<compile_context>
chip_gen: v7x
topology: tpu7x:2x2x1
jax: 0.10.0
libtpu: 0.0.40
codegen_flags: <defaults>
</compile_context>

<pallas_src>
import jax
import jax.numpy as jnp
from jax import lax
from jax.experimental import pallas as pl
from jax.experimental.pallas import tpu as pltpu


# ----------------------------------------------------------------------------
# helpers: padding / tile selection
# ----------------------------------------------------------------------------
def _round_up(x, m):
    return ((x + m - 1) // m) * m


def _dim_tile(d, target, align=128):
    """Pad d to a lane-aligned size and pick the tile.

    Every dim is padded to a multiple of `align` (=128 lanes) so any tile with
    this dim on the lane axis stores unmasked.  Dims <= target use one full
    block."""
    dp = _round_up(d, align)
    if dp <= target:
        return dp, dp
    dp = _round_up(d, target)
    return dp, target


def _pad2d(x, shape):
    r, c = x.shape
    rp, cp = shape
    if (r, c) == (rp, cp):
        return x
    return jnp.pad(x, ((0, rp - r), (0, cp - c)))


# ----------------------------------------------------------------------------
# dual shared-RHS matmul:  o1 = a1 @ b,  o2 = a2 @ b   (b tiles reused)
# ----------------------------------------------------------------------------
def _dual_rhs_kernel(a1_ref, a2_ref, b_ref, o1_ref, o2_ref, acc1, acc2):
    @pl.when(pl.program_id(2) == 0)
    def _init():
        acc1[...] = jnp.zeros_like(acc1)
        acc2[...] = jnp.zeros_like(acc2)

    b = b_ref[...]
    acc1[...] += jnp.dot(a1_ref[...], b, preferred_element_type=jnp.float32)
    acc2[...] += jnp.dot(a2_ref[...], b, preferred_element_type=jnp.float32)

    @pl.when(pl.program_id(2) == pl.num_programs(2) - 1)
    def _store():
        o1_ref[...] = acc1[...].astype(o1_ref.dtype)
        o2_ref[...] = acc2[...].astype(o2_ref.dtype)


def dual_rhs_matmul(a1, a2, b, *, tm, tn, tk, out_dtype=jnp.bfloat16):
    M, K = a1.shape
    K2, N = b.shape
    assert a2.shape == (M, K) and K == K2
    assert M % tm == 0 and N % tn == 0 and K % tk == 0
    grid = (M // tm, N // tn, K // tk)
    out_sd = jax.ShapeDtypeStruct((M, N), out_dtype)
    return pl.pallas_call(
        _dual_rhs_kernel,
        out_shape=(out_sd, out_sd),
        grid_spec=pltpu.PrefetchScalarGridSpec(
            num_scalar_prefetch=0,
            grid=grid,
            in_specs=[pl.BlockSpec((tm, tk), lambda i, j, k: (i, k)),
                      pl.BlockSpec((tm, tk), lambda i, j, k: (i, k)),
                      pl.BlockSpec((tk, tn), lambda i, j, k: (k, j))],
            out_specs=(pl.BlockSpec((tm, tn), lambda i, j, k: (i, j)),
                       pl.BlockSpec((tm, tn), lambda i, j, k: (i, j))),
            scratch_shapes=[pltpu.VMEM((tm, tn), jnp.float32),
                            pltpu.VMEM((tm, tn), jnp.float32)]),
        compiler_params=pltpu.CompilerParams(
            dimension_semantics=("parallel", "parallel", "arbitrary")),
    )(a1, a2, b)


# ----------------------------------------------------------------------------
# fused GCN adj layer: z = adj@xw, z_a = adj@xwa, with fused epilogue:
#   z (f32), z (bf16), relu(z) (bf16), relu(z_a) (bf16),
#   AvgReadout per-row-tile column sums for both branches.
# Each adj tile is read from HBM exactly once for both branches.
# ----------------------------------------------------------------------------
def _gcn_adj_kernel(adj_ref, xw_ref, xwa_ref,
                    z_ref, zb_ref, emb_ref, emba_ref, ps_ref, psa_ref,
                    acc1, acc2):
    @pl.when(pl.program_id(2) == 0)
    def _init():
        acc1[...] = jnp.zeros_like(acc1)
        acc2[...] = jnp.zeros_like(acc2)

    a = adj_ref[...]
    acc1[...] += jnp.dot(a, xw_ref[...], preferred_element_type=jnp.float32)
    acc2[...] += jnp.dot(a, xwa_ref[...], preferred_element_type=jnp.float32)

    @pl.when(pl.program_id(2) == pl.num_programs(2) - 1)
    def _store():
        z = acc1[...]
        za = acc2[...]
        e = jnp.maximum(z, 0.0)                      # fused ReLU (VPU filler)
        ea = jnp.maximum(za, 0.0)
        z_ref[...] = z                               # f32 hiden_emb
        zb_ref[...] = z.astype(zb_ref.dtype)         # bf16 copy for adj@z
        emb_ref[...] = e.astype(emb_ref.dtype)       # bf16 emb / emb_a
        emba_ref[...] = ea.astype(emba_ref.dtype)
        # AvgReadout partial column sums (f32), duplicated over 8 sublanes so
        # the store is unmasked; wrapper divides the total by 8.
        ps_ref[...] = jnp.broadcast_to(jnp.sum(e, axis=0, keepdims=True),
                                       ps_ref.shape)
        psa_ref[...] = jnp.broadcast_to(jnp.sum(ea, axis=0, keepdims=True),
                                        psa_ref.shape)


def gcn_adj_layer(adj_bf, xw, xwa, *, tm, tn, tk):
    Np, K = adj_bf.shape
    Hp = xw.shape[1]
    assert K == Np and xw.shape == (Np, Hp) and xwa.shape == (Np, Hp)
    assert Np % tm == 0 and Np % tk == 0 and Hp % tn == 0
    nti = Np // tm
    grid = (nti, Hp // tn, Np // tk)
    f32, bf16 = jnp.float32, jnp.bfloat16
    out_shapes = (jax.ShapeDtypeStruct((Np, Hp), f32),     # z (hiden_emb)
                  jax.ShapeDtypeStruct((Np, Hp), bf16),    # z bf16
                  jax.ShapeDtypeStruct((Np, Hp), bf16),    # emb = relu(z)
                  jax.ShapeDtypeStruct((Np, Hp), bf16),    # emb_a
                  jax.ShapeDtypeStruct((8 * nti, Hp), f32),  # readout partials
                  jax.ShapeDtypeStruct((8 * nti, Hp), f32))
    tile_spec = pl.BlockSpec((tm, tn), lambda i, j, k: (i, j))
    ps_spec = pl.BlockSpec((8, tn), lambda i, j, k: (i, j))
    return pl.pallas_call(
        _gcn_adj_kernel,
        out_shape=out_shapes,
        grid_spec=pltpu.PrefetchScalarGridSpec(
            num_scalar_prefetch=0,
            grid=grid,
            in_specs=[pl.BlockSpec((tm, tk), lambda i, j, k: (i, k)),
                      pl.BlockSpec((tk, tn), lambda i, j, k: (k, j)),
                      pl.BlockSpec((tk, tn), lambda i, j, k: (k, j))],
            out_specs=(tile_spec, tile_spec, tile_spec, tile_spec,
                       ps_spec, ps_spec),
            scratch_shapes=[pltpu.VMEM((tm, tn), f32),
                            pltpu.VMEM((tm, tn), f32)]),
        compiler_params=pltpu.CompilerParams(
            dimension_semantics=("parallel", "parallel", "arbitrary")),
    )(adj_bf, xw, xwa)


# ----------------------------------------------------------------------------
# fused h kernel: h = (adj @ z) @ W2  (== adj @ (z @ W2)).  adj@z is
# accumulated in VMEM over k and multiplied by a resident W2 block in the
# last-k epilogue; the intermediate never touches HBM.
# ----------------------------------------------------------------------------
def _adj_z_w2_kernel(adj_ref, zb_ref, w2_ref, h_ref, acc_ref):
    @pl.when(pl.program_id(1) == 0)
    def _init():
        acc_ref[...] = jnp.zeros_like(acc_ref)

    acc_ref[...] += jnp.dot(adj_ref[...], zb_ref[...],
                            preferred_element_type=jnp.float32)

    @pl.when(pl.program_id(1) == pl.num_programs(1) - 1)
    def _store():
        h_ref[...] = jnp.dot(acc_ref[...].astype(jnp.bfloat16), w2_ref[...],
                             preferred_element_type=jnp.float32)


def adj_z_w2(adj_bf, z_bf, w2_bf, *, tm, tk):
    Np = adj_bf.shape[0]
    Hp = z_bf.shape[1]
    Fp = w2_bf.shape[1]
    assert adj_bf.shape == (Np, Np) and z_bf.shape == (Np, Hp)
    assert w2_bf.shape == (Hp, Fp)
    assert Np % tm == 0 and Np % tk == 0
    grid = (Np // tm, Np // tk)
    return pl.pallas_call(
        _adj_z_w2_kernel,
        out_shape=jax.ShapeDtypeStruct((Np, Fp), jnp.float32),
        grid_spec=pltpu.PrefetchScalarGridSpec(
            num_scalar_prefetch=0,
            grid=grid,
            in_specs=[pl.BlockSpec((tm, tk), lambda i, k: (i, k)),
                      pl.BlockSpec((tk, Hp), lambda i, k: (k, 0)),
                      pl.BlockSpec((Hp, Fp), lambda i, k: (0, 0))],   # resident
            out_specs=pl.BlockSpec((tm, Fp), lambda i, k: (i, 0)),
            scratch_shapes=[pltpu.VMEM((tm, Hp), jnp.float32)]),
        compiler_params=pltpu.CompilerParams(
            dimension_semantics=("parallel", "arbitrary")),
    )(adj_bf, z_bf, w2_bf)


# ----------------------------------------------------------------------------
# fused Discriminator (Bilinear) for both (c, h_pl, h_mi) calls.
# cwstack = [Wb@g ; Wb@g_a] is a resident (2, Hp) LHS; two dot_generals per
# row tile produce all four logit rows, stored as one lane-dense (8, Np) slab.
# ----------------------------------------------------------------------------
def _disc_kernel(emb_ref, emba_ref, cw_ref, bias_ref, out_ref):
    e = emb_ref[...]                  # (TM, Hp) bf16
    ea = emba_ref[...]
    cwk = cw_ref[...]                 # (2, Hp): row0 = cw, row1 = cwa
    b = bias_ref[0, 0]
    dn = (((1,), (1,)), ((), ()))     # contract over H -> (2, TM)
    d_e = lax.dot_general(cwk, e, dn, preferred_element_type=jnp.float32)
    d_ea = lax.dot_general(cwk, ea, dn, preferred_element_type=jnp.float32)
    # rows: 0=cw.e 1=cwa.e 2=cw.ea 3=cwa.ea (then duplicated to fill 8
    # sublanes for an unmasked store; wrapper reads rows 0..3).
    out_ref[...] = jnp.concatenate([d_e, d_ea, d_e, d_ea], axis=0) + b


def discriminator(emb, emba, cwstack, bias, *, tm):
    Np, Hp = emb.shape
    assert emba.shape == (Np, Hp) and cwstack.shape == (2, Hp)
    assert Np % tm == 0
    grid = (Np // tm,)
    bias2d = jnp.reshape(bias.astype(jnp.float32), (1, 1))
    return pl.pallas_call(
        _disc_kernel,
        out_shape=jax.ShapeDtypeStruct((8, Np), jnp.float32),
        grid_spec=pltpu.PrefetchScalarGridSpec(
            num_scalar_prefetch=0,
            grid=grid,
            in_specs=[pl.BlockSpec((tm, Hp), lambda i: (i, 0)),
                      pl.BlockSpec((tm, Hp), lambda i: (i, 0)),
                      pl.BlockSpec((2, Hp), lambda i: (0, 0)),
                      pl.BlockSpec(memory_space=pltpu.MemorySpace.SMEM)],
            out_specs=pl.BlockSpec((8, tm), lambda i: (0, i))),
        compiler_params=pltpu.CompilerParams(
            dimension_semantics=("parallel",)),
    )(emb, emba, cwstack, bias2d)


# ----------------------------------------------------------------------------
# Encoder forward
# ----------------------------------------------------------------------------
TM_TARGET = 512   # node-row / adj-reduction tile (512x512 bf16 adj tile)
TF_TARGET = 512   # in_features tile
TH_TARGET = 256   # hidden-dim tile


def encoder_forward(params, feat, feat_a, adj):
    # TODO(synk): AvgReadout mask (graph_neigh) path not implemented — the
    # reference forward defaults to graph_neigh=None (plain mean readout).
    # TODO(synk): no full-VMEM-resident single-call path for tiny graphs yet;
    # adj is still streamed from HBM twice (gcn layer and the h kernel).
    W1, W2, Wb, bb = params["W1"], params["W2"], params["Wb"], params["bb"]
    N, F = feat.shape
    H = W1.shape[1]

    Np, TMr = _dim_tile(N, TM_TARGET)     # rows and both adj dims (128-aligned)
    Fp, TF = _dim_tile(F, TF_TARGET)
    Hp, TH = _dim_tile(H, TH_TARGET)
    TKn = TMr                             # adj reduction tile

    bf16 = jnp.bfloat16
    feat_p = _pad2d(feat, (Np, Fp)).astype(bf16)
    feata_p = _pad2d(feat_a, (Np, Fp)).astype(bf16)
    adj_p = _pad2d(adj, (Np, Np)).astype(bf16)
    W1_p = _pad2d(W1, (Fp, Hp)).astype(bf16)
    W2_p = _pad2d(W2, (Hp, Fp)).astype(bf16)
    Wb_p = _pad2d(Wb, (Hp, Hp))

    # dropout(p=0.0) == identity

    # 1) xw = feat @ W1 ; xwa = feat_a @ W1   (one fused call, W1 reused)
    xw, xwa = dual_rhs_matmul(feat_p, feata_p, W1_p, tm=TMr, tn=TH, tk=TF)

    # 2) z = adj@xw ; z_a = adj@xwa ; fused ReLU, bf16 copies, readout partials
    z, z_bf, emb, emba, psum, psuma = gcn_adj_layer(adj_p, xw, xwa,
                                                    tm=TMr, tn=TH, tk=TKn)

    # 3) h = adj @ (z @ W2) computed as (adj @ z) @ W2 in one fused call
    #    (identical math; keeps the big adj matmul on the narrow hidden dim).
    h = adj_z_w2(adj_p, z_bf, W2_p, tm=TMr, tk=TKn)

    # 4) finish AvgReadout on the tiny partial sums (XLA): mean over true N,
    #    L2-normalize, sigmoid; then cw = Wb @ g for the bilinear disc.
    def finish(ps):
        m = (jnp.sum(ps, axis=0, keepdims=True) / 8.0) / float(N)
        nrm = jnp.sqrt(jnp.sum(m * m, axis=1, keepdims=True))
        return jax.nn.sigmoid(m / jnp.maximum(nrm, 1e-12))

    g = finish(psum)
    ga = finish(psuma)
    cwstack = jnp.concatenate([g @ Wb_p.T, ga @ Wb_p.T], axis=0).astype(bf16)

    # 5) Discriminator: lane-dense (8, Np) logits, split/transposed in XLA.
    logits = discriminator(emb, emba, cwstack, bb, tm=TMr)

    hiden_emb = z[:N, :H]
    h_out = h[:N, :F]
    ret = jnp.stack([logits[0, :N], logits[2, :N]], axis=1)     # (N, 2)
    ret_a = jnp.stack([logits[3, :N], logits[1, :N]], axis=1)
    return hiden_emb, h_out, ret, ret_a


# ----------------------------------------------------------------------------
# parameter init (matches reference: xavier_uniform weights, zero bilinear bias)
# ----------------------------------------------------------------------------
def init_params(key, in_features, out_features):
    def xavier(k, shape):
        bound = float(jnp.sqrt(6.0 / (shape[0] + shape[1])))
        return jax.random.uniform(k, shape, jnp.float32, -bound, bound)

    k1, k2, k3 = jax.random.split(key, 3)
    return {
        "W1": xavier(k1, (in_features, out_features)),
        "W2": xavier(k2, (out_features, in_features)),
        "Wb": xavier(k3, (out_features, out_features)),   # nn.Bilinear weight[0]
        "bb": jnp.zeros((), jnp.float32),                  # nn.Bilinear bias
    }


# ----------------------------------------------------------------------------
# pure-JAX reference with the same bf16-in / f32-accumulate policy
# ----------------------------------------------------------------------------
def reference_forward(params, feat, feat_a, adj):
    W1, W2, Wb, bb = params["W1"], params["W2"], params["Wb"], params["bb"]
    bf16, f32 = jnp.bfloat16, jnp.float32
    mm = lambda a, b: jnp.dot(a.astype(bf16), b.astype(bf16),
                              preferred_element_type=f32)

    xw, xwa = mm(feat, W1).astype(bf16), mm(feat_a, W1).astype(bf16)
    z, z_a = mm(adj, xw), mm(adj, xwa)
    emb, emb_a = jnp.maximum(z, 0.0), jnp.maximum(z_a, 0.0)
    h = mm(mm(adj, z).astype(bf16), W2)        # == adj @ (z @ W2)

    def read(e):
        m = jnp.mean(e, axis=0, keepdims=True)
        v = m / jnp.maximum(jnp.sqrt(jnp.sum(m * m, axis=1, keepdims=True)), 1e-12)
        return jax.nn.sigmoid(v)

    g, g_a = read(emb), read(emb_a)
    cw, cwa = g @ Wb.T, g_a @ Wb.T
    ret = jnp.concatenate([mm(emb, cw.T), mm(emb_a, cw.T)], axis=1) + bb
    ret_a = jnp.concatenate([mm(emb_a, cwa.T), mm(emb, cwa.T)], axis=1) + bb
    return z, h, ret, ret_a


def _check(name, got, want, tol=2e-2):
    got = jnp.asarray(got, jnp.float32)
    want = jnp.asarray(want, jnp.float32)
    scale = jnp.maximum(jnp.max(jnp.abs(want)), 1e-3)
    err = float(jnp.max(jnp.abs(got - want)) / scale)
    if not err < tol:
        raise AssertionError(f"{name}: max rel-to-max error {err:.4g} > {tol}")


# ----------------------------------------------------------------------------
if __name__ == "__main__":
    key = jax.random.PRNGKey(0)
    N, F, H = 300, 80, 32     # small graph: 300 nodes, 80 features, hidden 32
    kf, kfa, ka, kp = jax.random.split(key, 4)

    feat = jax.random.normal(kf, (N, F), jnp.float32)
    feat_a = jax.random.normal(kfa, (N, F), jnp.float32)
    # row-normalized random adjacency with self loops (typical GCN adj)
    a = (jax.random.uniform(ka, (N, N)) < 0.05).astype(jnp.float32)
    a = a + jnp.eye(N, dtype=jnp.float32)
    adj = a / jnp.sum(a, axis=1, keepdims=True)

    params = init_params(kp, F, H)

    fwd = jax.jit(encoder_forward)
    hiden_emb, h, ret, ret_a = fwd(params, feat, feat_a, adj)
    jax.block_until_ready((hiden_emb, h, ret, ret_a))

    # light correctness check against a pure-JAX reference (same bf16 policy)
    ref = reference_forward(params, feat, feat_a, adj)
    for name, got, want in zip(("hiden_emb", "h", "ret", "ret_a"),
                               (hiden_emb, h, ret, ret_a), ref):
        assert got.shape == want.shape, (name, got.shape, want.shape)
        _check(name, got, want)

    print("KERNEL_OK")
</pallas_src>

<mosaic_0001>
module attributes {stable_mosaic.version = 11 : i64} {
  func.func @_dual_rhs_kernel(%arg0: i32, %arg1: i32, %arg2: i32, %arg3: memref<384x128xbf16, #tpu.memory_space<vmem>>, %arg4: memref<384x128xbf16, #tpu.memory_space<vmem>>, %arg5: memref<128x128xbf16, #tpu.memory_space<vmem>>, %arg6: memref<384x128xbf16, #tpu.memory_space<vmem>>, %arg7: memref<384x128xbf16, #tpu.memory_space<vmem>>, %arg8: memref<384x128xf32, #tpu.memory_space<vmem>>, %arg9: memref<384x128xf32, #tpu.memory_space<vmem>>) attributes {dimension_semantics = [#tpu.dimension_semantics<parallel>, #tpu.dimension_semantics<parallel>, #tpu.dimension_semantics<arbitrary>], iteration_bounds = array<i64: 1, 1, 1>, scalar_prefetch = 0 : i64, scratch_operands = 2 : i64, tpu.core_type = #tpu.core_type<tc>, window_params = [{transform_indices = @transform_0, window_bounds = array<i64: 384, 128>}, {transform_indices = @transform_1, window_bounds = array<i64: 384, 128>}, {transform_indices = @transform_2, window_bounds = array<i64: 128, 128>}, {transform_indices = @transform_3, window_bounds = array<i64: 384, 128>}, {transform_indices = @transform_4, window_bounds = array<i64: 384, 128>}]} {
    %c0_i32 = arith.constant 0 : i32
    %0 = arith.cmpi eq, %arg2, %c0_i32 : i32
    %1 = arith.extui %0 : i1 to i32
    %c0_i32_0 = arith.constant 0 : i32
    %2 = arith.cmpi ne, %1, %c0_i32_0 : i32
    scf.if %2 {
      %cst_17 = arith.constant 0.000000e+00 : f32
      %17 = vector.broadcast %cst_17 : f32 to vector<384x128xf32>
      %c0_18 = arith.constant 0 : index
      %c0_19 = arith.constant 0 : index
      %18 = vector.load %arg8[%c0_18, %c0_19] : memref<384x128xf32, #tpu.memory_space<vmem>>, vector<384x128xf32>
      tpu.vector_store %arg8[%c0_18, %c0_19], %17 {strides = array<i32>} : memref<384x128xf32, #tpu.memory_space<vmem>>, vector<384x128xf32>,
      %cst_20 = arith.constant 0.000000e+00 : f32
      %19 = vector.broadcast %cst_20 : f32 to vector<384x128xf32>
      %c0_21 = arith.constant 0 : index
      %c0_22 = arith.constant 0 : index
      %20 = vector.load %arg9[%c0_21, %c0_22] : memref<384x128xf32, #tpu.memory_space<vmem>>, vector<384x128xf32>
      tpu.vector_store %arg9[%c0_21, %c0_22], %19 {strides = array<i32>} : memref<384x128xf32, #tpu.memory_space<vmem>>, vector<384x128xf32>,
    } else {
    }
    %c0 = arith.constant 0 : index
    %c0_1 = arith.constant 0 : index
    %3 = vector.load %arg5[%c0, %c0_1] : memref<128x128xbf16, #tpu.memory_space<vmem>>, vector<128x128xbf16>
    %c0_2 = arith.constant 0 : index
    %c0_3 = arith.constant 0 : index
    %4 = vector.load %arg8[%c0_2, %c0_3] : memref<384x128xf32, #tpu.memory_space<vmem>>, vector<384x128xf32>
    %c0_4 = arith.constant 0 : index
    %c0_5 = arith.constant 0 : index
    %5 = vector.load %arg3[%c0_4, %c0_5] : memref<384x128xbf16, #tpu.memory_space<vmem>>, vector<384x128xbf16>
    %cst = arith.constant dense<0.000000e+00> : vector<384x128xf32>
    %6 = tpu.matmul %5, %3, %cst {dimension_numbers = #tpu.dot_dimension_numbers<[1], [0], [0], [1], [0, 0, 1, 1], [], []>} : vector<384x128xbf16>, vector<128x128xbf16>, vector<384x128xf32> -> vector<384x128xf32>
    %7 = arith.addf %4, %6 : vector<384x128xf32>
    %c0_6 = arith.constant 0 : index
    %c0_7 = arith.constant 0 : index
    %8 = vector.load %arg8[%c0_6, %c0_7] : memref<384x128xf32, #tpu.memory_space<vmem>>, vector<384x128xf32>
    tpu.vector_store %arg8[%c0_6, %c0_7], %7 {strides = array<i32>} : memref<384x128xf32, #tpu.memory_space<vmem>>, vector<384x128xf32>,
    %c0_8 = arith.constant 0 : index
    %c0_9 = arith.constant 0 : index
    %9 = vector.load %arg9[%c0_8, %c0_9] : memref<384x128xf32, #tpu.memory_space<vmem>>, vector<384x128xf32>
    %c0_10 = arith.constant 0 : index
    %c0_11 = arith.constant 0 : index
    %10 = vector.load %arg4[%c0_10, %c0_11] : memref<384x128xbf16, #tpu.memory_space<vmem>>, vector<384x128xbf16>
    %cst_12 = arith.constant dense<0.000000e+00> : vector<384x128xf32>
    %11 = tpu.matmul %10, %3, %cst_12 {dimension_numbers = #tpu.dot_dimension_numbers<[1], [0], [0], [1], [0, 0, 1, 1], [], []>} : vector<384x128xbf16>, vector<128x128xbf16>, vector<384x128xf32> -> vector<384x128xf32>
    %12 = arith.addf %9, %11 : vector<384x128xf32>
    %c0_13 = arith.constant 0 : index
    %c0_14 = arith.constant 0 : index
    %13 = vector.load %arg9[%c0_13, %c0_14] : memref<384x128xf32, #tpu.memory_space<vmem>>, vector<384x128xf32>
    tpu.vector_store %arg9[%c0_13, %c0_14], %12 {strides = array<i32>} : memref<384x128xf32, #tpu.memory_space<vmem>>, vector<384x128xf32>,
    %c0_i32_15 = arith.constant 0 : i32
    %14 = arith.cmpi eq, %arg2, %c0_i32_15 : i32
    %15 = arith.extui %14 : i1 to i32
    %c0_i32_16 = arith.constant 0 : i32
    %16 = arith.cmpi ne, %15, %c0_i32_16 : i32
    scf.if %16 {
      %c0_17 = arith.constant 0 : index
      %c0_18 = arith.constant 0 : index
      %17 = vector.load %arg8[%c0_17, %c0_18] : memref<384x128xf32, #tpu.memory_space<vmem>>, vector<384x128xf32>
      %18 = arith.truncf %17 : vector<384x128xf32> to vector<384x128xbf16>
      %c0_19 = arith.constant 0 : index
      %c0_20 = arith.constant 0 : index
      %19 = vector.load %arg6[%c0_19, %c0_20] : memref<384x128xbf16, #tpu.memory_space<vmem>>, vector<384x128xbf16>
      tpu.vector_store %arg6[%c0_19, %c0_20], %18 {strides = array<i32>} : memref<384x128xbf16, #tpu.memory_space<vmem>>, vector<384x128xbf16>,
      %c0_21 = arith.constant 0 : index
      %c0_22 = arith.constant 0 : index
      %20 = vector.load %arg9[%c0_21, %c0_22] : memref<384x128xf32, #tpu.memory_space<vmem>>, vector<384x128xf32>
      %21 = arith.truncf %20 : vector<384x128xf32> to vector<384x128xbf16>
      %c0_23 = arith.constant 0 : index
      %c0_24 = arith.constant 0 : index
      %22 = vector.load %arg7[%c0_23, %c0_24] : memref<384x128xbf16, #tpu.memory_space<vmem>>, vector<384x128xbf16>
      tpu.vector_store %arg7[%c0_23, %c0_24], %21 {strides = array<i32>} : memref<384x128xbf16, #tpu.memory_space<vmem>>, vector<384x128xbf16>,
    } else {
    }
    return
  }
  func.func @transform_0(%arg0: i32, %arg1: i32, %arg2: i32) -> (i32, i32) {
    %c0_i32 = arith.constant 0 : i32
    return %arg0, %arg2 : i32, i32
  }
  func.func @transform_1(%arg0: i32, %arg1: i32, %arg2: i32) -> (i32, i32) {
    %c0_i32 = arith.constant 0 : i32
    return %arg0, %arg2 : i32, i32
  }
  func.func @transform_2(%arg0: i32, %arg1: i32, %arg2: i32) -> (i32, i32) {
    %c0_i32 = arith.constant 0 : i32
    return %arg2, %arg1 : i32, i32
  }
  func.func @transform_3(%arg0: i32, %arg1: i32, %arg2: i32) -> (i32, i32) {
    %c0_i32 = arith.constant 0 : i32
    return %arg0, %arg1 : i32, i32
  }
  func.func @transform_4(%arg0: i32, %arg1: i32, %arg2: i32) -> (i32, i32) {
    %c0_i32 = arith.constant 0 : i32
    return %arg0, %arg1 : i32, i32
  }
}

module attributes {stable_mosaic.version = 11 : i64} {
  func.func @_gcn_adj_kernel(%arg0: i32, %arg1: i32, %arg2: i32, %arg3: memref<384x384xbf16, #tpu.memory_space<vmem>>, %arg4: memref<384x128xbf16, #tpu.memory_space<vmem>>, %arg5: memref<384x128xbf16, #tpu.memory_space<vmem>>, %arg6: memref<384x128xf32, #tpu.memory_space<vmem>>, %arg7: memref<384x128xbf16, #tpu.memory_space<vmem>>, %arg8: memref<384x128xbf16, #tpu.memory_space<vmem>>, %arg9: memref<384x128xbf16, #tpu.memory_space<vmem>>, %arg10: memref<8x128xf32, #tpu.memory_space<vmem>>, %arg11: memref<8x128xf32, #tpu.memory_space<vmem>>, %arg12: memref<384x128xf32, #tpu.memory_space<vmem>>, %arg13: memref<384x128xf32, #tpu.memory_space<vmem>>) attributes {dimension_semantics = [#tpu.dimension_semantics<parallel>, #tpu.dimension_semantics<parallel>, #tpu.dimension_semantics<arbitrary>], iteration_bounds = array<i64: 1, 1, 1>, scalar_prefetch = 0 : i64, scratch_operands = 2 : i64, tpu.core_type = #tpu.core_type<tc>, window_params = [{transform_indices = @transform_0, window_bounds = array<i64: 384, 384>}, {transform_indices = @transform_1, window_bounds = array<i64: 384, 128>}, {transform_indices = @transform_2, window_bounds = array<i64: 384, 128>}, {transform_indices = @transform_3, window_bounds = array<i64: 384, 128>}, {transform_indices = @transform_4, window_bounds = array<i64: 384, 128>}, {transform_indices = @transform_5, window_bounds = array<i64: 384, 128>}, {transform_indices = @transform_6, window_bounds = array<i64: 384, 128>}, {transform_indices = @transform_7, window_bounds = array<i64: 8, 128>}, {transform_indices = @transform_8, window_bounds = array<i64: 8, 128>}]} {
    %c0_i32 = arith.constant 0 : i32
    %0 = arith.cmpi eq, %arg2, %c0_i32 : i32
    %1 = arith.extui %0 : i1 to i32
    %c0_i32_0 = arith.constant 0 : i32
    %2 = arith.cmpi ne, %1, %c0_i32_0 : i32
    scf.if %2 {
      %cst_17 = arith.constant 0.000000e+00 : f32
      %17 = vector.broadcast %cst_17 : f32 to vector<384x128xf32>
      %c0_18 = arith.constant 0 : index
      %c0_19 = arith.constant 0 : index
      %18 = vector.load %arg12[%c0_18, %c0_19] : memref<384x128xf32, #tpu.memory_space<vmem>>, vector<384x128xf32>
      tpu.vector_store %arg12[%c0_18, %c0_19], %17 {strides = array<i32>} : memref<384x128xf32, #tpu.memory_space<vmem>>, vector<384x128xf32>,
      %cst_20 = arith.constant 0.000000e+00 : f32
      %19 = vector.broadcast %cst_20 : f32 to vector<384x128xf32>
      %c0_21 = arith.constant 0 : index
      %c0_22 = arith.constant 0 : index
      %20 = vector.load %arg13[%c0_21, %c0_22] : memref<384x128xf32, #tpu.memory_space<vmem>>, vector<384x128xf32>
      tpu.vector_store %arg13[%c0_21, %c0_22], %19 {strides = array<i32>} : memref<384x128xf32, #tpu.memory_space<vmem>>, vector<384x128xf32>,
    } else {
    }
    %c0 = arith.constant 0 : index
    %c0_1 = arith.constant 0 : index
    %3 = vector.load %arg3[%c0, %c0_1] : memref<384x384xbf16, #tpu.memory_space<vmem>>, vector<384x384xbf16>
    %c0_2 = arith.constant 0 : index
    %c0_3 = arith.constant 0 : index
    %4 = vector.load %arg12[%c0_2, %c0_3] : memref<384x128xf32, #tpu.memory_space<vmem>>, vector<384x128xf32>
    %c0_4 = arith.constant 0 : index
    %c0_5 = arith.constant 0 : index
    %5 = vector.load %arg4[%c0_4, %c0_5] : memref<384x128xbf16, #tpu.memory_space<vmem>>, vector<384x128xbf16>
    %cst = arith.constant dense<0.000000e+00> : vector<384x128xf32>
    %6 = tpu.matmul %3, %5, %cst {dimension_numbers = #tpu.dot_dimension_numbers<[1], [0], [0], [1], [0, 0, 1, 1], [], []>} : vector<384x384xbf16>, vector<384x128xbf16>, vector<384x128xf32> -> vector<384x128xf32>
    %7 = arith.addf %4, %6 : vector<384x128xf32>
    %c0_6 = arith.constant 0 : index
    %c0_7 = arith.constant 0 : index
    %8 = vector.load %arg12[%c0_6, %c0_7] : memref<384x128xf32, #tpu.memory_space<vmem>>, vector<384x128xf32>
    tpu.vector_store %arg12[%c0_6, %c0_7], %7 {strides = array<i32>} : memref<384x128xf32, #tpu.memory_space<vmem>>, vector<384x128xf32>,
    %c0_8 = arith.constant 0 : index
    %c0_9 = arith.constant 0 : index
    %9 = vector.load %arg13[%c0_8, %c0_9] : memref<384x128xf32, #tpu.memory_space<vmem>>, vector<384x128xf32>
    %c0_10 = arith.constant 0 : index
    %c0_11 = arith.constant 0 : index
    %10 = vector.load %arg5[%c0_10, %c0_11] : memref<384x128xbf16, #tpu.memory_space<vmem>>, vector<384x128xbf16>
    %cst_12 = arith.constant dense<0.000000e+00> : vector<384x128xf32>
    %11 = tpu.matmul %3, %10, %cst_12 {dimension_numbers = #tpu.dot_dimension_numbers<[1], [0], [0], [1], [0, 0, 1, 1], [], []>} : vector<384x384xbf16>, vector<384x128xbf16>, vector<384x128xf32> -> vector<384x128xf32>
    %12 = arith.addf %9, %11 : vector<384x128xf32>
    %c0_13 = arith.constant 0 : index
    %c0_14 = arith.constant 0 : index
    %13 = vector.load %arg13[%c0_13, %c0_14] : memref<384x128xf32, #tpu.memory_space<vmem>>, vector<384x128xf32>
    tpu.vector_store %arg13[%c0_13, %c0_14], %12 {strides = array<i32>} : memref<384x128xf32, #tpu.memory_space<vmem>>, vector<384x128xf32>,
    %c0_i32_15 = arith.constant 0 : i32
    %14 = arith.cmpi eq, %arg2, %c0_i32_15 : i32
    %15 = arith.extui %14 : i1 to i32
    %c0_i32_16 = arith.constant 0 : i32
    %16 = arith.cmpi ne, %15, %c0_i32_16 : i32
    scf.if %16 {
      %c0_17 = arith.constant 0 : index
      %c0_18 = arith.constant 0 : index
      %17 = vector.load %arg12[%c0_17, %c0_18] : memref<384x128xf32, #tpu.memory_space<vmem>>, vector<384x128xf32>
      %c0_19 = arith.constant 0 : index
      %c0_20 = arith.constant 0 : index
      %18 = vector.load %arg13[%c0_19, %c0_20] : memref<384x128xf32, #tpu.memory_space<vmem>>, vector<384x128xf32>
      %cst_21 = arith.constant 0.000000e+00 : f32
      %19 = vector.broadcast %cst_21 : f32 to vector<384x128xf32>
      %20 = arith.maximumf %17, %19 : vector<384x128xf32>
      %cst_22 = arith.constant 0.000000e+00 : f32
      %21 = vector.broadcast %cst_22 : f32 to vector<384x128xf32>
      %22 = arith.maximumf %18, %21 : vector<384x128xf32>
      %c0_23 = arith.constant 0 : index
      %c0_24 = arith.constant 0 : index
      %23 = vector.load %arg6[%c0_23, %c0_24] : memref<384x128xf32, #tpu.memory_space<vmem>>, vector<384x128xf32>
      tpu.vector_store %arg6[%c0_23, %c0_24], %17 {strides = array<i32>} : memref<384x128xf32, #tpu.memory_space<vmem>>, vector<384x128xf32>,
      %24 = arith.truncf %17 : vector<384x128xf32> to vector<384x128xbf16>
      %c0_25 = arith.constant 0 : index
      %c0_26 = arith.constant 0 : index
      %25 = vector.load %arg7[%c0_25, %c0_26] : memref<384x128xbf16, #tpu.memory_space<vmem>>, vector<384x128xbf16>
      tpu.vector_store %arg7[%c0_25, %c0_26], %24 {strides = array<i32>} : memref<384x128xbf16, #tpu.memory_space<vmem>>, vector<384x128xbf16>,
      %26 = arith.truncf %20 : vector<384x128xf32> to vector<384x128xbf16>
      %c0_27 = arith.constant 0 : index
      %c0_28 = arith.constant 0 : index
      %27 = vector.load %arg8[%c0_27, %c0_28] : memref<384x128xbf16, #tpu.memory_space<vmem>>, vector<384x128xbf16>
      tpu.vector_store %arg8[%c0_27, %c0_28], %26 {strides = array<i32>} : memref<384x128xbf16, #tpu.memory_space<vmem>>, vector<384x128xbf16>,
      %28 = arith.truncf %22 : vector<384x128xf32> to vector<384x128xbf16>
      %c0_29 = arith.constant 0 : index
      %c0_30 = arith.constant 0 : index
      %29 = vector.load %arg9[%c0_29, %c0_30] : memref<384x128xbf16, #tpu.memory_space<vmem>>, vector<384x128xbf16>
      tpu.vector_store %arg9[%c0_29, %c0_30], %28 {strides = array<i32>} : memref<384x128xbf16, #tpu.memory_space<vmem>>, vector<384x128xbf16>,
      %cst_31 = arith.constant dense<0.000000e+00> : vector<128xf32>
      %30 = vector.multi_reduction <add>, %20, %cst_31 [0] : vector<384x128xf32> to vector<128xf32>
      %31 = vector.shape_cast %30 : vector<128xf32> to vector<1x128xf32>
      %32 = vector.shape_cast %31 : vector<1x128xf32> to vector<1x128xf32>
      %33 = vector.broadcast %32 : vector<1x128xf32> to vector<8x128xf32>
      %c0_32 = arith.constant 0 : index
      %c0_33 = arith.constant 0 : index
      %34 = vector.load %arg10[%c0_32, %c0_33] : memref<8x128xf32, #tpu.memory_space<vmem>>, vector<8x128xf32>
      tpu.vector_store %arg10[%c0_32, %c0_33], %33 {strides = array<i32>} : memref<8x128xf32, #tpu.memory_space<vmem>>, vector<8x128xf32>,
      %cst_34 = arith.constant dense<0.000000e+00> : vector<128xf32>
      %35 = vector.multi_reduction <add>, %22, %cst_34 [0] : vector<384x128xf32> to vector<128xf32>
      %36 = vector.shape_cast %35 : vector<128xf32> to vector<1x128xf32>
      %37 = vector.shape_cast %36 : vector<1x128xf32> to vector<1x128xf32>
      %38 = vector.broadcast %37 : vector<1x128xf32> to vector<8x128xf32>
      %c0_35 = arith.constant 0 : index
      %c0_36 = arith.constant 0 : index
      %39 = vector.load %arg11[%c0_35, %c0_36] : memref<8x128xf32, #tpu.memory_space<vmem>>, vector<8x128xf32>
      tpu.vector_store %arg11[%c0_35, %c0_36], %38 {strides = array<i32>} : memref<8x128xf32, #tpu.memory_space<vmem>>, vector<8x128xf32>,
    } else {
    }
    return
  }
  func.func @transform_0(%arg0: i32, %arg1: i32, %arg2: i32) -> (i32, i32) {
    %c0_i32 = arith.constant 0 : i32
    return %arg0, %arg2 : i32, i32
  }
  func.func @transform_1(%arg0: i32, %arg1: i32, %arg2: i32) -> (i32, i32) {
    %c0_i32 = arith.constant 0 : i32
    return %arg2, %arg1 : i32, i32
  }
  func.func @transform_2(%arg0: i32, %arg1: i32, %arg2: i32) -> (i32, i32) {
    %c0_i32 = arith.constant 0 : i32
    return %arg2, %arg1 : i32, i32
  }
  func.func @transform_3(%arg0: i32, %arg1: i32, %arg2: i32) -> (i32, i32) {
    %c0_i32 = arith.constant 0 : i32
    return %arg0, %arg1 : i32, i32
  }
  func.func @transform_4(%arg0: i32, %arg1: i32, %arg2: i32) -> (i32, i32) {
    %c0_i32 = arith.constant 0 : i32
    return %arg0, %arg1 : i32, i32
  }
  func.func @transform_5(%arg0: i32, %arg1: i32, %arg2: i32) -> (i32, i32) {
    %c0_i32 = arith.constant 0 : i32
    return %arg0, %arg1 : i32, i32
  }
  func.func @transform_6(%arg0: i32, %arg1: i32, %arg2: i32) -> (i32, i32) {
    %c0_i32 = arith.constant 0 : i32
    return %arg0, %arg1 : i32, i32
  }
  func.func @transform_7(%arg0: i32, %arg1: i32, %arg2: i32) -> (i32, i32) {
    %c0_i32 = arith.constant 0 : i32
    return %arg0, %arg1 : i32, i32
  }
  func.func @transform_8(%arg0: i32, %arg1: i32, %arg2: i32) -> (i32, i32) {
    %c0_i32 = arith.constant 0 : i32
    return %arg0, %arg1 : i32, i32
  }
}

module attributes {stable_mosaic.version = 11 : i64} {
  func.func @_disc_kernel(%arg0: i32, %arg1: memref<384x128xbf16, #tpu.memory_space<vmem>>, %arg2: memref<384x128xbf16, #tpu.memory_space<vmem>>, %arg3: memref<2x128xbf16, #tpu.memory_space<vmem>>, %arg4: memref<1x1xf32, #tpu.memory_space<smem>>, %arg5: memref<8x384xf32, #tpu.memory_space<vmem>>) attributes {dimension_semantics = [#tpu.dimension_semantics<parallel>], iteration_bounds = array<i64: 1>, scalar_prefetch = 0 : i64, scratch_operands = 0 : i64, tpu.core_type = #tpu.core_type<tc>, window_params = [{transform_indices = @transform_0, window_bounds = array<i64: 384, 128>}, {transform_indices = @transform_1, window_bounds = array<i64: 384, 128>}, {pipeline_mode = #tpu.pipeline_mode<synchronous>, transform_indices = @transform_2, window_bounds = array<i64: 2, 128>}, {transform_indices = @transform_3, window_bounds = array<i64: 1, 1>}, {transform_indices = @transform_4, window_bounds = array<i64: 8, 384>}]} {
    %c0 = arith.constant 0 : index
    %c0_0 = arith.constant 0 : index
    %0 = vector.load %arg1[%c0, %c0_0] : memref<384x128xbf16, #tpu.memory_space<vmem>>, vector<384x128xbf16>
    %c0_1 = arith.constant 0 : index
    %c0_2 = arith.constant 0 : index
    %1 = vector.load %arg2[%c0_1, %c0_2] : memref<384x128xbf16, #tpu.memory_space<vmem>>, vector<384x128xbf16>
    %c0_3 = arith.constant 0 : index
    %c0_4 = arith.constant 0 : index
    %2 = vector.load %arg3[%c0_3, %c0_4] : memref<2x128xbf16, #tpu.memory_space<vmem>>, vector<2x128xbf16>
    %c0_5 = arith.constant 0 : index
    %c0_6 = arith.constant 0 : index
    %3 = memref.load %arg4[%c0_5, %c0_6] : memref<1x1xf32, #tpu.memory_space<smem>>
    %cst = arith.constant dense<0.000000e+00> : vector<2x384xf32>
    %4 = tpu.matmul %2, %0, %cst {dimension_numbers = #tpu.dot_dimension_numbers<[1], [1], [0], [0], [0, 0, 1, 0], [], []>} : vector<2x128xbf16>, vector<384x128xbf16>, vector<2x384xf32> -> vector<2x384xf32>
    %cst_7 = arith.constant dense<0.000000e+00> : vector<2x384xf32>
    %5 = tpu.matmul %2, %1, %cst_7 {dimension_numbers = #tpu.dot_dimension_numbers<[1], [1], [0], [0], [0, 0, 1, 0], [], []>} : vector<2x128xbf16>, vector<384x128xbf16>, vector<2x384xf32> -> vector<2x384xf32>
    %6 = tpu.concatenate %4, %5, %4, %5 in 0 : vector<2x384xf32>, vector<2x384xf32>, vector<2x384xf32>, vector<2x384xf32> -> vector<8x384xf32>
    %7 = vector.broadcast %3 : f32 to vector<8x384xf32>
    %8 = arith.addf %6, %7 : vector<8x384xf32>
    %c0_8 = arith.constant 0 : index
    %c0_9 = arith.constant 0 : index
    %9 = vector.load %arg5[%c0_8, %c0_9] : memref<8x384xf32, #tpu.memory_space<vmem>>, vector<8x384xf32>
    tpu.vector_store %arg5[%c0_8, %c0_9], %8 {strides = array<i32>} : memref<8x384xf32, #tpu.memory_space<vmem>>, vector<8x384xf32>,
    return
  }
  func.func @transform_0(%arg0: i32) -> (i32, i32) {
    %c0_i32 = arith.constant 0 : i32
    %c0_i32_0 = arith.constant 0 : i32
    return %arg0, %c0_i32 : i32, i32
  }
  func.func @transform_1(%arg0: i32) -> (i32, i32) {
    %c0_i32 = arith.constant 0 : i32
    %c0_i32_0 = arith.constant 0 : i32
    return %arg0, %c0_i32 : i32, i32
  }
  func.func @transform_2(%arg0: i32) -> (i32, i32) {
    %c0_i32 = arith.constant 0 : i32
    %c0_i32_0 = arith.constant 0 : i32
    %c0_i32_1 = arith.constant 0 : i32
    return %c0_i32, %c0_i32_0 : i32, i32
  }
  func.func @transform_3(%arg0: i32) -> (i32, i32) {
    %c0_i32 = arith.constant 0 : i32
    %c0_i32_0 = arith.constant 0 : i32
    %c0_i32_1 = arith.constant 0 : i32
    return %c0_i32, %c0_i32_0 : i32, i32
  }
  func.func @transform_4(%arg0: i32) -> (i32, i32) {
    %c0_i32 = arith.constant 0 : i32
    %c0_i32_0 = arith.constant 0 : i32
    return %c0_i32, %arg0 : i32, i32
  }
}

module attributes {stable_mosaic.version = 11 : i64} {
  func.func @_adj_z_w2_kernel(%arg0: i32, %arg1: i32, %arg2: memref<384x384xbf16, #tpu.memory_space<vmem>>, %arg3: memref<384x128xbf16, #tpu.memory_space<vmem>>, %arg4: memref<128x128xbf16, #tpu.memory_space<vmem>>, %arg5: memref<384x128xf32, #tpu.memory_space<vmem>>, %arg6: memref<384x128xf32, #tpu.memory_space<vmem>>) attributes {dimension_semantics = [#tpu.dimension_semantics<parallel>, #tpu.dimension_semantics<arbitrary>], iteration_bounds = array<i64: 1, 1>, scalar_prefetch = 0 : i64, scratch_operands = 1 : i64, tpu.core_type = #tpu.core_type<tc>, window_params = [{transform_indices = @transform_0, window_bounds = array<i64: 384, 384>}, {transform_indices = @transform_1, window_bounds = array<i64: 384, 128>}, {pipeline_mode = #tpu.pipeline_mode<synchronous>, transform_indices = @transform_2, window_bounds = array<i64: 128, 128>}, {transform_indices = @transform_3, window_bounds = array<i64: 384, 128>}]} {
    %c0_i32 = arith.constant 0 : i32
    %0 = arith.cmpi eq, %arg1, %c0_i32 : i32
    %1 = arith.extui %0 : i1 to i32
    %c0_i32_0 = arith.constant 0 : i32
    %2 = arith.cmpi ne, %1, %c0_i32_0 : i32
    scf.if %2 {
      %cst_10 = arith.constant 0.000000e+00 : f32
      %12 = vector.broadcast %cst_10 : f32 to vector<384x128xf32>
      %c0_11 = arith.constant 0 : index
      %c0_12 = arith.constant 0 : index
      %13 = vector.load %arg6[%c0_11, %c0_12] : memref<384x128xf32, #tpu.memory_space<vmem>>, vector<384x128xf32>
      tpu.vector_store %arg6[%c0_11, %c0_12], %12 {strides = array<i32>} : memref<384x128xf32, #tpu.memory_space<vmem>>, vector<384x128xf32>,
    } else {
    }
    %c0 = arith.constant 0 : index
    %c0_1 = arith.constant 0 : index
    %3 = vector.load %arg6[%c0, %c0_1] : memref<384x128xf32, #tpu.memory_space<vmem>>, vector<384x128xf32>
    %c0_2 = arith.constant 0 : index
    %c0_3 = arith.constant 0 : index
    %4 = vector.load %arg2[%c0_2, %c0_3] : memref<384x384xbf16, #tpu.memory_space<vmem>>, vector<384x384xbf16>
    %c0_4 = arith.constant 0 : index
    %c0_5 = arith.constant 0 : index
    %5 = vector.load %arg3[%c0_4, %c0_5] : memref<384x128xbf16, #tpu.memory_space<vmem>>, vector<384x128xbf16>
    %cst = arith.constant dense<0.000000e+00> : vector<384x128xf32>
    %6 = tpu.matmul %4, %5, %cst {dimension_numbers = #tpu.dot_dimension_numbers<[1], [0], [0], [1], [0, 0, 1, 1], [], []>} : vector<384x384xbf16>, vector<384x128xbf16>, vector<384x128xf32> -> vector<384x128xf32>
    %7 = arith.addf %3, %6 : vector<384x128xf32>
    %c0_6 = arith.constant 0 : index
    %c0_7 = arith.constant 0 : index
    %8 = vector.load %arg6[%c0_6, %c0_7] : memref<384x128xf32, #tpu.memory_space<vmem>>, vector<384x128xf32>
    tpu.vector_store %arg6[%c0_6, %c0_7], %7 {strides = array<i32>} : memref<384x128xf32, #tpu.memory_space<vmem>>, vector<384x128xf32>,
    %c0_i32_8 = arith.constant 0 : i32
    %9 = arith.cmpi eq, %arg1, %c0_i32_8 : i32
    %10 = arith.extui %9 : i1 to i32
    %c0_i32_9 = arith.constant 0 : i32
    %11 = arith.cmpi ne, %10, %c0_i32_9 : i32
    scf.if %11 {
      %c0_10 = arith.constant 0 : index
      %c0_11 = arith.constant 0 : index
      %12 = vector.load %arg6[%c0_10, %c0_11] : memref<384x128xf32, #tpu.memory_space<vmem>>, vector<384x128xf32>
      %13 = arith.truncf %12 : vector<384x128xf32> to vector<384x128xbf16>
      %c0_12 = arith.constant 0 : index
      %c0_13 = arith.constant 0 : index
      %14 = vector.load %arg4[%c0_12, %c0_13] : memref<128x128xbf16, #tpu.memory_space<vmem>>, vector<128x128xbf16>
      %cst_14 = arith.constant dense<0.000000e+00> : vector<384x128xf32>
      %15 = tpu.matmul %13, %14, %cst_14 {dimension_numbers = #tpu.dot_dimension_numbers<[1], [0], [0], [1], [0, 0, 1, 1], [], []>} : vector<384x128xbf16>, vector<128x128xbf16>, vector<384x128xf32> -> vector<384x128xf32>
      %c0_15 = arith.constant 0 : index
      %c0_16 = arith.constant 0 : index
      %16 = vector.load %arg5[%c0_15, %c0_16] : memref<384x128xf32, #tpu.memory_space<vmem>>, vector<384x128xf32>
      tpu.vector_store %arg5[%c0_15, %c0_16], %15 {strides = array<i32>} : memref<384x128xf32, #tpu.memory_space<vmem>>, vector<384x128xf32>,
    } else {
    }
    return
  }
  func.func @transform_0(%arg0: i32, %arg1: i32) -> (i32, i32) {
    %c0_i32 = arith.constant 0 : i32
    return %arg0, %arg1 : i32, i32
  }
  func.func @transform_1(%arg0: i32, %arg1: i32) -> (i32, i32) {
    %c0_i32 = arith.constant 0 : i32
    %c0_i32_0 = arith.constant 0 : i32
    return %arg1, %c0_i32 : i32, i32
  }
  func.func @transform_2(%arg0: i32, %arg1: i32) -> (i32, i32) {
    %c0_i32 = arith.constant 0 : i32
    %c0_i32_0 = arith.constant 0 : i32
    %c0_i32_1 = arith.constant 0 : i32
    return %c0_i32, %c0_i32_0 : i32, i32
  }
  func.func @transform_3(%arg0: i32, %arg1: i32) -> (i32, i32) {
    %c0_i32 = arith.constant 0 : i32
    %c0_i32_0 = arith.constant 0 : i32
    return %arg0, %c0_i32 : i32, i32
  }
}

</mosaic_0001>

<bundles_post_ra>
// kernel: encoder_forward.7
= control target key start
LH: loop header
LB: loop body
LE: loop exit
PB: predicated region body
PF: predicated region fallthrough
CT: control target
= control target key end

     0   :  { %v806_v0 = vmov 0.0   ;;  %vm807_vm0 = vmmov 0   ;;  %vm591_vm1 = vcmask 1041408   ;;  %vm595_vm2 = vcmask 1043456   ;;  %s1029_s0 = inlined_call_operand.vmem [shape: bf16[384,128], index: 0, kind: input, shape index: {}]   ;;  %s1030_s2 = inlined_call_operand.vmem [shape: bf16[2,128], index: 2, kind: input, shape index: {}]   ;;  %s1031_s1 = inlined_call_operand.vmem [shape: bf16[384,128], index: 1, kind: input, shape index: {}]   ;;  %s1032_s3 = inlined_call_operand.<no memory space> [shape: f32[1,1], index: 3, kind: input, shape index: {}]   ;;  %s1033_s4 = inlined_call_operand.vmem [shape: f32[8,384], index: 4, kind: output, shape index: {}]  }
   0x1   :  { %716 = vmatprep.subr.bf16.mxu1 %v806_v0  ;;  %v758_v1 = vld [vmem:[%s1029_s0 + $0x40] sm:$0xff]   ;;  %732 = vmatprep.mubr.msk.bf16.mxu1 %vm807_vm0, %v806_v0  ;;  %v761_v4 = vld [vmem:[%s1029_s0 + $0x48] sm:$0xff]   ;;  %v764_v7 = vld [vmem:[%s1029_s0 + $0x50] sm:$0xff]   ;;  %vm599_vm3 = vcmask 1045504  }
   0x2   :  { %v759_v2 = vld [vmem:[%s1029_s0 + $0x80] sm:$0xff]   ;;  %662 = vmatprep.subr.bf16.mxu0 %v758_v1  ;;  %v762_v5 = vld [vmem:[%s1029_s0 + $0x88] sm:$0xff]   ;;  %v765_v8 = vld [vmem:[%s1029_s0 + $0x90] sm:$0xff]  }
   0x3   :  { %v760_v3 = vld [vmem:[%s1029_s0] sm:$0xff]   ;;  %717 = vmatpush3.bf16.xpose.msra.mxu1 %v759_v2  ;;  %v763_v6 = vld [vmem:[%s1029_s0 + $0x8] sm:$0xff]   ;;  %v766_v9 = vld [vmem:[%s1029_s0 + $0x10] sm:$0xff]  }
   0x4   :  { %663 = vmatpush3.bf16.xpose.msra.mxu0 %v760_v3  ;;  %718 = vmatprep.subr.bf16.mxu1 %v806_v0  ;;  %v767_v10 = vld [vmem:[%s1029_s0 + $0x58] sm:$0xff]   ;;  %v878_v13 = vld [vmem:[%s1030_s2] sm:$0x1]  ;;  %v773_v17 = vld [vmem:[%s1029_s0 + $0x68] sm:$0xff]  }
   0x5   :  { %664 = vmatprep.subr.bf16.mxu0 %v761_v4  ;;  %v768_v11 = vld [vmem:[%s1029_s0 + $0x98] sm:$0xff]   ;;  %v770_v14 = vld [vmem:[%s1029_s0 + $0x60] sm:$0xff]   ;;  %678 = vmatprep.mubr.bf16.mxu0 %v878_v13  ;;  %v774_v18 = vld [vmem:[%s1029_s0 + $0xa8] sm:$0xff]  }
   0x6   :  { %v769_v12 = vld [vmem:[%s1029_s0 + $0x18] sm:$0xff]   ;;  %v771_v15 = vld [vmem:[%s1029_s0 + $0xa0] sm:$0xff]   ;;  %v775_v19 = vld [vmem:[%s1029_s0 + $0x28] sm:$0xff]  }
   0x7   :  { %v772_v16 = vld [vmem:[%s1029_s0 + $0x20] sm:$0xff]   ;;  %v776_v20 = vld [vmem:[%s1029_s0 + $0x70] sm:$0xff]   ;;  %v779_v23 = vld [vmem:[%s1029_s0 + $0x78] sm:$0xff]  }
   0x8   :  { %v777_v21 = vld [vmem:[%s1029_s0 + $0xb0] sm:$0xff]   ;;  %v780_v24 = vld [vmem:[%s1029_s0 + $0xb8] sm:$0xff]   ;;  %v782_v26 = vld [vmem:[%s1031_s1 + $0x40] sm:$0xff]  }
   0x9   :  { %v778_v22 = vld [vmem:[%s1029_s0 + $0x30] sm:$0xff]   ;;  %v781_v25 = vld [vmem:[%s1029_s0 + $0x38] sm:$0xff]   ;;  %v783_v27 = vld [vmem:[%s1031_s1 + $0x80] sm:$0xff]  }
   0xa   :  { %v784_v28 = vld [vmem:[%s1031_s1] sm:$0xff]   ;;  %v785_v29 = vld [vmem:[%s1031_s1 + $0x48] sm:$0xff]   ;;  %v788_v32 = vld [vmem:[%s1031_s1 + $0x50] sm:$0xff]  }
   0xb   :  { %719 = vmatpush3.bf16.xpose.msra.mxu1 %v762_v5  ;;  %v786_v30 = vld [vmem:[%s1031_s1 + $0x88] sm:$0xff]   ;;  %v789_v33 = vld [vmem:[%s1031_s1 + $0x90] sm:$0xff]   ;;  %v791_v35 = vld [vmem:[%s1031_s1 + $0x58] sm:$0xff]   ;;  %v603_v5 = vstv %s1032_s3 }
   0xc   :  { %665 = vmatpush3.bf16.xpose.msra.mxu0 %v763_v6  ;;  %720 = vmatprep.subr.bf16.mxu1 %v806_v0  ;;  %v787_v31 = vld [vmem:[%s1031_s1 + $0x8] sm:$0xff]   ;;  %v790_v34 = vld [vmem:[%s1031_s1 + $0x10] sm:$0xff]   ;;  %v792_v36 = vld [vmem:[%s1031_s1 + $0x98] sm:$0xff]  }
   0xd   :  { %666 = vmatprep.subr.bf16.mxu0 %v764_v7  ;;  %v793_v37 = vld [vmem:[%s1031_s1 + $0x18] sm:$0xff]   ;;  %v794_v38 = vld [vmem:[%s1031_s1 + $0x60] sm:$0xff]   ;;  %v797_v41 = vld [vmem:[%s1031_s1 + $0x68] sm:$0xff]  }
   0xe   :  { %v795_v39 = vld [vmem:[%s1031_s1 + $0xa0] sm:$0xff]   ;;  %v798_v42 = vld [vmem:[%s1031_s1 + $0xa8] sm:$0xff]   ;;  %v800_v44 = vld [vmem:[%s1031_s1 + $0x70] sm:$0xff]  }
   0xf   :  { %v796_v40 = vld [vmem:[%s1031_s1 + $0x20] sm:$0xff]   ;;  %v799_v43 = vld [vmem:[%s1031_s1 + $0x28] sm:$0xff]   ;;  %v801_v45 = vld [vmem:[%s1031_s1 + $0xb0] sm:$0xff]  }
  0x10   :  { %v802_v46 = vld [vmem:[%s1031_s1 + $0x30] sm:$0xff]   ;;  %v803_v47 = vld [vmem:[%s1031_s1 + $0x78] sm:$0xff]  }
  0x11   :  { %v804_v48 = vld [vmem:[%s1031_s1 + $0xb8] sm:$0xff]  }
  0x12   :  { %v805_v49 = vld [vmem:[%s1031_s1 + $0x38] sm:$0xff]  }
  0x13   :  { %721 = vmatpush3.bf16.xpose.msra.mxu1 %v765_v8 }
  0x14   :  { %667 = vmatpush3.bf16.xpose.msra.mxu0 %v766_v9  ;;  %722 = vmatprep.subr.bf16.mxu1 %v806_v0 }
  0x15   :  { %668 = vmatprep.subr.bf16.mxu0 %v767_v10 }
  0x1b   :  { %723 = vmatpush3.bf16.xpose.msra.mxu1 %v768_v11 }
  0x1c   :  { %669 = vmatpush3.bf16.xpose.msra.mxu0 %v769_v12  ;;  %724 = vmatprep.subr.bf16.mxu1 %v806_v0 }
  0x1d   :  { %670 = vmatprep.subr.bf16.mxu0 %v770_v14 }
  0x23   :  { %725 = vmatpush3.bf16.xpose.msra.mxu1 %v771_v15 }
  0x24   :  { %671 = vmatpush3.bf16.xpose.msra.mxu0 %v772_v16  ;;  %726 = vmatprep.subr.bf16.mxu1 %v806_v0 }
  0x25   :  { %672 = vmatprep.subr.bf16.mxu0 %v773_v17 }
  0x2b   :  { %727 = vmatpush3.bf16.xpose.msra.mxu1 %v774_v18 }
  0x2c   :  { %673 = vmatpush3.bf16.xpose.msra.mxu0 %v775_v19  ;;  %728 = vmatprep.subr.bf16.mxu1 %v806_v0 }
  0x2d   :  { %674 = vmatprep.subr.bf16.mxu0 %v776_v20 }
  0x33   :  { %729 = vmatpush3.bf16.xpose.msra.mxu1 %v777_v21 }
  0x34   :  { %675 = vmatpush3.bf16.xpose.msra.mxu0 %v778_v22  ;;  %730 = vmatprep.subr.bf16.mxu1 %v806_v0 }
  0x35   :  { %676 = vmatprep.subr.bf16.mxu0 %v779_v23 }
  0x3b   :  { %731 = vmatpush3.bf16.xpose.msra.mxu1 %v780_v24 }
  0x3c   :  { %677 = vmatpush3.bf16.xpose.msra.mxu0 %v781_v25  ;;  %736 = vmatprep.subr.bf16.mxu1 %v806_v0 }
  0x3d   :  { %689 = vmatprep.subr.bf16.mxu0 %v782_v26 }
  0x42   :  { %733 = vmatmul.mubr.bf16.vlgmr.msra.gmra.mrb[0].mxu1 %v878_v13 }
  0x43   :  { %679 = vmatmul.mubr.bf16.vlgmr.msra.gmra.mrb[0].mxu0 %v878_v13  ;;  %737 = vmatpush3.bf16.xpose.msra.mxu1 %v783_v27 }
  0x44   :  { %690 = vmatpush3.bf16.xpose.msra.mxu0 %v784_v28  ;;  %738 = vmatprep.subr.bf16.mxu1 %v806_v0 }
  0x45   :  { %691 = vmatprep.subr.bf16.mxu0 %v785_v29  ;;  %752 = vmatprep.mubr.msk.bf16.mxu1 %vm807_vm0, %v806_v0 }
  0x46   :  { %705 = vmatprep.mubr.bf16.mxu0 %v878_v13 }
  0x4b   :  { %739 = vmatpush3.bf16.xpose.msra.mxu1 %v786_v30 }
  0x4c   :  { %692 = vmatpush3.bf16.xpose.msra.mxu0 %v787_v31  ;;  %740 = vmatprep.subr.bf16.mxu1 %v806_v0 }
  0x4d   :  { %693 = vmatprep.subr.bf16.mxu0 %v788_v32 }
  0x53   :  { %741 = vmatpush3.bf16.xpose.msra.mxu1 %v789_v33 }
  0x54   :  { %694 = vmatpush3.bf16.xpose.msra.mxu0 %v790_v34  ;;  %742 = vmatprep.subr.bf16.mxu1 %v806_v0 }
  0x55   :  { %695 = vmatprep.subr.bf16.mxu0 %v791_v35 }
  0x5b   :  { %743 = vmatpush3.bf16.xpose.msra.mxu1 %v792_v36 }
  0x5c   :  { %696 = vmatpush3.bf16.xpose.msra.mxu0 %v793_v37  ;;  %744 = vmatprep.subr.bf16.mxu1 %v806_v0 }
  0x5d   :  { %697 = vmatprep.subr.bf16.mxu0 %v794_v38 }
  0x63   :  { %745 = vmatpush3.bf16.xpose.msra.mxu1 %v795_v39 }
  0x64   :  { %698 = vmatpush3.bf16.xpose.msra.mxu0 %v796_v40  ;;  %746 = vmatprep.subr.bf16.mxu1 %v806_v0 }
  0x65   :  { %699 = vmatprep.subr.bf16.mxu0 %v797_v41 }
  0x6b   :  { %747 = vmatpush3.bf16.xpose.msra.mxu1 %v798_v42 }
  0x6c   :  { %700 = vmatpush3.bf16.xpose.msra.mxu0 %v799_v43  ;;  %748 = vmatprep.subr.bf16.mxu1 %v806_v0 }
  0x6d   :  { %701 = vmatprep.subr.bf16.mxu0 %v800_v44 }
  0x73   :  { %749 = vmatpush3.bf16.xpose.msra.mxu1 %v801_v45 }
  0x74   :  { %702 = vmatpush3.bf16.xpose.msra.mxu0 %v802_v46  ;;  %750 = vmatprep.subr.bf16.mxu1 %v806_v0 }
  0x75   :  { %703 = vmatprep.subr.bf16.mxu0 %v803_v47 }
  0x7b   :  { %751 = vmatpush3.bf16.xpose.msra.mxu1 %v804_v48 }
  0x7c   :  { %704 = vmatpush3.bf16.xpose.msra.mxu0 %v805_v49 }
  0x82   :  { %753 = vmatmul.mubr.bf16.vlgmr.msra.gmra.mrb[4].mxu1 %v878_v13 }
  0x83   :  { %706 = vmatmul.mubr.bf16.vlgmr.msra.gmra.mrb[4].mxu0 %v878_v13 }
 0x115   :  { %v336_v50 = vpop.f32.mrb[0].mxu1 }
 0x116   :  { %v295_v51 = vpop.f32.mrb[0].mxu0  ;;  %v734_v52 = vpop.f32.mrb[1].mxu1  ;;  %v581_v63 = vrot.slane %v336_v50, 4 }
 0x117   :  { %v297_v53 = vpop.f32.mrb[1].mxu0  ;;  %v339_v54 = vpop.f32.mrb[2].mxu1  ;;  %v579_v3 = vrot.slane %v295_v51, 4 }
 0x118   :  { %v299_v55 = vpop.f32.mrb[2].mxu0  ;;  %v735_v56 = vpop.f32.mrb[3].mxu1  ;;  %v580_v9 = vrot.slane %v297_v53, 4 }
 0x119   :  { %v300_v57 = vpop.f32.mrb[3].mxu0 }
 0x155   :  { %v561_v58 = vpop.f32.mrb[4].mxu1 }
 0x156   :  { %v572_v59 = vrot.slane %v561_v58, 6  ;;  %v587_v60 = vrot.slane %v561_v58, 2  ;;  %v520_v61 = vpop.f32.mrb[4].mxu0  ;;  %v754_v62 = vpop.f32.mrb[5].mxu1 }
 0x157   :  { %v570_v0 = vrot.slane %v520_v61, 6  ;;  %v522_v1 = vpop.f32.mrb[5].mxu0  ;;  %v564_v2 = vpop.f32.mrb[6].mxu1  ;;  %v585_v11 = vrot.slane %v520_v61, 2 }
 0x158   :  { %v594_v4 = vsel %vm591_vm1, %v336_v50, %v572_v59  ;;  %v571_v6 = vrot.slane %v522_v1, 6  ;;  %v524_v7 = vpop.f32.mrb[6].mxu0  ;;  %v755_v8 = vpop.f32.mrb[7].mxu1  ;;  %v586_v16 = vrot.slane %v522_v1, 2 }
 0x159   :  { %v598_v10 = vsel %vm595_vm2, %v594_v4, %v581_v63  ;;  %v592_v12 = vsel %vm591_vm1, %v295_v51, %v570_v0  ;;  %v525_v13 = vpop.f32.mrb[7].mxu0 }
 0x15a   :  { %v602_v14 = vsel %vm599_vm3, %v598_v10, %v587_v60  ;;  %v596_v15 = vsel %vm595_vm2, %v592_v12, %v579_v3  ;;  %v593_v17 = vsel %vm591_vm1, %v297_v53, %v571_v6 }
 0x15b   :  { %v606_v18 = vadd.f32 %v603_v5, %v602_v14  ;;  %v600_v19 = vsel %vm599_vm3, %v596_v15, %v585_v11  ;;  %v597_v20 = vsel %vm595_vm2, %v593_v17, %v580_v9 }
 0x15c   :  { %v604_v21 = vadd.f32 %v603_v5, %v600_v19  ;;  %v601_v22 = vsel %vm599_vm3, %v597_v20, %v586_v16 }
 0x15d   :  { %609 = vst [vmem:[%s1033_s4 + $0x10] sm:$0xff] %v606_v18  ;;  %v605_v23 = vadd.f32 %v603_v5, %v601_v22 }
 0x15e   :  { %607 = vst [vmem:[%s1033_s4] sm:$0xff] %v604_v21 }
 0x15f   :  { %608 = vst [vmem:[%s1033_s4 + $0x8] sm:$0xff] %v605_v23 }

// kernel: encoder_forward.4
= control target key start
LH: loop header
LB: loop body
LE: loop exit
PB: predicated region body
PF: predicated region fallthrough
CT: control target
= control target key end

     0   :  { %s3009_s2 = inlined_call_operand.vmem [shape: bf16[128,128], index: 2, kind: input, shape index: {}]   ;;  %s3010_s0 = inlined_call_operand.vmem [shape: bf16[384,128], index: 0, kind: input, shape index: {}]   ;;  %s3011_s1 = inlined_call_operand.vmem [shape: bf16[384,128], index: 1, kind: input, shape index: {}]   ;;  %s3012_s3 = inlined_call_operand.vmem [shape: bf16[384,128], index: 3, kind: output, shape index: {0}]   ;;  %s3013_s4 = inlined_call_operand.vmem [shape: bf16[384,128], index: 4, kind: output, shape index: {1}]  }
   0x1   :  { %v2616_v0 = vld [vmem:[%s3009_s2] sm:$0xff]   ;;  %v2617_v1 = vld [vmem:[%s3009_s2 + $0x8] sm:$0xff]   ;;  %v2618_v2 = vld [vmem:[%s3009_s2 + $0x10] sm:$0xff]  }
   0x2   :  { %2488 = vmatprep.subr.bf16.mxu0 %v2616_v0  ;;  %2552 = vmatprep.subr.bf16.mxu1 %v2616_v0  ;;  %v2619_v3 = vld [vmem:[%s3009_s2 + $0x18] sm:$0xff]   ;;  %v2624_v4 = vld [vmem:[%s3010_s0] sm:$0xff]   ;;  %v2621_v7 = vld [vmem:[%s3009_s2 + $0x28] sm:$0xff]  }
   0x3   :  { %2489 = vmatpush3.bf16.msra.mxu0 %v2616_v0  ;;  %2553 = vmatpush3.bf16.msra.mxu1 %v2616_v0  ;;  %v2625_v5 = vld [vmem:[%s3011_s1] sm:$0xff]   ;;  %v2622_v8 = vld [vmem:[%s3009_s2 + $0x30] sm:$0xff]   ;;  %v2623_v9 = vld [vmem:[%s3009_s2 + $0x38] sm:$0xff]  }
   0x4   :  { %2490 = vmatprep.subr.bf16.mxu0 %v2617_v1  ;;  %2554 = vmatprep.subr.bf16.mxu1 %v2617_v1  ;;  %v2620_v6 = vld [vmem:[%s3009_s2 + $0x20] sm:$0xff]   ;;  %v2626_v10 = vld [vmem:[%s3010_s0 + $0x8] sm:$0xff]   ;;  %v2628_v12 = vld [vmem:[%s3010_s0 + $0x10] sm:$0xff]  }
   0x5   :  { %2504 = vmatprep.mubr.bf16.mxu0 %v2624_v4  ;;  %2568 = vmatprep.mubr.bf16.mxu1 %v2625_v5  ;;  %v2627_v11 = vld [vmem:[%s3011_s1 + $0x8] sm:$0xff]   ;;  %v2629_v13 = vld [vmem:[%s3011_s1 + $0x10] sm:$0xff]   ;;  %v2630_v14 = vld [vmem:[%s3010_s0 + $0x18] sm:$0xff]  }
   0x6   :  { %v2631_v15 = vld [vmem:[%s3011_s1 + $0x18] sm:$0xff]   ;;  %v2632_v16 = vld [vmem:[%s3010_s0 + $0x20] sm:$0xff]   ;;  %v2634_v18 = vld [vmem:[%s3010_s0 + $0x28] sm:$0xff]  }
   0x7   :  { %2491 = vmatpush3.bf16.msra.mxu0 %v2617_v1  ;;  %2555 = vmatpush3.bf16.msra.mxu1 %v2617_v1  ;;  %v2633_v17 = vld [vmem:[%s3011_s1 + $0x20] sm:$0xff]   ;;  %v2635_v19 = vld [vmem:[%s3011_s1 + $0x28] sm:$0xff]   ;;  %v2636_v20 = vld [vmem:[%s3010_s0 + $0x30] sm:$0xff]  }
   0x8   :  { %2492 = vmatprep.subr.bf16.mxu0 %v2618_v2  ;;  %2556 = vmatprep.subr.bf16.mxu1 %v2618_v2  ;;  %v2637_v21 = vld [vmem:[%s3011_s1 + $0x30] sm:$0xff]   ;;  %v2638_v22 = vld [vmem:[%s3010_s0 + $0x38] sm:$0xff]   ;;  %v2640_v24 = vld [vmem:[%s3010_s0 + $0x40] sm:$0xff]  }
   0x9   :  { %v2639_v23 = vld [vmem:[%s3011_s1 + $0x38] sm:$0xff]   ;;  %v2641_v25 = vld [vmem:[%s3011_s1 + $0x40] sm:$0xff]   ;;  %v2642_v26 = vld [vmem:[%s3010_s0 + $0x48] sm:$0xff]  }
   0xa   :  { %v2643_v27 = vld [vmem:[%s3011_s1 + $0x48] sm:$0xff]   ;;  %v2644_v28 = vld [vmem:[%s3010_s0 + $0x50] sm:$0xff]   ;;  %v2646_v30 = vld [vmem:[%s3010_s0 + $0x58] sm:$0xff]  }
   0xb   :  { %2493 = vmatpush3.bf16.msra.mxu0 %v2618_v2  ;;  %2557 = vmatpush3.bf16.msra.mxu1 %v2618_v2  ;;  %v2645_v29 = vld [vmem:[%s3011_s1 + $0x50] sm:$0xff]   ;;  %v2647_v31 = vld [vmem:[%s3011_s1 + $0x58] sm:$0xff]   ;;  %v2648_v32 = vld [vmem:[%s3010_s0 + $0x60] sm:$0xff]  }
   0xc   :  { %2494 = vmatprep.subr.bf16.mxu0 %v2619_v3  ;;  %2558 = vmatprep.subr.bf16.mxu1 %v2619_v3  ;;  %v2649_v33 = vld [vmem:[%s3011_s1 + $0x60] sm:$0xff]   ;;  %v2650_v34 = vld [vmem:[%s3010_s0 + $0x68] sm:$0xff]   ;;  %v2652_v36 = vld [vmem:[%s3010_s0 + $0x70] sm:$0xff]  }
   0xd   :  { %v2651_v35 = vld [vmem:[%s3011_s1 + $0x68] sm:$0xff]   ;;  %v2653_v37 = vld [vmem:[%s3011_s1 + $0x70] sm:$0xff]   ;;  %v2654_v38 = vld [vmem:[%s3010_s0 + $0x78] sm:$0xff]  }
   0xe   :  { %v2655_v39 = vld [vmem:[%s3011_s1 + $0x78] sm:$0xff]   ;;  %v2656_v40 = vld [vmem:[%s3010_s0 + $0x80] sm:$0xff]   ;;  %v2658_v42 = vld [vmem:[%s3010_s0 + $0x88] sm:$0xff]  }
   0xf   :  { %2495 = vmatpush3.bf16.msra.mxu0 %v2619_v3  ;;  %2559 = vmatpush3.bf16.msra.mxu1 %v2619_v3  ;;  %v2657_v41 = vld [vmem:[%s3011_s1 + $0x80] sm:$0xff]   ;;  %v2659_v43 = vld [vmem:[%s3011_s1 + $0x88] sm:$0xff]   ;;  %v2660_v44 = vld [vmem:[%s3010_s0 + $0x90] sm:$0xff]  }
  0x10   :  { %2496 = vmatprep.subr.bf16.mxu0 %v2620_v6  ;;  %2560 = vmatprep.subr.bf16.mxu1 %v2620_v6  ;;  %v2661_v45 = vld [vmem:[%s3011_s1 + $0x90] sm:$0xff]   ;;  %v2662_v46 = vld [vmem:[%s3010_s0 + $0x98] sm:$0xff]   ;;  %v2664_v48 = vld [vmem:[%s3010_s0 + $0xa0] sm:$0xff]  }
  0x11   :  { %v2663_v47 = vld [vmem:[%s3011_s1 + $0x98] sm:$0xff]   ;;  %v2665_v49 = vld [vmem:[%s3011_s1 + $0xa0] sm:$0xff]   ;;  %v2666_v50 = vld [vmem:[%s3010_s0 + $0xa8] sm:$0xff]  }
  0x12   :  { %v2667_v51 = vld [vmem:[%s3011_s1 + $0xa8] sm:$0xff]   ;;  %v2668_v52 = vld [vmem:[%s3010_s0 + $0xb0] sm:$0xff]   ;;  %v2670_v54 = vld [vmem:[%s3010_s0 + $0xb8] sm:$0xff]  }
  0x13   :  { %2497 = vmatpush3.bf16.msra.mxu0 %v2620_v6  ;;  %2561 = vmatpush3.bf16.msra.mxu1 %v2620_v6  ;;  %v2669_v53 = vld [vmem:[%s3011_s1 + $0xb0] sm:$0xff]   ;;  %v2671_v55 = vld [vmem:[%s3011_s1 + $0xb8] sm:$0xff]  }
  0x14   :  { %2498 = vmatprep.subr.bf16.mxu0 %v2621_v7  ;;  %2562 = vmatprep.subr.bf16.mxu1 %v2621_v7 }
  0x17   :  { %2499 = vmatpush3.bf16.msra.mxu0 %v2621_v7  ;;  %2563 = vmatpush3.bf16.msra.mxu1 %v2621_v7 }
  0x18   :  { %2500 = vmatprep.subr.bf16.mxu0 %v2622_v8  ;;  %2564 = vmatprep.subr.bf16.mxu1 %v2622_v8 }
  0x1b   :  { %2501 = vmatpush3.bf16.msra.mxu0 %v2622_v8  ;;  %2565 = vmatpush3.bf16.msra.mxu1 %v2622_v8 }
  0x1c   :  { %2502 = vmatprep.subr.bf16.mxu0 %v2623_v9  ;;  %2566 = vmatprep.subr.bf16.mxu1 %v2623_v9 }
  0x1f   :  { %2503 = vmatpush3.bf16.msra.mxu0 %v2623_v9  ;;  %2567 = vmatpush3.bf16.msra.mxu1 %v2623_v9 }
  0x22   :  { %2505 = vmatmul.mubr.bf16.vlgmr.msra.gmra.mrb[0].mxu0 %v2626_v10  ;;  %2569 = vmatmul.mubr.bf16.vlgmr.msra.gmra.mrb[0].mxu1 %v2627_v11 }
  0x23   :  { %2508 = vmatprep.mubr.bf16.mxu0 %v2628_v12  ;;  %2572 = vmatprep.mubr.bf16.mxu1 %v2629_v13 }
  0x2a   :  { %2509 = vmatmul.mubr.bf16.gmra.mrb[4].mxu0 %v2630_v14  ;;  %2573 = vmatmul.mubr.bf16.gmra.mrb[4].mxu1 %v2631_v15 }
  0x2b   :  { %2512 = vmatprep.mubr.bf16.mxu0 %v2632_v16  ;;  %2576 = vmatprep.mubr.bf16.mxu1 %v2633_v17 }
  0x32   :  { %2513 = vmatmul.mubr.bf16.gmra.mrb[8].mxu0 %v2634_v18  ;;  %2577 = vmatmul.mubr.bf16.gmra.mrb[8].mxu1 %v2635_v19 }
  0x33   :  { %2516 = vmatprep.mubr.bf16.mxu0 %v2636_v20  ;;  %2580 = vmatprep.mubr.bf16.mxu1 %v2637_v21 }
  0x3a   :  { %2517 = vmatmul.mubr.bf16.gmra.mrb[12].mxu0 %v2638_v22  ;;  %2581 = vmatmul.mubr.bf16.gmra.mrb[12].mxu1 %v2639_v23 }
  0x3b   :  { %2520 = vmatprep.mubr.bf16.mxu0 %v2640_v24  ;;  %2584 = vmatprep.mubr.bf16.mxu1 %v2641_v25 }
  0x42   :  { %2521 = vmatmul.mubr.bf16.gmra.mrb[16].mxu0 %v2642_v26  ;;  %2585 = vmatmul.mubr.bf16.gmra.mrb[16].mxu1 %v2643_v27 }
  0x43   :  { %2524 = vmatprep.mubr.bf16.mxu0 %v2644_v28  ;;  %2588 = vmatprep.mubr.bf16.mxu1 %v2645_v29 }
  0x4a   :  { %2525 = vmatmul.mubr.bf16.gmra.mrb[20].mxu0 %v2646_v30  ;;  %2589 = vmatmul.mubr.bf16.gmra.mrb[20].mxu1 %v2647_v31 }
  0x4b   :  { %2528 = vmatprep.mubr.bf16.mxu0 %v2648_v32  ;;  %2592 = vmatprep.mubr.bf16.mxu1 %v2649_v33 }
  0x52   :  { %2529 = vmatmul.mubr.bf16.gmra.mrb[24].mxu0 %v2650_v34  ;;  %2593 = vmatmul.mubr.bf16.gmra.mrb[24].mxu1 %v2651_v35 }
  0x53   :  { %2532 = vmatprep.mubr.bf16.mxu0 %v2652_v36  ;;  %2596 = vmatprep.mubr.bf16.mxu1 %v2653_v37 }
  0x5a   :  { %2533 = vmatmul.mubr.bf16.gmra.mrb[28].mxu0 %v2654_v38  ;;  %2597 = vmatmul.mubr.bf16.gmra.mrb[28].mxu1 %v2655_v39 }
  0x5b   :  { %2536 = vmatprep.mubr.bf16.mxu0 %v2656_v40  ;;  %2600 = vmatprep.mubr.bf16.mxu1 %v2657_v41 }
  0x62   :  { %2537 = vmatmul.mubr.bf16.gmra.mrb[32].mxu0 %v2658_v42  ;;  %2601 = vmatmul.mubr.bf16.gmra.mrb[32].mxu1 %v2659_v43 }
  0x63   :  { %2540 = vmatprep.mubr.bf16.mxu0 %v2660_v44  ;;  %2604 = vmatprep.mubr.bf16.mxu1 %v2661_v45 }
  0x6a   :  { %2541 = vmatmul.mubr.bf16.gmra.mrb[36].mxu0 %v2662_v46  ;;  %2605 = vmatmul.mubr.bf16.gmra.mrb[36].mxu1 %v2663_v47 }
  0x6b   :  { %2544 = vmatprep.mubr.bf16.mxu0 %v2664_v48  ;;  %2608 = vmatprep.mubr.bf16.mxu1 %v2665_v49 }
  0x72   :  { %2545 = vmatmul.mubr.bf16.gmra.mrb[40].mxu0 %v2666_v50  ;;  %2609 = vmatmul.mubr.bf16.gmra.mrb[40].mxu1 %v2667_v51 }
  0x73   :  { %2548 = vmatprep.mubr.bf16.mxu0 %v2668_v52  ;;  %2612 = vmatprep.mubr.bf16.mxu1 %v2669_v53 }
  0x7a   :  { %2549 = vmatmul.mubr.bf16.gmra.mrb[44].mxu0 %v2670_v54  ;;  %2613 = vmatmul.mubr.bf16.gmra.mrb[44].mxu1 %v2671_v55 }
  0xf5   :  { %v2506_v56 = vpop.f32.mrb[0].mxu0  ;;  %v2570_v57 = vpop.f32.mrb[0].mxu1 }
  0xf6   :  { %v455_v58 = vpop.f32.mrb[1].mxu0  ;;  %v1016_v59 = vpop.f32.mrb[1].mxu1 }
  0xf7   :  { %v2507_v60 = vpop.f32.mrb[2].mxu0  ;;  %v2571_v61 = vpop.f32.mrb[2].mxu1 }
  0xf8   :  { %v2146_v62 = vpack.c.bf16 %v2507_v60, %v2506_v56  ;;  %v2266_v63 = vpack.c.bf16 %v2571_v61, %v2570_v57  ;;  %v458_v0 = vpop.f32.mrb[3].mxu0  ;;  %v1019_v1 = vpop.f32.mrb[3].mxu1 }
  0xf9   :  { %v2141_v2 = vpack.c.bf16 %v458_v0, %v455_v58  ;;  %v2261_v3 = vpack.c.bf16 %v1019_v1, %v1016_v59 }
  0xfa   :  { %2378 = vst [vmem:[%s3012_s3 + $0x8] sm:$0xff] %v2146_v62   ;;  %2401 = vst [vmem:[%s3013_s4 + $0x8] sm:$0xff] %v2266_v63  }
  0xfb   :  { %2142 = vst [vmem:[%s3012_s3] sm:$0xff] %v2141_v2   ;;  %2262 = vst [vmem:[%s3013_s4] sm:$0xff] %v2261_v3  }
  0xfd   :  { %v2510_v4 = vpop.f32.mrb[4].mxu0  ;;  %v2574_v5 = vpop.f32.mrb[4].mxu1 }
  0xfe   :  { %v471_v6 = vpop.f32.mrb[5].mxu0  ;;  %v1032_v7 = vpop.f32.mrb[5].mxu1 }
  0xff   :  { %v2511_v8 = vpop.f32.mrb[6].mxu0  ;;  %v2575_v9 = vpop.f32.mrb[6].mxu1 }
 0x100   :  { %v2156_v10 = vpack.c.bf16 %v2511_v8, %v2510_v4  ;;  %v2276_v11 = vpack.c.bf16 %v2575_v9, %v2574_v5  ;;  %v474_v12 = vpop.f32.mrb[7].mxu0  ;;  %v1035_v13 = vpop.f32.mrb[7].mxu1 }
 0x101   :  { %v2151_v14 = vpack.c.bf16 %v474_v12, %v471_v6  ;;  %v2271_v15 = vpack.c.bf16 %v1035_v13, %v1032_v7 }
 0x102   :  { %2380 = vst [vmem:[%s3012_s3 + $0x18] sm:$0xff] %v2156_v10   ;;  %2403 = vst [vmem:[%s3013_s4 + $0x18] sm:$0xff] %v2276_v11  }
 0x103   :  { %2379 = vst [vmem:[%s3012_s3 + $0x10] sm:$0xff] %v2151_v14   ;;  %2402 = vst [vmem:[%s3013_s4 + $0x10] sm:$0xff] %v2271_v15  }
 0x105   :  { %v2514_v16 = vpop.f32.mrb[8].mxu0  ;;  %v2578_v17 = vpop.f32.mrb[8].mxu1 }
 0x106   :  { %v487_v18 = vpop.f32.mrb[9].mxu0  ;;  %v1048_v19 = vpop.f32.mrb[9].mxu1 }
 0x107   :  { %v2515_v20 = vpop.f32.mrb[10].mxu0  ;;  %v2579_v21 = vpop.f32.mrb[10].mxu1 }
 0x108   :  { %v2166_v22 = vpack.c.bf16 %v2515_v20, %v2514_v16  ;;  %v2286_v23 = vpack.c.bf16 %v2579_v21, %v2578_v17  ;;  %v490_v24 = vpop.f32.mrb[11].mxu0  ;;  %v1051_v25 = vpop.f32.mrb[11].mxu1 }
 0x109   :  { %v2161_v26 = vpack.c.bf16 %v490_v24, %v487_v18  ;;  %v2281_v27 = vpack.c.bf16 %v1051_v25, %v1048_v19 }
 0x10a   :  { %2382 = vst [vmem:[%s3012_s3 + $0x28] sm:$0xff] %v2166_v22   ;;  %2405 = vst [vmem:[%s3013_s4 + $0x28] sm:$0xff] %v2286_v23  }
 0x10b   :  { %2381 = vst [vmem:[%s3012_s3 + $0x20] sm:$0xff] %v2161_v26   ;;  %2404 = vst [vmem:[%s3013_s4 + $0x20] sm:$0xff] %v2281_v27  }
 0x10d   :  { %v2518_v28 = vpop.f32.mrb[12].mxu0  ;;  %v2582_v29 = vpop.f32.mrb[12].mxu1 }
 0x10e   :  { %v503_v30 = vpop.f32.mrb[13].mxu0  ;;  %v1064_v31 = vpop.f32.mrb[13].mxu1 }
 0x10f   :  { %v2519_v32 = vpop.f32.mrb[14].mxu0  ;;  %v2583_v33 = vpop.f32.mrb[14].mxu1 }
 0x110   :  { %v2176_v34 = vpack.c.bf16 %v2519_v32, %v2518_v28  ;;  %v2296_v35 = vpack.c.bf16 %v2583_v33, %v2582_v29  ;;  %v506_v36 = vpop.f32.mrb[15].mxu0  ;;  %v1067_v37 = vpop.f32.mrb[15].mxu1 }
 0x111   :  { %v2171_v38 = vpack.c.bf16 %v506_v36, %v503_v30  ;;  %v2291_v39 = vpack.c.bf16 %v1067_v37, %v1064_v31 }
 0x112   :  { %2384 = vst [vmem:[%s3012_s3 + $0x38] sm:$0xff] %v2176_v34   ;;  %2407 = vst [vmem:[%s3013_s4 + $0x38] sm:$0xff] %v2296_v35  }
 0x113   :  { %2383 = vst [vmem:[%s3012_s3 + $0x30] sm:$0xff] %v2171_v38   ;;  %2406 = vst [vmem:[%s3013_s4 + $0x30] sm:$0xff] %v2291_v39  }
 0x115   :  { %v2522_v40 = vpop.f32.mrb[16].mxu0  ;;  %v2586_v41 = vpop.f32.mrb[16].mxu1 }
 0x116   :  { %v519_v42 = vpop.f32.mrb[17].mxu0  ;;  %v1080_v43 = vpop.f32.mrb[17].mxu1 }
 0x117   :  { %v2523_v44 = vpop.f32.mrb[18].mxu0  ;;  %v2587_v45 = vpop.f32.mrb[18].mxu1 }
 0x118   :  { %v2186_v46 = vpack.c.bf16 %v2523_v44, %v2522_v40  ;;  %v2306_v47 = vpack.c.bf16 %v2587_v45, %v2586_v41  ;;  %v522_v48 = vpop.f32.mrb[19].mxu0  ;;  %v1083_v49 = vpop.f32.mrb[19].mxu1 }
 0x119   :  { %v2181_v50 = vpack.c.bf16 %v522_v48, %v519_v42  ;;  %v2301_v51 = vpack.c.bf16 %v1083_v49, %v1080_v43 }
 0x11a   :  { %2386 = vst [vmem:[%s3012_s3 + $0x48] sm:$0xff] %v2186_v46   ;;  %2409 = vst [vmem:[%s3013_s4 + $0x48] sm:$0xff] %v2306_v47  }
 0x11b   :  { %2385 = vst [vmem:[%s3012_s3 + $0x40] sm:$0xff] %v2181_v50   ;;  %2408 = vst [vmem:[%s3013_s4 + $0x40] sm:$0xff] %v2301_v51  }
 0x11d   :  { %v2526_v52 = vpop.f32.mrb[20].mxu0  ;;  %v2590_v53 = vpop.f32.mrb[20].mxu1 }
 0x11e   :  { %v535_v54 = vpop.f32.mrb[21].mxu0  ;;  %v1096_v55 = vpop.f32.mrb[21].mxu1 }
 0x11f   :  { %v2527_v56 = vpop.f32.mrb[22].mxu0  ;;  %v2591_v57 = vpop.f32.mrb[22].mxu1 }
 0x120   :  { %v2196_v58 = vpack.c.bf16 %v2527_v56, %v2526_v52  ;;  %v2316_v59 = vpack.c.bf16 %v2591_v57, %v2590_v53  ;;  %v538_v60 = vpop.f32.mrb[23].mxu0  ;;  %v1099_v61 = vpop.f32.mrb[23].mxu1 }
 0x121   :  { %v2191_v62 = vpack.c.bf16 %v538_v60, %v535_v54  ;;  %v2311_v63 = vpack.c.bf16 %v1099_v61, %v1096_v55 }
 0x122   :  { %2388 = vst [vmem:[%s3012_s3 + $0x58] sm:$0xff] %v2196_v58   ;;  %2411 = vst [vmem:[%s3013_s4 + $0x58] sm:$0xff] %v2316_v59  }
 0x123   :  { %2387 = vst [vmem:[%s3012_s3 + $0x50] sm:$0xff] %v2191_v62   ;;  %2410 = vst [vmem:[%s3013_s4 + $0x50] sm:$0xff] %v2311_v63  }
 0x125   :  { %v2530_v0 = vpop.f32.mrb[24].mxu0  ;;  %v2594_v1 = vpop.f32.mrb[24].mxu1 }
 0x126   :  { %v551_v2 = vpop.f32.mrb[25].mxu0  ;;  %v1112_v3 = vpop.f32.mrb[25].mxu1 }
 0x127   :  { %v2531_v4 = vpop.f32.mrb[26].mxu0  ;;  %v2595_v5 = vpop.f32.mrb[26].mxu1 }
 0x128   :  { %v2206_v6 = vpack.c.bf16 %v2531_v4, %v2530_v0  ;;  %v2326_v7 = vpack.c.bf16 %v2595_v5, %v2594_v1  ;;  %v554_v8 = vpop.f32.mrb[27].mxu0  ;;  %v1115_v9 = vpop.f32.mrb[27].mxu1 }
 0x129   :  { %v2201_v10 = vpack.c.bf16 %v554_v8, %v551_v2  ;;  %v2321_v11 = vpack.c.bf16 %v1115_v9, %v1112_v3 }
 0x12a   :  { %2390 = vst [vmem:[%s3012_s3 + $0x68] sm:$0xff] %v2206_v6   ;;  %2413 = vst [vmem:[%s3013_s4 + $0x68] sm:$0xff] %v2326_v7  }
 0x12b   :  { %2389 = vst [vmem:[%s3012_s3 + $0x60] sm:$0xff] %v2201_v10   ;;  %2412 = vst [vmem:[%s3013_s4 + $0x60] sm:$0xff] %v2321_v11  }
 0x12d   :  { %v2534_v12 = vpop.f32.mrb[28].mxu0  ;;  %v2598_v13 = vpop.f32.mrb[28].mxu1 }
 0x12e   :  { %v567_v14 = vpop.f32.mrb[29].mxu0  ;;  %v1128_v15 = vpop.f32.mrb[29].mxu1 }
 0x12f   :  { %v2535_v16 = vpop.f32.mrb[30].mxu0  ;;  %v2599_v17 = vpop.f32.mrb[30].mxu1 }
 0x130   :  { %v2216_v18 = vpack.c.bf16 %v2535_v16, %v2534_v12  ;;  %v2336_v19 = vpack.c.bf16 %v2599_v17, %v2598_v13  ;;  %v570_v20 = vpop.f32.mrb[31].mxu0  ;;  %v1131_v21 = vpop.f32.mrb[31].mxu1 }
 0x131   :  { %v2211_v22 = vpack.c.bf16 %v570_v20, %v567_v14  ;;  %v2331_v23 = vpack.c.bf16 %v1131_v21, %v1128_v15 }
 0x132   :  { %2392 = vst [vmem:[%s3012_s3 + $0x78] sm:$0xff] %v2216_v18   ;;  %2415 = vst [vmem:[%s3013_s4 + $0x78] sm:$0xff] %v2336_v19  }
 0x133   :  { %2391 = vst [vmem:[%s3012_s3 + $0x70] sm:$0xff] %v2211_v22   ;;  %2414 = vst [vmem:[%s3013_s4 + $0x70] sm:$0xff] %v2331_v23  }
 0x135   :  { %v2538_v24 = vpop.f32.mrb[32].mxu0  ;;  %v2602_v25 = vpop.f32.mrb[32].mxu1 }
 0x136   :  { %v583_v26 = vpop.f32.mrb[33].mxu0  ;;  %v1144_v27 = vpop.f32.mrb[33].mxu1 }
 0x137   :  { %v2539_v28 = vpop.f32.mrb[34].mxu0  ;;  %v2603_v29 = vpop.f32.mrb[34].mxu1 }
 0x138   :  { %v2226_v30 = vpack.c.bf16 %v2539_v28, %v2538_v24  ;;  %v2346_v31 = vpack.c.bf16 %v2603_v29, %v2602_v25  ;;  %v586_v32 = vpop.f32.mrb[35].mxu0  ;;  %v1147_v33 = vpop.f32.mrb[35].mxu1 }
 0x139   :  { %v2221_v34 = vpack.c.bf16 %v586_v32, %v583_v26  ;;  %v2341_v35 = vpack.c.bf16 %v1147_v33, %v1144_v27 }
 0x13a   :  { %2394 = vst [vmem:[%s3012_s3 + $0x88] sm:$0xff] %v2226_v30   ;;  %2417 = vst [vmem:[%s3013_s4 + $0x88] sm:$0xff] %v2346_v31  }
 0x13b   :  { %2393 = vst [vmem:[%s3012_s3 + $0x80] sm:$0xff] %v2221_v34   ;;  %2416 = vst [vmem:[%s3013_s4 + $0x80] sm:$0xff] %v2341_v35  }
 0x13d   :  { %v2542_v36 = vpop.f32.mrb[36].mxu0  ;;  %v2606_v37 = vpop.f32.mrb[36].mxu1 }
 0x13e   :  { %v599_v38 = vpop.f32.mrb[37].mxu0  ;;  %v1160_v39 = vpop.f32.mrb[37].mxu1 }
 0x13f   :  { %v2543_v40 = vpop.f32.mrb[38].mxu0  ;;  %v2607_v41 = vpop.f32.mrb[38].mxu1 }
 0x140   :  { %v2236_v42 = vpack.c.bf16 %v2543_v40, %v2542_v36  ;;  %v2356_v43 = vpack.c.bf16 %v2607_v41, %v2606_v37  ;;  %v602_v44 = vpop.f32.mrb[39].mxu0  ;;  %v1163_v45 = vpop.f32.mrb[39].mxu1 }
 0x141   :  { %v2231_v46 = vpack.c.bf16 %v602_v44, %v599_v38  ;;  %v2351_v47 = vpack.c.bf16 %v1163_v45, %v1160_v39 }
 0x142   :  { %2396 = vst [vmem:[%s3012_s3 + $0x98] sm:$0xff] %v2236_v42   ;;  %2419 = vst [vmem:[%s3013_s4 + $0x98] sm:$0xff] %v2356_v43  }
 0x143   :  { %2395 = vst [vmem:[%s3012_s3 + $0x90] sm:$0xff] %v2231_v46   ;;  %2418 = vst [vmem:[%s3013_s4 + $0x90] sm:$0xff] %v2351_v47  }
 0x145   :  { %v2546_v48 = vpop.f32.mrb[40].mxu0  ;;  %v2610_v49 = vpop.f32.mrb[40].mxu1 }
 0x146   :  { %v615_v50 = vpop.f32.mrb[41].mxu0  ;;  %v1176_v51 = vpop.f32.mrb[41].mxu1 }
 0x147   :  { %v2547_v52 = vpop.f32.mrb[42].mxu0  ;;  %v2611_v53 = vpop.f32.mrb[42].mxu1 }
 0x148   :  { %v2246_v54 = vpack.c.bf16 %v2547_v52, %v2546_v48  ;;  %v2366_v55 = vpack.c.bf16 %v2611_v53, %v2610_v49  ;;  %v618_v56 = vpop.f32.mrb[43].mxu0  ;;  %v1179_v57 = vpop.f32.mrb[43].mxu1 }
 0x149   :  { %v2241_v58 = vpack.c.bf16 %v618_v56, %v615_v50  ;;  %v2361_v59 = vpack.c.bf16 %v1179_v57, %v1176_v51 }
 0x14a   :  { %2398 = vst [vmem:[%s3012_s3 + $0xa8] sm:$0xff] %v2246_v54   ;;  %2421 = vst [vmem:[%s3013_s4 + $0xa8] sm:$0xff] %v2366_v55  }
 0x14b   :  { %2397 = vst [vmem:[%s3012_s3 + $0xa0] sm:$0xff] %v2241_v58   ;;  %2420 = vst [vmem:[%s3013_s4 + $0xa0] sm:$0xff] %v2361_v59  }
 0x14d   :  { %v2550_v60 = vpop.f32.mrb[44].mxu0  ;;  %v2614_v61 = vpop.f32.mrb[44].mxu1 }
 0x14e   :  { %v631_v62 = vpop.f32.mrb[45].mxu0  ;;  %v1192_v63 = vpop.f32.mrb[45].mxu1 }
 0x14f   :  { %v2551_v0 = vpop.f32.mrb[46].mxu0  ;;  %v2615_v1 = vpop.f32.mrb[46].mxu1 }
 0x150   :  { %v2256_v2 = vpack.c.bf16 %v2551_v0, %v2550_v60  ;;  %v2376_v3 = vpack.c.bf16 %v2615_v1, %v2614_v61  ;;  %v634_v4 = vpop.f32.mrb[47].mxu0  ;;  %v1195_v5 = vpop.f32.mrb[47].mxu1 }
 0x151   :  { %v2251_v6 = vpack.c.bf16 %v634_v4, %v631_v62  ;;  %v2371_v7 = vpack.c.bf16 %v1195_v5, %v1192_v63 }
 0x152   :  { %2400 = vst [vmem:[%s3012_s3 + $0xb8] sm:$0xff] %v2256_v2   ;;  %2423 = vst [vmem:[%s3013_s4 + $0xb8] sm:$0xff] %v2376_v3  }
 0x153   :  { %2399 = vst [vmem:[%s3012_s3 + $0xb0] sm:$0xff] %v2251_v6   ;;  %2422 = vst [vmem:[%s3013_s4 + $0xb0] sm:$0xff] %v2371_v7  }

// kernel: encoder_forward.6
= control target key start
LH: loop header
LB: loop body
LE: loop exit
PB: predicated region body
PF: predicated region fallthrough
CT: control target
= control target key end

     0   :  { %v2174_v0 = vmov 0   ;;  %s2781_s1 = inlined_call_operand.vmem [shape: bf16[384,128], index: 1, kind: input, shape index: {}]   ;;  %s2782_s0 = inlined_call_operand.vmem [shape: bf16[384,384], index: 0, kind: input, shape index: {}]   ;;  %s2783_s2 = inlined_call_operand.vmem [shape: bf16[128,128], index: 2, kind: input, shape index: {}]   ;;  %s2784_s3 = inlined_call_operand.vmem [shape: f32[384,128], index: 3, kind: output, shape index: {}]  }
   0x1   :  { %787 = vmatprep.subr.bf16.mxu0 %v2174_v0  ;;  %v2046_v1 = vld [vmem:[%s2781_s1] sm:$0xff]   ;;  %v2047_v2 = vld [vmem:[%s2781_s1 + $0x8] sm:$0xff]   ;;  %v2048_v3 = vld [vmem:[%s2781_s1 + $0x10] sm:$0xff]  }
   0x2   :  { %788 = vmatpush1.bf16.msra.mxu0 %v2046_v1  ;;  %v2054_v4 = vld [vmem:[%s2781_s1 + $0x80] sm:$0xff]   ;;  %v2049_v5 = vld [vmem:[%s2781_s1 + $0x18] sm:$0xff]   ;;  %v2056_v6 = vld [vmem:[%s2781_s1 + $0x88] sm:$0xff]  }
   0x3   :  { %789 = vmatprep.subr.bf16.mxu0 %v2174_v0  ;;  %1917 = vmatprep.subr.bf16.mxu1 %v2054_v4  ;;  %v2058_v7 = vld [vmem:[%s2781_s1 + $0x90] sm:$0xff]   ;;  %v2050_v8 = vld [vmem:[%s2781_s1 + $0x20] sm:$0xff]   ;;  %v2060_v9 = vld [vmem:[%s2781_s1 + $0x98] sm:$0xff]  }
   0x4   :  { %1918 = vmatpush3.bf16.msra.mxu1 %v2054_v4  ;;  %v2051_v10 = vld [vmem:[%s2781_s1 + $0x28] sm:$0xff]   ;;  %v2062_v11 = vld [vmem:[%s2781_s1 + $0xa0] sm:$0xff]   ;;  %v2052_v12 = vld [vmem:[%s2781_s1 + $0x30] sm:$0xff]  }
   0x5   :  { %1919 = vmatprep.subr.bf16.mxu1 %v2056_v6  ;;  %v2064_v13 = vld [vmem:[%s2781_s1 + $0xa8] sm:$0xff]   ;;  %v2053_v15 = vld [vmem:[%s2781_s1 + $0x38] sm:$0xff]   ;;  %v2073_v16 = vld [vmem:[%s2782_s0 + $0x4] ss:$12 sps:$4 sm:$0xff]  }
   0x6   :  { %790 = vmatpush1.bf16.msra.mxu0 %v2047_v2  ;;  %v2070_v14 = vld [vmem:[%s2782_s0 + $0x8] ss:$12 sps:$4 sm:$0xff]   ;;  %819 = vmatprep.mubr.bf16.mxu0 %v2073_v16  ;;  %v2055_v18 = vld [vmem:[%s2781_s1 + $0x40] sm:$0xff]   ;;  %v2068_v19 = vld [vmem:[%s2781_s1 + $0xb8] sm:$0xff]  }
   0x7   :  { %791 = vmatprep.subr.bf16.mxu0 %v2174_v0  ;;  %1933 = vmatprep.mubr.bf16.mxu1 %v2070_v14  ;;  %v2066_v17 = vld [vmem:[%s2781_s1 + $0xb0] sm:$0xff]   ;;  %v2057_v20 = vld [vmem:[%s2781_s1 + $0x48] sm:$0xff]   ;;  %v2078_v23 = vld [vmem:[%s2782_s0 + $0x38] ss:$12 sps:$4 sm:$0xff]  }
   0x8   :  { %1920 = vmatpush3.bf16.msra.mxu1 %v2056_v6  ;;  %v2059_v21 = vld [vmem:[%s2781_s1 + $0x50] sm:$0xff]   ;;  %v2074_v22 = vld [vmem:[%s2782_s0 + $0x20] ss:$12 sps:$4 sm:$0xff]   ;;  %v2061_v24 = vld [vmem:[%s2781_s1 + $0x58] sm:$0xff]  }
   0x9   :  { %1921 = vmatprep.subr.bf16.mxu1 %v2058_v7  ;;  %v2063_v25 = vld [vmem:[%s2781_s1 + $0x60] sm:$0xff]   ;;  %v2081_v26 = vld [vmem:[%s2782_s0 + $0x50] ss:$12 sps:$4 sm:$0xff]   ;;  %v2086_v27 = vld [vmem:[%s2782_s0 + $0x68] ss:$12 sps:$4 sm:$0xff]  }
   0xa   :  { %792 = vmatpush1.bf16.msra.mxu0 %v2048_v3  ;;  %v2065_v28 = vld [vmem:[%s2781_s1 + $0x68] sm:$0xff]   ;;  %v2067_v29 = vld [vmem:[%s2781_s1 + $0x70] sm:$0xff]   ;;  %v2094_v31 = vld [vmem:[%s2782_s0 + $0x98] ss:$12 sps:$4 sm:$0xff]  }
   0xb   :  { %793 = vmatprep.subr.bf16.mxu0 %v2174_v0  ;;  %v2089_v30 = vld [vmem:[%s2782_s0 + $0x80] ss:$12 sps:$4 sm:$0xff]   ;;  %v2069_v32 = vld [vmem:[%s2781_s1 + $0x78] sm:$0xff]   ;;  %v2102_v36 = vld [vmem:[%s2782_s0 + $0xc8] ss:$12 sps:$4 sm:$0xff]  }
   0xc   :  { %1922 = vmatpush3.bf16.msra.mxu1 %v2058_v7  ;;  %v2071_v33 = vld [vmem:[%s2782_s0] ss:$12 sps:$4 sm:$0xff]   ;;  %v2075_v34 = vld [vmem:[%s2782_s0 + $0x1c] ss:$12 sps:$4 sm:$0xff]   ;;  %v2077_v37 = vld [vmem:[%s2782_s0 + $0x18] ss:$12 sps:$4 sm:$0xff]  }
   0xd   :  { %1923 = vmatprep.subr.bf16.mxu1 %v2060_v9  ;;  %v2097_v35 = vld [vmem:[%s2782_s0 + $0xb0] ss:$12 sps:$4 sm:$0xff]   ;;  %v2079_v38 = vld [vmem:[%s2782_s0 + $0x34] ss:$12 sps:$4 sm:$0xff]   ;;  %v2110_v40 = vld [vmem:[%s2782_s0 + $0xf8] ss:$12 sps:$4 sm:$0xff]  }
   0xe   :  { %794 = vmatpush1.bf16.msra.mxu0 %v2049_v5  ;;  %v2105_v39 = vld [vmem:[%s2782_s0 + $0xe0] ss:$12 sps:$4 sm:$0xff]   ;;  %v2082_v41 = vld [vmem:[%s2782_s0 + $0x30] ss:$12 sps:$4 sm:$0xff]   ;;  %v2118_v44 = vld [vmem:[%s2782_s0 + $0x128] ss:$12 sps:$4 sm:$0xff]  }
   0xf   :  { %795 = vmatprep.subr.bf16.mxu0 %v2174_v0  ;;  %v2083_v42 = vld [vmem:[%s2782_s0 + $0x4c] ss:$12 sps:$4 sm:$0xff]   ;;  %v2113_v43 = vld [vmem:[%s2782_s0 + $0x110] ss:$12 sps:$4 sm:$0xff]   ;;  %v2085_v45 = vld [vmem:[%s2782_s0 + $0x48] ss:$12 sps:$4 sm:$0xff]  }
  0x10   :  { %1924 = vmatpush3.bf16.msra.mxu1 %v2060_v9  ;;  %v2087_v46 = vld [vmem:[%s2782_s0 + $0x64] ss:$12 sps:$4 sm:$0xff]   ;;  %v2121_v47 = vld [vmem:[%s2782_s0 + $0x140] ss:$12 sps:$4 sm:$0xff]   ;;  %v2091_v50 = vld [vmem:[%s2782_s0 + $0x7c] ss:$12 sps:$4 sm:$0xff]  }
  0x11   :  { %1925 = vmatprep.subr.bf16.mxu1 %v2062_v11  ;;  %v2126_v48 = vld [vmem:[%s2782_s0 + $0x158] ss:$12 sps:$4 sm:$0xff]   ;;  %v2090_v49 = vld [vmem:[%s2782_s0 + $0x60] ss:$12 sps:$4 sm:$0xff]   ;;  %v2129_v51 = vld [vmem:[%s2782_s0 + $0x170] ss:$12 sps:$4 sm:$0xff]  }
  0x12   :  { %796 = vmatpush1.bf16.msra.mxu0 %v2050_v8  ;;  %v2134_v52 = vld [vmem:[%s2782_s0 + $0x188] ss:$12 sps:$4 sm:$0xff]   ;;  %v2093_v53 = vld [vmem:[%s2782_s0 + $0x78] ss:$12 sps:$4 sm:$0xff]   ;;  %v2137_v55 = vld [vmem:[%s2782_s0 + $0x1a0] ss:$12 sps:$4 sm:$0xff]  }
  0x13   :  { %797 = vmatprep.subr.bf16.mxu0 %v2174_v0  ;;  %v2095_v54 = vld [vmem:[%s2782_s0 + $0x94] ss:$12 sps:$4 sm:$0xff]   ;;  %v2142_v56 = vld [vmem:[%s2782_s0 + $0x1b8] ss:$12 sps:$4 sm:$0xff]   ;;  %v2098_v57 = vld [vmem:[%s2782_s0 + $0x90] ss:$12 sps:$4 sm:$0xff]  }
  0x14   :  { %1926 = vmatpush3.bf16.msra.mxu1 %v2062_v11  ;;  %v2099_v58 = vld [vmem:[%s2782_s0 + $0xac] ss:$12 sps:$4 sm:$0xff]   ;;  %v2145_v59 = vld [vmem:[%s2782_s0 + $0x1d0] ss:$12 sps:$4 sm:$0xff]   ;;  %v2150_v60 = vld [vmem:[%s2782_s0 + $0x1e8] ss:$12 sps:$4 sm:$0xff]  }
  0x15   :  { %1927 = vmatprep.subr.bf16.mxu1 %v2064_v13  ;;  %v2101_v61 = vld [vmem:[%s2782_s0 + $0xa8] ss:$12 sps:$4 sm:$0xff]   ;;  %v2103_v62 = vld [vmem:[%s2782_s0 + $0xc4] ss:$12 sps:$4 sm:$0xff]   ;;  %v2153_v63 = vld [vmem:[%s2782_s0 + $0x200] ss:$12 sps:$4 sm:$0xff]  }
  0x16   :  { %798 = vmatpush1.bf16.msra.mxu0 %v2051_v10  ;;  %v2166_v1 = vld [vmem:[%s2783_s2] sm:$0xff]   ;;  %v2167_v3 = vld [vmem:[%s2783_s2 + $0x8] sm:$0xff]   ;;  %v2161_v5 = vld [vmem:[%s2782_s0 + $0x230] ss:$12 sps:$4 sm:$0xff]  }
  0x17   :  { %799 = vmatprep.subr.bf16.mxu0 %v2174_v0  ;;  %v2106_v2 = vld [vmem:[%s2782_s0 + $0xc0] ss:$12 sps:$4 sm:$0xff]   ;;  %v2107_v4 = vld [vmem:[%s2782_s0 + $0xdc] ss:$12 sps:$4 sm:$0xff]   ;;  %v2168_v6 = vld [vmem:[%s2783_s2 + $0x10] sm:$0xff]  }
  0x18   :  { %1928 = vmatpush3.bf16.msra.mxu1 %v2064_v13  ;;  %v2169_v7 = vld [vmem:[%s2783_s2 + $0x18] sm:$0xff]   ;;  %v2111_v9 = vld [vmem:[%s2782_s0 + $0xf4] ss:$12 sps:$4 sm:$0xff]   ;;  %v2171_v14 = vld [vmem:[%s2783_s2 + $0x28] sm:$0xff]  }
  0x19   :  { %1929 = vmatprep.subr.bf16.mxu1 %v2066_v17  ;;  %v2109_v8 = vld [vmem:[%s2782_s0 + $0xd8] ss:$12 sps:$4 sm:$0xff]   ;;  %v2114_v11 = vld [vmem:[%s2782_s0 + $0xf0] ss:$12 sps:$4 sm:$0xff]   ;;  %v2117_v13 = vld [vmem:[%s2782_s0 + $0x108] ss:$12 sps:$4 sm:$0xff]  }
  0x1a   :  { %800 = vmatpush1.bf16.msra.mxu0 %v2052_v12  ;;  %v2170_v10 = vld [vmem:[%s2783_s2 + $0x20] sm:$0xff]   ;;  %v2115_v12 = vld [vmem:[%s2782_s0 + $0x10c] ss:$12 sps:$4 sm:$0xff]   ;;  %v2172_v16 = vld [vmem:[%s2783_s2 + $0x30] sm:$0xff]  }
  0x1b   :  { %801 = vmatprep.subr.bf16.mxu0 %v2174_v0 }
  0x1c   :  { %1930 = vmatpush3.bf16.msra.mxu1 %v2066_v17  ;;  %v2122_v17 = vld [vmem:[%s2782_s0 + $0x120] ss:$12 sps:$4 sm:$0xff]  }
  0x1d   :  { %1931 = vmatprep.subr.bf16.mxu1 %v2068_v19 }
  0x1e   :  { %802 = vmatpush1.bf16.msra.mxu0 %v2053_v15  ;;  %v2119_v15 = vld [vmem:[%s2782_s0 + $0x124] ss:$12 sps:$4 sm:$0xff]  }
  0x1f   :  { %803 = vmatprep.subr.bf16.mxu0 %v2174_v0 }
  0x20   :  { %1932 = vmatpush3.bf16.msra.mxu1 %v2068_v19  ;;  %v2123_v19 = vld [vmem:[%s2782_s0 + $0x13c] ss:$12 sps:$4 sm:$0xff]  }
  0x21   :  { %1981 = vmatprep.subr.bf16.mxu1 %v2166_v1 }
  0x22   :  { %804 = vmatpush1.bf16.msra.mxu0 %v2055_v18  ;;  %v2173_v18 = vld [vmem:[%s2783_s2 + $0x38] sm:$0xff]  }
  0x23   :  { %805 = vmatprep.subr.bf16.mxu0 %v2174_v0  ;;  %1934 = vmatmul.mubr.bf16.vlgmr.msra.gmra.mrb[0].mxu1 %v2074_v22  ;;  %v2130_v22 = vld [vmem:[%s2782_s0 + $0x150] ss:$12 sps:$4 sm:$0xff]  }
  0x24   :  { %1937 = vmatprep.mubr.bf16.mxu1 %v2078_v23  ;;  %1982 = vmatpush3.bf16.msra.mxu1 %v2166_v1  ;;  %v2131_v23 = vld [vmem:[%s2782_s0 + $0x16c] ss:$12 sps:$4 sm:$0xff]  }
  0x25   :  { %1983 = vmatprep.subr.bf16.mxu1 %v2167_v3 }
  0x26   :  { %806 = vmatpush1.bf16.msra.mxu0 %v2057_v20  ;;  %v2125_v20 = vld [vmem:[%s2782_s0 + $0x138] ss:$12 sps:$4 sm:$0xff]  }
  0x27   :  { %807 = vmatprep.subr.bf16.mxu0 %v2174_v0 }
  0x28   :  { %1984 = vmatpush3.bf16.msra.mxu1 %v2167_v3 }
  0x29   :  { %1985 = vmatprep.subr.bf16.mxu1 %v2168_v6 }
  0x2a   :  { %808 = vmatpush1.bf16.msra.mxu0 %v2059_v21  ;;  %v2127_v21 = vld [vmem:[%s2782_s0 + $0x154] ss:$12 sps:$4 sm:$0xff]  }
  0x2b   :  { %809 = vmatprep.subr.bf16.mxu0 %v2174_v0  ;;  %1938 = vmatmul.mubr.bf16.gmra.mrb[4].mxu1 %v2081_v26  ;;  %v2138_v26 = vld [vmem:[%s2782_s0 + $0x180] ss:$12 sps:$4 sm:$0xff]  }
  0x2c   :  { %1941 = vmatprep.mubr.bf16.mxu1 %v2086_v27  ;;  %1986 = vmatpush3.bf16.msra.mxu1 %v2168_v6  ;;  %v2139_v27 = vld [vmem:[%s2782_s0 + $0x19c] ss:$12 sps:$4 sm:$0xff]  }
  0x2d   :  { %1987 = vmatprep.subr.bf16.mxu1 %v2169_v7 }
  0x2e   :  { %810 = vmatpush1.bf16.msra.mxu0 %v2061_v24  ;;  %v2133_v24 = vld [vmem:[%s2782_s0 + $0x168] ss:$12 sps:$4 sm:$0xff]  }
  0x2f   :  { %811 = vmatprep.subr.bf16.mxu0 %v2174_v0 }
  0x30   :  { %1988 = vmatpush3.bf16.msra.mxu1 %v2169_v7 }
  0x31   :  { %1989 = vmatprep.subr.bf16.mxu1 %v2170_v10 }
  0x32   :  { %812 = vmatpush1.bf16.msra.mxu0 %v2063_v25  ;;  %v2135_v25 = vld [vmem:[%s2782_s0 + $0x184] ss:$12 sps:$4 sm:$0xff]  }
  0x33   :  { %813 = vmatprep.subr.bf16.mxu0 %v2174_v0  ;;  %1942 = vmatmul.mubr.bf16.gmra.mrb[8].mxu1 %v2089_v30  ;;  %v2146_v30 = vld [vmem:[%s2782_s0 + $0x1b0] ss:$12 sps:$4 sm:$0xff]  }
  0x34   :  { %1945 = vmatprep.mubr.bf16.mxu1 %v2094_v31  ;;  %1990 = vmatpush3.bf16.msra.mxu1 %v2170_v10  ;;  %v2147_v31 = vld [vmem:[%s2782_s0 + $0x1cc] ss:$12 sps:$4 sm:$0xff]  }
  0x35   :  { %1991 = vmatprep.subr.bf16.mxu1 %v2171_v14 }
  0x36   :  { %814 = vmatpush1.bf16.msra.mxu0 %v2065_v28  ;;  %v2141_v28 = vld [vmem:[%s2782_s0 + $0x198] ss:$12 sps:$4 sm:$0xff]  }
  0x37   :  { %815 = vmatprep.subr.bf16.mxu0 %v2174_v0 }
  0x38   :  { %1992 = vmatpush3.bf16.msra.mxu1 %v2171_v14 }
  0x39   :  { %1993 = vmatprep.subr.bf16.mxu1 %v2172_v16 }
  0x3a   :  { %816 = vmatpush1.bf16.msra.mxu0 %v2067_v29  ;;  %v2143_v29 = vld [vmem:[%s2782_s0 + $0x1b4] ss:$12 sps:$4 sm:$0xff]  }
  0x3b   :  { %817 = vmatprep.subr.bf16.mxu0 %v2174_v0  ;;  %1946 = vmatmul.mubr.bf16.gmra.mrb[12].mxu1 %v2097_v35  ;;  %v2158_v0 = vld [vmem:[%s2782_s0 + $0x218] ss:$12 sps:$4 sm:$0xff]   ;;  %v2155_v35 = vld [vmem:[%s2782_s0 + $0x1fc] ss:$12 sps:$4 sm:$0xff]  }
  0x3c   :  { %1949 = vmatprep.mubr.bf16.mxu1 %v2102_v36  ;;  %1994 = vmatpush3.bf16.msra.mxu1 %v2172_v16  ;;  %v2157_v36 = vld [vmem:[%s2782_s0 + $0x1f8] ss:$12 sps:$4 sm:$0xff]  }
  0x3d   :  { %1995 = vmatprep.subr.bf16.mxu1 %v2173_v18 }
  0x3e   :  { %818 = vmatpush1.bf16.msra.mxu0 %v2069_v32  ;;  %v2149_v32 = vld [vmem:[%s2782_s0 + $0x1c8] ss:$12 sps:$4 sm:$0xff]  }
  0x40   :  { %1996 = vmatpush3.bf16.msra.mxu1 %v2173_v18 }
  0x41   :  { %820 = vmatmul.mubr.bf16.vlgmr.msra.gmra.mrb[0].mxu0 %v2071_v33  ;;  %v2151_v33 = vld [vmem:[%s2782_s0 + $0x1e4] ss:$12 sps:$4 sm:$0xff]  }
  0x42   :  { %827 = vmatprep.mubr.bf16.mxu0 %v2075_v34  ;;  %v2154_v34 = vld [vmem:[%s2782_s0 + $0x1e0] ss:$12 sps:$4 sm:$0xff]  }
  0x43   :  { %1950 = vmatmul.mubr.bf16.gmra.mrb[16].mxu1 %v2105_v39  ;;  %v2163_v39 = vld [vmem:[%s2782_s0 + $0x22c] ss:$12 sps:$4 sm:$0xff]  }
  0x44   :  { %1953 = vmatprep.mubr.bf16.mxu1 %v2110_v40  ;;  %v2165_v40 = vld [vmem:[%s2782_s0 + $0x228] ss:$12 sps:$4 sm:$0xff]  }
  0x49   :  { %828 = vmatmul.mubr.bf16.gmra.mrb[4].mxu0 %v2077_v37  ;;  %v2159_v37 = vld [vmem:[%s2782_s0 + $0x214] ss:$12 sps:$4 sm:$0xff]  }
  0x4a   :  { %835 = vmatprep.mubr.bf16.mxu0 %v2079_v38  ;;  %v2162_v38 = vld [vmem:[%s2782_s0 + $0x210] ss:$12 sps:$4 sm:$0xff]  }
  0x4b   :  { %1954 = vmatmul.mubr.bf16.gmra.mrb[20].mxu1 %v2113_v43 }
  0x4c   :  { %1957 = vmatprep.mubr.bf16.mxu1 %v2118_v44 }
  0x51   :  { %836 = vmatmul.mubr.bf16.gmra.mrb[8].mxu0 %v2082_v41 }
  0x52   :  { %843 = vmatprep.mubr.bf16.mxu0 %v2083_v42 }
  0x53   :  { %1958 = vmatmul.mubr.bf16.gmra.mrb[24].mxu1 %v2121_v47 }
  0x54   :  { %1961 = vmatprep.mubr.bf16.mxu1 %v2126_v48 }
  0x59   :  { %844 = vmatmul.mubr.bf16.gmra.mrb[12].mxu0 %v2085_v45 }
  0x5a   :  { %851 = vmatprep.mubr.bf16.mxu0 %v2087_v46 }
  0x5b   :  { %1962 = vmatmul.mubr.bf16.gmra.mrb[28].mxu1 %v2129_v51 }
  0x5c   :  { %1965 = vmatprep.mubr.bf16.mxu1 %v2134_v52 }
  0x61   :  { %852 = vmatmul.mubr.bf16.gmra.mrb[16].mxu0 %v2090_v49 }
  0x62   :  { %859 = vmatprep.mubr.bf16.mxu0 %v2091_v50 }
  0x63   :  { %1966 = vmatmul.mubr.bf16.gmra.mrb[32].mxu1 %v2137_v55 }
  0x64   :  { %1969 = vmatprep.mubr.bf16.mxu1 %v2142_v56 }
  0x69   :  { %860 = vmatmul.mubr.bf16.gmra.mrb[20].mxu0 %v2093_v53 }
  0x6a   :  { %867 = vmatprep.mubr.bf16.mxu0 %v2095_v54 }
  0x6b   :  { %1970 = vmatmul.mubr.bf16.gmra.mrb[36].mxu1 %v2145_v59 }
  0x6c   :  { %1973 = vmatprep.mubr.bf16.mxu1 %v2150_v60 }
  0x71   :  { %868 = vmatmul.mubr.bf16.gmra.mrb[24].mxu0 %v2098_v57 }
  0x72   :  { %875 = vmatprep.mubr.bf16.mxu0 %v2099_v58 }
  0x73   :  { %1974 = vmatmul.mubr.bf16.gmra.mrb[40].mxu1 %v2153_v63 }
  0x74   :  { %1977 = vmatprep.mubr.bf16.mxu1 %v2158_v0 }
  0x79   :  { %876 = vmatmul.mubr.bf16.gmra.mrb[28].mxu0 %v2101_v61 }
  0x7a   :  { %883 = vmatprep.mubr.bf16.mxu0 %v2103_v62 }
  0x7b   :  { %1978 = vmatmul.mubr.bf16.gmra.mrb[44].mxu1 %v2161_v5 }
  0x81   :  { %884 = vmatmul.mubr.bf16.gmra.mrb[32].mxu0 %v2106_v2 }
  0x82   :  { %891 = vmatprep.mubr.bf16.mxu0 %v2107_v4 }
  0x89   :  { %892 = vmatmul.mubr.bf16.gmra.mrb[36].mxu0 %v2109_v8 }
  0x8a   :  { %899 = vmatprep.mubr.bf16.mxu0 %v2111_v9 }
  0x91   :  { %900 = vmatmul.mubr.bf16.gmra.mrb[40].mxu0 %v2114_v11 }
  0x92   :  { %907 = vmatprep.mubr.bf16.mxu0 %v2115_v12 }
  0x99   :  { %908 = vmatmul.mubr.bf16.gmra.mrb[44].mxu0 %v2117_v13 }
  0x9a   :  { %915 = vmatprep.mubr.bf16.mxu0 %v2119_v15 }
  0xa1   :  { %916 = vmatmul.mubr.bf16.gmra.mrb[48].mxu0 %v2122_v17 }
  0xa2   :  { %923 = vmatprep.mubr.bf16.mxu0 %v2123_v19 }
  0xa9   :  { %924 = vmatmul.mubr.bf16.gmra.mrb[52].mxu0 %v2125_v20 }
  0xaa   :  { %931 = vmatprep.mubr.bf16.mxu0 %v2127_v21 }
  0xb1   :  { %932 = vmatmul.mubr.bf16.gmra.mrb[56].mxu0 %v2130_v22 }
  0xb2   :  { %939 = vmatprep.mubr.bf16.mxu0 %v2131_v23 }
  0xb9   :  { %940 = vmatmul.mubr.bf16.gmra.mrb[60].mxu0 %v2133_v24 }
  0xba   :  { %947 = vmatprep.mubr.bf16.mxu0 %v2135_v25 }
  0xc1   :  { %948 = vmatmul.mubr.bf16.gmra.mrb[64].mxu0 %v2138_v26 }
  0xc2   :  { %955 = vmatprep.mubr.bf16.mxu0 %v2139_v27 }
  0xc9   :  { %956 = vmatmul.mubr.bf16.gmra.mrb[68].mxu0 %v2141_v28 }
  0xca   :  { %963 = vmatprep.mubr.bf16.mxu0 %v2143_v29 }
  0xd1   :  { %964 = vmatmul.mubr.bf16.gmra.mrb[72].mxu0 %v2146_v30 }
  0xd2   :  { %971 = vmatprep.mubr.bf16.mxu0 %v2147_v31 }
  0xd9   :  { %972 = vmatmul.mubr.bf16.gmra.mrb[76].mxu0 %v2149_v32 }
  0xda   :  { %979 = vmatprep.mubr.bf16.mxu0 %v2151_v33 }
  0xe1   :  { %980 = vmatmul.mubr.bf16.gmra.mrb[80].mxu0 %v2154_v34 }
  0xe2   :  { %987 = vmatprep.mubr.bf16.mxu0 %v2155_v35 }
  0xe9   :  { %988 = vmatmul.mubr.bf16.gmra.mrb[84].mxu0 %v2157_v36 }
  0xea   :  { %995 = vmatprep.mubr.bf16.mxu0 %v2159_v37 }
  0xf1   :  { %996 = vmatmul.mubr.bf16.gmra.mrb[88].mxu0 %v2162_v38 }
  0xf2   :  { %1003 = vmatprep.mubr.bf16.mxu0 %v2163_v39 }
  0xf6   :  { %v1935_v41 = vpop.f32.mrb[0].mxu1 }
  0xf7   :  { %v1046_v42 = vpop.f32.mrb[1].mxu1 }
  0xf8   :  { %v1936_v43 = vpop.f32.mrb[2].mxu1 }
  0xf9   :  { %1004 = vmatmul.mubr.bf16.gmra.mrb[92].mxu0 %v2165_v40  ;;  %v1049_v44 = vpop.f32.mrb[3].mxu1 }
  0xfe   :  { %v1939_v45 = vpop.f32.mrb[4].mxu1 }
  0xff   :  { %v1062_v46 = vpop.f32.mrb[5].mxu1 }
 0x100   :  { %v1940_v47 = vpop.f32.mrb[6].mxu1 }
 0x101   :  { %v1065_v48 = vpop.f32.mrb[7].mxu1 }
 0x106   :  { %v2523_v49 = vpop.f32.mrb[8].mxu1 }
 0x107   :  { %v1078_v50 = vpop.f32.mrb[9].mxu1 }
 0x108   :  { %v2525_v51 = vpop.f32.mrb[10].mxu1 }
 0x109   :  { %v1081_v52 = vpop.f32.mrb[11].mxu1 }
 0x10e   :  { %v2527_v56 = vpop.f32.mrb[12].mxu1 }
 0x10f   :  { %v2529_v58 = vpop.f32.mrb[13].mxu1 }
 0x110   :  { %v2531_v61 = vpop.f32.mrb[14].mxu1 }
 0x111   :  { %v2533_v62 = vpop.f32.mrb[15].mxu1 }
 0x114   :  { %v821_v53 = vpop.f32.mrb[0].mxu0 }
 0x115   :  { %v1047_v54 = vadd.f32 %v1046_v42, %v821_v53  ;;  %v823_v55 = vpop.f32.mrb[1].mxu0 }
 0x116   :  { %v824_v57 = vpop.f32.mrb[2].mxu0  ;;  %v2535_v3 = vpop.f32.mrb[16].mxu1 }
 0x117   :  { %v1050_v59 = vadd.f32 %v1049_v44, %v824_v57  ;;  %v826_v60 = vpop.f32.mrb[3].mxu0  ;;  %v2537_v5 = vpop.f32.mrb[17].mxu1 }
 0x118   :  { %v2539_v8 = vpop.f32.mrb[18].mxu1 }
 0x119   :  { %v1384_v63 = vpack.c.bf16 %v1050_v59, %v1047_v54  ;;  %v2541_v9 = vpop.f32.mrb[19].mxu1 }
 0x11b   :  { %1997 = vmatprep.mubr.bf16.mxu1 %v1384_v63 }
 0x11c   :  { %v829_v0 = vpop.f32.mrb[4].mxu0 }
 0x11d   :  { %v1055_v1 = vadd.f32 %v1935_v41, %v829_v0  ;;  %v831_v2 = vpop.f32.mrb[5].mxu0 }
 0x11e   :  { %v832_v4 = vpop.f32.mrb[6].mxu0  ;;  %v2543_v14 = vpop.f32.mrb[20].mxu1 }
 0x11f   :  { %v1058_v6 = vadd.f32 %v1936_v43, %v832_v4  ;;  %v834_v7 = vpop.f32.mrb[7].mxu0  ;;  %v2545_v16 = vpop.f32.mrb[21].mxu1 }
 0x120   :  { %v2547_v19 = vpop.f32.mrb[22].mxu1 }
 0x121   :  { %v1385_v10 = vpack.c.bf16 %v1058_v6, %v1055_v1  ;;  %v2549_v20 = vpop.f32.mrb[23].mxu1 }
 0x123   :  { %1998 = vmatmul.mubr.bf16.vlgmr.msra.gmra.mrb[48].mxu1 %v1385_v10 }
 0x124   :  { %v837_v11 = vpop.f32.mrb[8].mxu0 }
 0x125   :  { %v1063_v12 = vadd.f32 %v1062_v46, %v837_v11  ;;  %v839_v13 = vpop.f32.mrb[9].mxu0 }
 0x126   :  { %v840_v15 = vpop.f32.mrb[10].mxu0  ;;  %v2551_v25 = vpop.f32.mrb[24].mxu1 }
 0x127   :  { %v1066_v17 = vadd.f32 %v1065_v48, %v840_v15  ;;  %v842_v18 = vpop.f32.mrb[11].mxu0  ;;  %v2553_v27 = vpop.f32.mrb[25].mxu1 }
 0x128   :  { %v2555_v30 = vpop.f32.mrb[26].mxu1 }
 0x129   :  { %v1386_v21 = vpack.c.bf16 %v1066_v17, %v1063_v12  ;;  %v2557_v31 = vpop.f32.mrb[27].mxu1 }
 0x12b   :  { %2001 = vmatprep.mubr.bf16.mxu1 %v1386_v21 }
 0x12c   :  { %v845_v22 = vpop.f32.mrb[12].mxu0 }
 0x12d   :  { %v1071_v23 = vadd.f32 %v1939_v45, %v845_v22  ;;  %v847_v24 = vpop.f32.mrb[13].mxu0 }
 0x12e   :  { %v848_v26 = vpop.f32.mrb[14].mxu0  ;;  %v2559_v36 = vpop.f32.mrb[28].mxu1 }
 0x12f   :  { %v1074_v28 = vadd.f32 %v1940_v47, %v848_v26  ;;  %v850_v29 = vpop.f32.mrb[15].mxu0  ;;  %v2561_v38 = vpop.f32.mrb[29].mxu1 }
 0x130   :  { %v2563_v41 = vpop.f32.mrb[30].mxu1 }
 0x131   :  { %v1387_v32 = vpack.c.bf16 %v1074_v28, %v1071_v23  ;;  %v2565_v42 = vpop.f32.mrb[31].mxu1 }
 0x133   :  { %2002 = vmatmul.mubr.bf16.gmra.mrb[52].mxu1 %v1387_v32 }
 0x134   :  { %v853_v33 = vpop.f32.mrb[16].mxu0 }
 0x135   :  { %v1079_v34 = vadd.f32 %v1078_v50, %v853_v33  ;;  %v855_v35 = vpop.f32.mrb[17].mxu0 }
 0x136   :  { %v856_v37 = vpop.f32.mrb[18].mxu0  ;;  %v2568_v47 = vpop.f32.mrb[32].mxu1 }
 0x137   :  { %v1082_v39 = vadd.f32 %v1081_v52, %v856_v37  ;;  %v858_v40 = vpop.f32.mrb[19].mxu0  ;;  %v2570_v50 = vpop.f32.mrb[33].mxu1 }
 0x138   :  { %v2573_v52 = vpop.f32.mrb[34].mxu1 }
 0x139   :  { %v1388_v43 = vpack.c.bf16 %v1082_v39, %v1079_v34  ;;  %v2575_v55 = vpop.f32.mrb[35].mxu1 }
 0x13b   :  { %2005 = vmatprep.mubr.bf16.mxu1 %v1388_v43 }
 0x13c   :  { %v861_v44 = vpop.f32.mrb[20].mxu0 }
 0x13d   :  { %v1087_v45 = vadd.f32 %v2523_v49, %v861_v44  ;;  %v863_v46 = vpop.f32.mrb[21].mxu0 }
 0x13e   :  { %v864_v48 = vpop.f32.mrb[22].mxu0  ;;  %v2578_v49 = vpop.f32.mrb[36].mxu1 }
 0x13f   :  { %v1090_v53 = vadd.f32 %v2525_v51, %v864_v48  ;;  %v866_v54 = vpop.f32.mrb[23].mxu0  ;;  %v2580_v1 = vpop.f32.mrb[37].mxu1 }
 0x140   :  { %v2583_v51 = vpop.f32.mrb[38].mxu1 }
 0x141   :  { %v1389_v57 = vpack.c.bf16 %v1090_v53, %v1087_v45  ;;  %v2585_v6 = vpop.f32.mrb[39].mxu1 }
 0x143   :  { %2006 = vmatmul.mubr.bf16.gmra.mrb[56].mxu1 %v1389_v57 }
 0x144   :  { %v869_v59 = vpop.f32.mrb[24].mxu0 }
 0x145   :  { %v1095_v60 = vadd.f32 %v2529_v58, %v869_v59  ;;  %v871_v63 = vpop.f32.mrb[25].mxu0 }
 0x146   :  { %v872_v0 = vpop.f32.mrb[26].mxu0  ;;  %v2588_v58 = vpop.f32.mrb[40].mxu1 }
 0x147   :  { %v1098_v2 = vadd.f32 %v2533_v62, %v872_v0  ;;  %v874_v4 = vpop.f32.mrb[27].mxu0  ;;  %v2590_v15 = vpop.f32.mrb[41].mxu1 }
 0x148   :  { %v2593_v62 = vpop.f32.mrb[42].mxu1 }
 0x149   :  { %v1390_v7 = vpack.c.bf16 %v1098_v2, %v1095_v60  ;;  %v2595_v21 = vpop.f32.mrb[43].mxu1 }
 0x14b   :  { %2009 = vmatprep.mubr.bf16.mxu1 %v1390_v7 }
 0x14c   :  { %v877_v10 = vpop.f32.mrb[28].mxu0 }
 0x14d   :  { %v1103_v11 = vadd.f32 %v2527_v56, %v877_v10  ;;  %v879_v12 = vpop.f32.mrb[29].mxu0 }
 0x14e   :  { %v880_v13 = vpop.f32.mrb[30].mxu0  ;;  %v2598_v56 = vpop.f32.mrb[44].mxu1 }
 0x14f   :  { %v1106_v17 = vadd.f32 %v2531_v61, %v880_v13  ;;  %v882_v18 = vpop.f32.mrb[31].mxu0  ;;  %v2600_v29 = vpop.f32.mrb[45].mxu1 }
 0x150   :  { %v2603_v61 = vpop.f32.mrb[46].mxu1 }
 0x151   :  { %v1391_v22 = vpack.c.bf16 %v1106_v17, %v1103_v11  ;;  %v2605_v34 = vpop.f32.mrb[47].mxu1 }
 0x153   :  { %2010 = vmatmul.mubr.bf16.gmra.mrb[60].mxu1 %v1391_v22 }
 0x154   :  { %v885_v23 = vpop.f32.mrb[32].mxu0 }
 0x155   :  { %v1111_v24 = vadd.f32 %v2537_v5, %v885_v23  ;;  %v887_v26 = vpop.f32.mrb[33].mxu0 }
 0x156   :  { %v888_v28 = vpop.f32.mrb[34].mxu0 }
 0x157   :  { %v1114_v32 = vadd.f32 %v2541_v9, %v888_v28  ;;  %v890_v33 = vpop.f32.mrb[35].mxu0 }
 0x159   :  { %v1392_v35 = vpack.c.bf16 %v1114_v32, %v1111_v24 }
 0x15b   :  { %2013 = vmatprep.mubr.bf16.mxu1 %v1392_v35 }
 0x15c   :  { %v893_v37 = vpop.f32.mrb[36].mxu0 }
 0x15d   :  { %v1119_v39 = vadd.f32 %v2535_v3, %v893_v37  ;;  %v895_v40 = vpop.f32.mrb[37].mxu0 }
 0x15e   :  { %v896_v5 = vpop.f32.mrb[38].mxu0 }
 0x15f   :  { %v1122_v43 = vadd.f32 %v2539_v8, %v896_v5  ;;  %v898_v44 = vpop.f32.mrb[39].mxu0 }
 0x161   :  { %v1393_v45 = vpack.c.bf16 %v1122_v43, %v1119_v39 }
 0x163   :  { %2014 = vmatmul.mubr.bf16.gmra.mrb[64].mxu1 %v1393_v45 }
 0x164   :  { %v901_v46 = vpop.f32.mrb[40].mxu0 }
 0x165   :  { %v1127_v9 = vadd.f32 %v2545_v16, %v901_v46  ;;  %v903_v48 = vpop.f32.mrb[41].mxu0 }
 0x166   :  { %v904_v53 = vpop.f32.mrb[42].mxu0 }
 0x167   :  { %v1130_v54 = vadd.f32 %v2549_v20, %v904_v53  ;;  %v906_v57 = vpop.f32.mrb[43].mxu0 }
 0x169   :  { %v1394_v59 = vpack.c.bf16 %v1130_v54, %v1127_v9 }
 0x16b   :  { %2017 = vmatprep.mubr.bf16.mxu1 %v1394_v59 }
 0x16c   :  { %v909_v60 = vpop.f32.mrb[44].mxu0 }
 0x16d   :  { %v1135_v3 = vadd.f32 %v2543_v14, %v909_v60  ;;  %v911_v63 = vpop.f32.mrb[45].mxu0 }
 0x16e   :  { %v912_v0 = vpop.f32.mrb[46].mxu0 }
 0x16f   :  { %v1138_v8 = vadd.f32 %v2547_v19, %v912_v0  ;;  %v914_v2 = vpop.f32.mrb[47].mxu0 }
 0x171   :  { %v1395_v4 = vpack.c.bf16 %v1138_v8, %v1135_v3 }
 0x173   :  { %2018 = vmatmul.mubr.bf16.gmra.mrb[68].mxu1 %v1395_v4 }
 0x174   :  { %v917_v7 = vpop.f32.mrb[48].mxu0 }
 0x175   :  { %v1143_v16 = vadd.f32 %v2553_v27, %v917_v7  ;;  %v919_v10 = vpop.f32.mrb[49].mxu0 }
 0x176   :  { %v920_v11 = vpop.f32.mrb[50].mxu0 }
 0x177   :  { %v1146_v20 = vadd.f32 %v2557_v31, %v920_v11  ;;  %v922_v12 = vpop.f32.mrb[51].mxu0 }
 0x179   :  { %v1396_v13 = vpack.c.bf16 %v1146_v20, %v1143_v16 }
 0x17b   :  { %2021 = vmatprep.mubr.bf16.mxu1 %v1396_v13 }
 0x17c   :  { %v925_v17 = vpop.f32.mrb[52].mxu0 }
 0x17d   :  { %v1151_v14 = vadd.f32 %v2551_v25, %v925_v17  ;;  %v927_v18 = vpop.f32.mrb[53].mxu0 }
 0x17e   :  { %v928_v22 = vpop.f32.mrb[54].mxu0 }
 0x17f   :  { %v1154_v19 = vadd.f32 %v2555_v30, %v928_v22  ;;  %v930_v23 = vpop.f32.mrb[55].mxu0 }
 0x181   :  { %v1397_v24 = vpack.c.bf16 %v1154_v19, %v1151_v14 }
 0x183   :  { %2022 = vmatmul.mubr.bf16.gmra.mrb[72].mxu1 %v1397_v24 }
 0x184   :  { %v933_v26 = vpop.f32.mrb[56].mxu0 }
 0x185   :  { %v1159_v27 = vadd.f32 %v2561_v38, %v933_v26  ;;  %v935_v28 = vpop.f32.mrb[57].mxu0 }
 0x186   :  { %v936_v32 = vpop.f32.mrb[58].mxu0 }
 0x187   :  { %v1162_v31 = vadd.f32 %v2565_v42, %v936_v32  ;;  %v938_v33 = vpop.f32.mrb[59].mxu0 }
 0x189   :  { %v1398_v35 = vpack.c.bf16 %v1162_v31, %v1159_v27 }
 0x18b   :  { %2025 = vmatprep.mubr.bf16.mxu1 %v1398_v35 }
 0x18c   :  { %v941_v37 = vpop.f32.mrb[60].mxu0 }
 0x18d   :  { %v1167_v25 = vadd.f32 %v2559_v36, %v941_v37  ;;  %v943_v39 = vpop.f32.mrb[61].mxu0 }
 0x18e   :  { %v944_v40 = vpop.f32.mrb[62].mxu0 }
 0x18f   :  { %v1170_v30 = vadd.f32 %v2563_v41, %v944_v40  ;;  %v946_v5 = vpop.f32.mrb[63].mxu0 }
 0x191   :  { %v1399_v43 = vpack.c.bf16 %v1170_v30, %v1167_v25 }
 0x193   :  { %2026 = vmatmul.mubr.bf16.gmra.mrb[76].mxu1 %v1399_v43 }
 0x194   :  { %v949_v44 = vpop.f32.mrb[64].mxu0 }
 0x195   :  { %v1175_v38 = vadd.f32 %v2570_v50, %v949_v44  ;;  %v951_v45 = vpop.f32.mrb[65].mxu0 }
 0x196   :  { %v952_v46 = vpop.f32.mrb[66].mxu0 }
 0x197   :  { %v1178_v42 = vadd.f32 %v2575_v55, %v952_v46  ;;  %v954_v9 = vpop.f32.mrb[67].mxu0 }
 0x199   :  { %v1400_v48 = vpack.c.bf16 %v1178_v42, %v1175_v38 }
 0x19b   :  { %2029 = vmatprep.mubr.bf16.mxu1 %v1400_v48 }
 0x19c   :  { %v957_v53 = vpop.f32.mrb[68].mxu0 }
 0x19d   :  { %v1183_v36 = vadd.f32 %v2568_v47, %v957_v53  ;;  %v959_v54 = vpop.f32.mrb[69].mxu0 }
 0x19e   :  { %v960_v57 = vpop.f32.mrb[70].mxu0 }
 0x19f   :  { %v1186_v41 = vadd.f32 %v2573_v52, %v960_v57  ;;  %v962_v59 = vpop.f32.mrb[71].mxu0 }
 0x1a1   :  { %v1401_v60 = vpack.c.bf16 %v1186_v41, %v1183_v36 }
 0x1a3   :  { %2030 = vmatmul.mubr.bf16.gmra.mrb[80].mxu1 %v1401_v60 }
 0x1a4   :  { %v965_v3 = vpop.f32.mrb[72].mxu0 }
 0x1a5   :  { %v1191_v50 = vadd.f32 %v2580_v1, %v965_v3  ;;  %v967_v63 = vpop.f32.mrb[73].mxu0 }
 0x1a6   :  { %v968_v0 = vpop.f32.mrb[74].mxu0 }
 0x1a7   :  { %v1194_v55 = vadd.f32 %v2585_v6, %v968_v0  ;;  %v970_v8 = vpop.f32.mrb[75].mxu0 }
 0x1a9   :  { %v1402_v2 = vpack.c.bf16 %v1194_v55, %v1191_v50 }
 0x1ab   :  { %2033 = vmatprep.mubr.bf16.mxu1 %v1402_v2 }
 0x1ac   :  { %v973_v4 = vpop.f32.mrb[76].mxu0 }
 0x1ad   :  { %v1199_v47 = vadd.f32 %v2578_v49, %v973_v4  ;;  %v975_v7 = vpop.f32.mrb[77].mxu0 }
 0x1ae   :  { %v976_v16 = vpop.f32.mrb[78].mxu0 }
 0x1af   :  { %v1202_v52 = vadd.f32 %v2583_v51, %v976_v16  ;;  %v978_v10 = vpop.f32.mrb[79].mxu0 }
 0x1b1   :  { %v1403_v11 = vpack.c.bf16 %v1202_v52, %v1199_v47 }
 0x1b3   :  { %2034 = vmatmul.mubr.bf16.gmra.mrb[84].mxu1 %v1403_v11 }
 0x1b4   :  { %v981_v20 = vpop.f32.mrb[80].mxu0 }
 0x1b5   :  { %v1207_v1 = vadd.f32 %v2590_v15, %v981_v20  ;;  %v983_v12 = vpop.f32.mrb[81].mxu0 }
 0x1b6   :  { %v984_v13 = vpop.f32.mrb[82].mxu0 }
 0x1b7   :  { %v1210_v6 = vadd.f32 %v2595_v21, %v984_v13  ;;  %v986_v17 = vpop.f32.mrb[83].mxu0 }
 0x1b9   :  { %v1404_v14 = vpack.c.bf16 %v1210_v6, %v1207_v1 }
 0x1bb   :  { %2037 = vmatprep.mubr.bf16.mxu1 %v1404_v14 }
 0x1bc   :  { %v989_v18 = vpop.f32.mrb[84].mxu0 }
 0x1bd   :  { %v1215_v49 = vadd.f32 %v2588_v58, %v989_v18  ;;  %v991_v22 = vpop.f32.mrb[85].mxu0 }
 0x1be   :  { %v992_v19 = vpop.f32.mrb[86].mxu0 }
 0x1bf   :  { %v1218_v51 = vadd.f32 %v2593_v62, %v992_v19  ;;  %v994_v23 = vpop.f32.mrb[87].mxu0 }
 0x1c1   :  { %v1405_v24 = vpack.c.bf16 %v1218_v51, %v1215_v49 }
 0x1c3   :  { %2038 = vmatmul.mubr.bf16.gmra.mrb[88].mxu1 %v1405_v24 }
 0x1c4   :  { %v997_v26 = vpop.f32.mrb[88].mxu0 }
 0x1c5   :  { %v1223_v15 = vadd.f32 %v2600_v29, %v997_v26  ;;  %v999_v27 = vpop.f32.mrb[89].mxu0 }
 0x1c6   :  { %v1000_v28 = vpop.f32.mrb[90].mxu0 }
 0x1c7   :  { %v1226_v21 = vadd.f32 %v2605_v34, %v1000_v28  ;;  %v1002_v32 = vpop.f32.mrb[91].mxu0 }
 0x1c9   :  { %v1406_v31 = vpack.c.bf16 %v1226_v21, %v1223_v15 }
 0x1cb   :  { %2041 = vmatprep.mubr.bf16.mxu1 %v1406_v31 }
 0x1cc   :  { %v1005_v33 = vpop.f32.mrb[92].mxu0 }
 0x1cd   :  { %v1231_v58 = vadd.f32 %v2598_v56, %v1005_v33  ;;  %v1007_v35 = vpop.f32.mrb[93].mxu0 }
 0x1ce   :  { %v1008_v37 = vpop.f32.mrb[94].mxu0 }
 0x1cf   :  { %v1234_v62 = vadd.f32 %v2603_v61, %v1008_v37  ;;  %v1010_v25 = vpop.f32.mrb[95].mxu0 }
 0x1d1   :  { %v1407_v39 = vpack.c.bf16 %v1234_v62, %v1231_v58 }
 0x1d3   :  { %2042 = vmatmul.mubr.bf16.gmra.mrb[92].mxu1 %v1407_v39 }
 0x1f6   :  { %v1999_v40 = vpop.f32.mrb[48].mxu1 }
 0x1f7   :  { %1699 = vst [vmem:[%s2784_s3 + $0x10] sm:$0xff] %v1999_v40  ;;  %v1506_v29 = vpop.f32.mrb[49].mxu1 }
 0x1f8   :  { %1697 = vst [vmem:[%s2784_s3] sm:$0xff] %v1506_v29  ;;  %v2000_v34 = vpop.f32.mrb[50].mxu1 }
 0x1f9   :  { %1700 = vst [vmem:[%s2784_s3 + $0x18] sm:$0xff] %v2000_v34  ;;  %v1509_v56 = vpop.f32.mrb[51].mxu1 }
 0x1fa   :  { %1698 = vst [vmem:[%s2784_s3 + $0x8] sm:$0xff] %v1509_v56 }
 0x206   :  { %v2003_v61 = vpop.f32.mrb[52].mxu1 }
 0x207   :  { %1703 = vst [vmem:[%s2784_s3 + $0x30] sm:$0xff] %v2003_v61  ;;  %v1522_v30 = vpop.f32.mrb[53].mxu1 }
 0x208   :  { %1701 = vst [vmem:[%s2784_s3 + $0x20] sm:$0xff] %v1522_v30  ;;  %v2004_v5 = vpop.f32.mrb[54].mxu1 }
 0x209   :  { %1704 = vst [vmem:[%s2784_s3 + $0x38] sm:$0xff] %v2004_v5  ;;  %v1525_v43 = vpop.f32.mrb[55].mxu1 }
 0x20a   :  { %1702 = vst [vmem:[%s2784_s3 + $0x28] sm:$0xff] %v1525_v43 }
 0x216   :  { %v2007_v44 = vpop.f32.mrb[56].mxu1 }
 0x217   :  { %1707 = vst [vmem:[%s2784_s3 + $0x50] sm:$0xff] %v2007_v44  ;;  %v1538_v38 = vpop.f32.mrb[57].mxu1 }
 0x218   :  { %1705 = vst [vmem:[%s2784_s3 + $0x40] sm:$0xff] %v1538_v38  ;;  %v2008_v45 = vpop.f32.mrb[58].mxu1 }
 0x219   :  { %1708 = vst [vmem:[%s2784_s3 + $0x58] sm:$0xff] %v2008_v45  ;;  %v1541_v46 = vpop.f32.mrb[59].mxu1 }
 0x21a   :  { %1706 = vst [vmem:[%s2784_s3 + $0x48] sm:$0xff] %v1541_v46 }
 0x226   :  { %v2011_v42 = vpop.f32.mrb[60].mxu1 }
 0x227   :  { %1711 = vst [vmem:[%s2784_s3 + $0x70] sm:$0xff] %v2011_v42  ;;  %v1554_v9 = vpop.f32.mrb[61].mxu1 }
 0x228   :  { %1709 = vst [vmem:[%s2784_s3 + $0x60] sm:$0xff] %v1554_v9  ;;  %v2012_v48 = vpop.f32.mrb[62].mxu1 }
 0x229   :  { %1712 = vst [vmem:[%s2784_s3 + $0x78] sm:$0xff] %v2012_v48  ;;  %v1557_v53 = vpop.f32.mrb[63].mxu1 }
 0x22a   :  { %1710 = vst [vmem:[%s2784_s3 + $0x68] sm:$0xff] %v1557_v53 }
 0x236   :  { %v2015_v36 = vpop.f32.mrb[64].mxu1 }
 0x237   :  { %1715 = vst [vmem:[%s2784_s3 + $0x90] sm:$0xff] %v2015_v36  ;;  %v1570_v54 = vpop.f32.mrb[65].mxu1 }
 0x238   :  { %1713 = vst [vmem:[%s2784_s3 + $0x80] sm:$0xff] %v1570_v54  ;;  %v2016_v57 = vpop.f32.mrb[66].mxu1 }
 0x239   :  { %1716 = vst [vmem:[%s2784_s3 + $0x98] sm:$0xff] %v2016_v57  ;;  %v1573_v41 = vpop.f32.mrb[67].mxu1 }
 0x23a   :  { %1714 = vst [vmem:[%s2784_s3 + $0x88] sm:$0xff] %v1573_v41 }
 0x246   :  { %v2019_v59 = vpop.f32.mrb[68].mxu1 }
 0x247   :  { %1719 = vst [vmem:[%s2784_s3 + $0xb0] sm:$0xff] %v2019_v59  ;;  %v1586_v60 = vpop.f32.mrb[69].mxu1 }
 0x248   :  { %1717 = vst [vmem:[%s2784_s3 + $0xa0] sm:$0xff] %v1586_v60  ;;  %v2020_v3 = vpop.f32.mrb[70].mxu1 }
 0x249   :  { %1720 = vst [vmem:[%s2784_s3 + $0xb8] sm:$0xff] %v2020_v3  ;;  %v1589_v50 = vpop.f32.mrb[71].mxu1 }
 0x24a   :  { %1718 = vst [vmem:[%s2784_s3 + $0xa8] sm:$0xff] %v1589_v50 }
 0x256   :  { %v2023_v63 = vpop.f32.mrb[72].mxu1 }
 0x257   :  { %1723 = vst [vmem:[%s2784_s3 + $0xd0] sm:$0xff] %v2023_v63  ;;  %v1602_v0 = vpop.f32.mrb[73].mxu1 }
 0x258   :  { %1721 = vst [vmem:[%s2784_s3 + $0xc0] sm:$0xff] %v1602_v0  ;;  %v2024_v55 = vpop.f32.mrb[74].mxu1 }
 0x259   :  { %1724 = vst [vmem:[%s2784_s3 + $0xd8] sm:$0xff] %v2024_v55  ;;  %v1605_v8 = vpop.f32.mrb[75].mxu1 }
 0x25a   :  { %1722 = vst [vmem:[%s2784_s3 + $0xc8] sm:$0xff] %v1605_v8 }
 0x266   :  { %v2027_v2 = vpop.f32.mrb[76].mxu1 }
 0x267   :  { %1727 = vst [vmem:[%s2784_s3 + $0xf0] sm:$0xff] %v2027_v2  ;;  %v1618_v4 = vpop.f32.mrb[77].mxu1 }
 0x268   :  { %1725 = vst [vmem:[%s2784_s3 + $0xe0] sm:$0xff] %v1618_v4  ;;  %v2028_v47 = vpop.f32.mrb[78].mxu1 }
 0x269   :  { %1728 = vst [vmem:[%s2784_s3 + $0xf8] sm:$0xff] %v2028_v47  ;;  %v1621_v7 = vpop.f32.mrb[79].mxu1 }
 0x26a   :  { %1726 = vst [vmem:[%s2784_s3 + $0xe8] sm:$0xff] %v1621_v7 }
 0x276   :  { %v2031_v16 = vpop.f32.mrb[80].mxu1 }
 0x277   :  { %1731 = vst [vmem:[%s2784_s3 + $0x110] sm:$0xff] %v2031_v16  ;;  %v1634_v52 = vpop.f32.mrb[81].mxu1 }
 0x278   :  { %1729 = vst [vmem:[%s2784_s3 + $0x100] sm:$0xff] %v1634_v52  ;;  %v2032_v10 = vpop.f32.mrb[82].mxu1 }
 0x279   :  { %1732 = vst [vmem:[%s2784_s3 + $0x118] sm:$0xff] %v2032_v10  ;;  %v1637_v11 = vpop.f32.mrb[83].mxu1 }
 0x27a   :  { %1730 = vst [vmem:[%s2784_s3 + $0x108] sm:$0xff] %v1637_v11 }
 0x286   :  { %v2035_v20 = vpop.f32.mrb[84].mxu1 }
 0x287   :  { %1735 = vst [vmem:[%s2784_s3 + $0x130] sm:$0xff] %v2035_v20  ;;  %v1650_v1 = vpop.f32.mrb[85].mxu1 }
 0x288   :  { %1733 = vst [vmem:[%s2784_s3 + $0x120] sm:$0xff] %v1650_v1  ;;  %v2036_v12 = vpop.f32.mrb[86].mxu1 }
 0x289   :  { %1736 = vst [vmem:[%s2784_s3 + $0x138] sm:$0xff] %v2036_v12  ;;  %v1653_v13 = vpop.f32.mrb[87].mxu1 }
 0x28a   :  { %1734 = vst [vmem:[%s2784_s3 + $0x128] sm:$0xff] %v1653_v13 }
 0x296   :  { %v2039_v6 = vpop.f32.mrb[88].mxu1 }
 0x297   :  { %1739 = vst [vmem:[%s2784_s3 + $0x150] sm:$0xff] %v2039_v6  ;;  %v1666_v17 = vpop.f32.mrb[89].mxu1 }
 0x298   :  { %1737 = vst [vmem:[%s2784_s3 + $0x140] sm:$0xff] %v1666_v17  ;;  %v2040_v14 = vpop.f32.mrb[90].mxu1 }
 0x299   :  { %1740 = vst [vmem:[%s2784_s3 + $0x158] sm:$0xff] %v2040_v14  ;;  %v1669_v18 = vpop.f32.mrb[91].mxu1 }
 0x29a   :  { %1738 = vst [vmem:[%s2784_s3 + $0x148] sm:$0xff] %v1669_v18 }
 0x2a6   :  { %v2043_v49 = vpop.f32.mrb[92].mxu1 }
 0x2a7   :  { %1743 = vst [vmem:[%s2784_s3 + $0x170] sm:$0xff] %v2043_v49  ;;  %v1682_v22 = vpop.f32.mrb[93].mxu1 }
 0x2a8   :  { %1741 = vst [vmem:[%s2784_s3 + $0x160] sm:$0xff] %v1682_v22  ;;  %v2044_v19 = vpop.f32.mrb[94].mxu1 }
 0x2a9   :  { %1744 = vst [vmem:[%s2784_s3 + $0x178] sm:$0xff] %v2044_v19  ;;  %v1685_v51 = vpop.f32.mrb[95].mxu1 }
 0x2aa   :  { %1742 = vst [vmem:[%s2784_s3 + $0x168] sm:$0xff] %v1685_v51 }

// kernel: encoder_forward.5
= control target key start
LH: loop header
LB: loop body
LE: loop exit
PB: predicated region body
PF: predicated region fallthrough
CT: control target
= control target key end

     0   :  { %v4458_v0 = vmov 0   ;;  %s5799_s1 = inlined_call_operand.vmem [shape: bf16[384,128], index: 1, kind: input, shape index: {}]   ;;  %s5800_s0 = inlined_call_operand.vmem [shape: bf16[384,384], index: 0, kind: input, shape index: {}]   ;;  %s5801_s2 = inlined_call_operand.vmem [shape: bf16[384,128], index: 2, kind: input, shape index: {}]   ;;  %s5802_s3 = inlined_call_operand.vmem [shape: f32[384,128], index: 3, kind: output, shape index: {0}]   ;;  %s5803_s4 = inlined_call_operand.vmem [shape: bf16[384,128], index: 4, kind: output, shape index: {1}]   ;;  %s5804_s5 = inlined_call_operand.vmem [shape: bf16[384,128], index: 5, kind: output, shape index: {2}]   ;;  %s5805_s6 = inlined_call_operand.vmem [shape: bf16[384,128], index: 6, kind: output, shape index: {3}]   ;;  %s5806_s7 = inlined_call_operand.vmem [shape: f32[8,128], index: 7, kind: output, shape index: {4}]   ;;  %s5807_s8 = inlined_call_operand.vmem [shape: f32[8,128], index: 8, kind: output, shape index: {5}]  }
   0x1   :  { %841 = vmatprep.subr.bf16.mxu0 %v4458_v0  ;;  %v4314_v1 = vld [vmem:[%s5799_s1] sm:$0xff]   ;;  %v4316_v3 = vld [vmem:[%s5799_s1 + $0x8] sm:$0xff]   ;;  %v4319_v5 = vld [vmem:[%s5799_s1 + $0x90] sm:$0xff]  }
   0x2   :  { %v4315_v2 = vld [vmem:[%s5799_s1 + $0x80] sm:$0xff]   ;;  %842 = vmatpush1.bf16.msra.mxu0 %v4314_v1  ;;  %v4317_v4 = vld [vmem:[%s5799_s1 + $0x88] sm:$0xff]   ;;  %v4318_v6 = vld [vmem:[%s5799_s1 + $0x10] sm:$0xff]  }
   0x3   :  { %4169 = vmatprep.subr.bf16.mxu1 %v4315_v2  ;;  %843 = vmatprep.subr.bf16.mxu0 %v4458_v0  ;;  %v4321_v7 = vld [vmem:[%s5799_s1 + $0x98] sm:$0xff]   ;;  %v4323_v9 = vld [vmem:[%s5799_s1 + $0xa0] sm:$0xff]   ;;  %v4542_v11 = vld [vmem:[%s5800_s0 + $0x8] ss:$12 sps:$4 sm:$0xff]  }
   0x4   :  { %4170 = vmatpush3.bf16.msra.mxu1 %v4315_v2  ;;  %v4320_v8 = vld [vmem:[%s5799_s1 + $0x18] sm:$0xff]   ;;  %v4322_v10 = vld [vmem:[%s5799_s1 + $0x20] sm:$0xff]   ;;  %v4325_v12 = vld [vmem:[%s5799_s1 + $0xa8] sm:$0xff]   ;;  %4185 = vmatprep.mubr.bf16.mxu1 %v4542_v11 }
   0x5   :  { %4171 = vmatprep.subr.bf16.mxu1 %v4317_v4  ;;  %v4324_v13 = vld [vmem:[%s5799_s1 + $0x28] sm:$0xff]   ;;  %v4327_v14 = vld [vmem:[%s5799_s1 + $0xb0] sm:$0xff]   ;;  %v4329_v16 = vld [vmem:[%s5799_s1 + $0xb8] sm:$0xff]  }
   0x6   :  { %844 = vmatpush1.bf16.msra.mxu0 %v4316_v3  ;;  %v4326_v15 = vld [vmem:[%s5799_s1 + $0x30] sm:$0xff]   ;;  %v4328_v17 = vld [vmem:[%s5799_s1 + $0x38] sm:$0xff]   ;;  %v4331_v18 = vld [vmem:[%s5799_s1 + $0x40] sm:$0xff]  }
   0x7   :  { %845 = vmatprep.subr.bf16.mxu0 %v4458_v0  ;;  %v4572_v19 = vld [vmem:[%s5800_s0 + $0x20] ss:$12 sps:$4 sm:$0xff]   ;;  %v4578_v20 = vld [vmem:[%s5800_s0 + $0x38] ss:$12 sps:$4 sm:$0xff]   ;;  %v4335_v25 = vld [vmem:[%s5799_s1 + $0x50] sm:$0xff]  }
   0x8   :  { %4172 = vmatpush3.bf16.msra.mxu1 %v4317_v4  ;;  %v4341_v21 = vld [vmem:[%s5801_s2] sm:$0xff]   ;;  %v4333_v22 = vld [vmem:[%s5799_s1 + $0x48] sm:$0xff]   ;;  %v4605_v26 = vld [vmem:[%s5800_s0 + $0x50] ss:$12 sps:$4 sm:$0xff]  }
   0x9   :  { %4173 = vmatprep.subr.bf16.mxu1 %v4319_v5  ;;  %v4343_v23 = vld [vmem:[%s5801_s2 + $0x8] sm:$0xff]   ;;  %v4596_v24 = vld [vmem:[%s5800_s0 + $0x4] ss:$12 sps:$4 sm:$0xff]   ;;  %v4337_v29 = vld [vmem:[%s5799_s1 + $0x58] sm:$0xff]  }
   0xa   :  { %846 = vmatpush1.bf16.msra.mxu0 %v4318_v6  ;;  %873 = vmatprep.mubr.bf16.mxu0 %v4596_v24  ;;  %v4612_v27 = vld [vmem:[%s5800_s0 + $0x68] ss:$12 sps:$4 sm:$0xff]   ;;  %v4355_v30 = vld [vmem:[%s5801_s2 + $0x18] sm:$0xff]   ;;  %v4339_v31 = vld [vmem:[%s5799_s1 + $0x60] sm:$0xff]  }
   0xb   :  { %847 = vmatprep.subr.bf16.mxu0 %v4458_v0  ;;  %v4348_v28 = vld [vmem:[%s5801_s2 + $0x10] sm:$0xff]   ;;  %v4634_v32 = vld [vmem:[%s5800_s0 + $0x80] ss:$12 sps:$4 sm:$0xff]   ;;  %v4640_v33 = vld [vmem:[%s5800_s0 + $0x98] ss:$12 sps:$4 sm:$0xff]  }
   0xc   :  { %4174 = vmatpush3.bf16.msra.mxu1 %v4319_v5  ;;  %v4361_v34 = vld [vmem:[%s5801_s2 + $0x20] sm:$0xff]   ;;  %v4342_v35 = vld [vmem:[%s5799_s1 + $0x68] sm:$0xff]   ;;  %v4345_v37 = vld [vmem:[%s5799_s1 + $0x70] sm:$0xff]  }
   0xd   :  { %4175 = vmatprep.subr.bf16.mxu1 %v4321_v7  ;;  %v4364_v36 = vld [vmem:[%s5801_s2 + $0x28] sm:$0xff]   ;;  %v4663_v38 = vld [vmem:[%s5800_s0 + $0xb0] ss:$12 sps:$4 sm:$0xff]   ;;  %v4687_v43 = vld [vmem:[%s5801_s2 + $0x80] sm:$0xff]  }
   0xe   :  { %848 = vmatpush1.bf16.msra.mxu0 %v4320_v8  ;;  %v4668_v39 = vld [vmem:[%s5800_s0 + $0xc8] ss:$12 sps:$4 sm:$0xff]   ;;  %v4347_v41 = vld [vmem:[%s5799_s1 + $0x78] sm:$0xff]   ;;  %v4682_v42 = vld [vmem:[%s5800_s0] ss:$12 sps:$4 sm:$0xff]  }
   0xf   :  { %849 = vmatprep.subr.bf16.mxu0 %v4458_v0  ;;  %v4368_v40 = vld [vmem:[%s5801_s2 + $0x30] sm:$0xff]   ;;  %v4375_v44 = vld [vmem:[%s5801_s2 + $0x38] sm:$0xff]   ;;  %v4696_v45 = vld [vmem:[%s5800_s0 + $0xe0] ss:$12 sps:$4 sm:$0xff]  }
  0x10   :  { %4176 = vmatpush3.bf16.msra.mxu1 %v4321_v7  ;;  %v4701_v46 = vld [vmem:[%s5800_s0 + $0x1c] ss:$12 sps:$4 sm:$0xff]   ;;  %v4707_v47 = vld [vmem:[%s5800_s0 + $0xf8] ss:$12 sps:$4 sm:$0xff]   ;;  %v4742_v53 = vld [vmem:[%s5801_s2 + $0x90] sm:$0xff]  }
  0x11   :  { %4177 = vmatprep.subr.bf16.mxu1 %v4323_v9  ;;  %v4713_v48 = vld [vmem:[%s5801_s2 + $0x88] sm:$0xff]   ;;  %v4381_v49 = vld [vmem:[%s5801_s2 + $0x40] sm:$0xff]   ;;  %v4736_v52 = vld [vmem:[%s5800_s0 + $0x110] ss:$12 sps:$4 sm:$0xff]  }
  0x12   :  { %850 = vmatpush1.bf16.msra.mxu0 %v4322_v10  ;;  %v4726_v50 = vld [vmem:[%s5800_s0 + $0x18] ss:$12 sps:$4 sm:$0xff]   ;;  %v4382_v51 = vld [vmem:[%s5801_s2 + $0x48] sm:$0xff]   ;;  %v4747_v54 = vld [vmem:[%s5800_s0 + $0x34] ss:$12 sps:$4 sm:$0xff]  }
  0x13   :  { %851 = vmatprep.subr.bf16.mxu0 %v4458_v0  ;;  %v4753_v55 = vld [vmem:[%s5800_s0 + $0x128] ss:$12 sps:$4 sm:$0xff]   ;;  %v4389_v57 = vld [vmem:[%s5801_s2 + $0x58] sm:$0xff]   ;;  %v4777_v59 = vld [vmem:[%s5800_s0 + $0x140] ss:$12 sps:$4 sm:$0xff]  }
  0x14   :  { %4178 = vmatpush3.bf16.msra.mxu1 %v4323_v9  ;;  %v4388_v56 = vld [vmem:[%s5801_s2 + $0x50] sm:$0xff]   ;;  %v4782_v60 = vld [vmem:[%s5800_s0 + $0x4c] ss:$12 sps:$4 sm:$0xff]   ;;  %v4396_v62 = vld [vmem:[%s5801_s2 + $0x60] sm:$0xff]  }
  0x15   :  { %4179 = vmatprep.subr.bf16.mxu1 %v4325_v12  ;;  %v4771_v58 = vld [vmem:[%s5800_s0 + $0x30] ss:$12 sps:$4 sm:$0xff]   ;;  %v4787_v61 = vld [vmem:[%s5800_s0 + $0x158] ss:$12 sps:$4 sm:$0xff]   ;;  %v4804_v1 = vld [vmem:[%s5800_s0 + $0x48] ss:$12 sps:$4 sm:$0xff]  }
  0x16   :  { %852 = vmatpush1.bf16.msra.mxu0 %v4324_v13  ;;  %v4797_v63 = vld [vmem:[%s5801_s2 + $0x98] sm:$0xff]   ;;  %v4397_v2 = vld [vmem:[%s5801_s2 + $0x68] sm:$0xff]   ;;  %v4814_v3 = vld [vmem:[%s5800_s0 + $0x64] ss:$12 sps:$4 sm:$0xff]  }
  0x17   :  { %853 = vmatprep.subr.bf16.mxu0 %v4458_v0  ;;  %v4821_v4 = vld [vmem:[%s5801_s2 + $0xa0] sm:$0xff]   ;;  %v4826_v5 = vld [vmem:[%s5800_s0 + $0x170] ss:$12 sps:$4 sm:$0xff]   ;;  %v4831_v6 = vld [vmem:[%s5800_s0 + $0x188] ss:$12 sps:$4 sm:$0xff]  }
  0x18   :  { %4180 = vmatpush3.bf16.msra.mxu1 %v4325_v12  ;;  %v4403_v7 = vld [vmem:[%s5801_s2 + $0x70] sm:$0xff]   ;;  %v4845_v8 = vld [vmem:[%s5801_s2 + $0xa8] sm:$0xff]   ;;  %v4404_v9 = vld [vmem:[%s5801_s2 + $0x78] sm:$0xff]  }
  0x19   :  { %4181 = vmatprep.subr.bf16.mxu1 %v4327_v14  ;;  %v4854_v10 = vld [vmem:[%s5800_s0 + $0x60] ss:$12 sps:$4 sm:$0xff]   ;;  %v4866_v13 = vld [vmem:[%s5800_s0 + $0x7c] ss:$12 sps:$4 sm:$0xff]  }
  0x1a   :  { %854 = vmatpush1.bf16.msra.mxu0 %v4326_v15  ;;  %v4859_v12 = vld [vmem:[%s5800_s0 + $0x1a0] ss:$12 sps:$4 sm:$0xff]   ;;  %v4877_v15 = vld [vmem:[%s5801_s2 + $0xb0] sm:$0xff]  }
  0x1b   :  { %855 = vmatprep.subr.bf16.mxu0 %v4458_v0 }
  0x1c   :  { %4182 = vmatpush3.bf16.msra.mxu1 %v4327_v14  ;;  %v4872_v14 = vld [vmem:[%s5800_s0 + $0x1b8] ss:$12 sps:$4 sm:$0xff]  }
  0x1d   :  { %4183 = vmatprep.subr.bf16.mxu1 %v4329_v16 }
  0x1e   :  { %856 = vmatpush1.bf16.msra.mxu0 %v4328_v17  ;;  %v4899_v17 = vld [vmem:[%s5800_s0 + $0x1d0] ss:$12 sps:$4 sm:$0xff]  }
  0x1f   :  { %857 = vmatprep.subr.bf16.mxu0 %v4458_v0 }
  0x20   :  { %4184 = vmatpush3.bf16.msra.mxu1 %v4329_v16  ;;  %v4894_v16 = vld [vmem:[%s5800_s0 + $0x94] ss:$12 sps:$4 sm:$0xff]  }
  0x21   :  { %1627 = vmatprep.subr.bf16.mxu1 %v4458_v0 }
  0x22   :  { %858 = vmatpush1.bf16.msra.mxu0 %v4331_v18  ;;  %v4904_v18 = vld [vmem:[%s5800_s0 + $0x1e8] ss:$12 sps:$4 sm:$0xff]  }
  0x23   :  { %4186 = vmatmul.mubr.bf16.vlgmr.msra.gmra.mrb[0].mxu1 %v4572_v19  ;;  %859 = vmatprep.subr.bf16.mxu0 %v4458_v0 }
  0x24   :  { %4189 = vmatprep.mubr.bf16.mxu1 %v4578_v20  ;;  %1628 = vmatpush1.bf16.msra.mxu1 %v4341_v21  ;;  %v4451_v21 = vld [vmem:[%s5801_s2 + $0xb8] sm:$0xff]  }
  0x25   :  { %1629 = vmatprep.subr.bf16.mxu1 %v4458_v0 }
  0x26   :  { %860 = vmatpush1.bf16.msra.mxu0 %v4333_v22  ;;  %v4916_v22 = vld [vmem:[%s5800_s0 + $0x90] ss:$12 sps:$4 sm:$0xff]  }
  0x27   :  { %861 = vmatprep.subr.bf16.mxu0 %v4458_v0 }
  0x28   :  { %1630 = vmatpush1.bf16.msra.mxu1 %v4343_v23  ;;  %v4921_v23 = vld [vmem:[%s5800_s0 + $0xac] ss:$12 sps:$4 sm:$0xff]  }
  0x29   :  { %1631 = vmatprep.subr.bf16.mxu1 %v4458_v0 }
  0x2a   :  { %862 = vmatpush1.bf16.msra.mxu0 %v4335_v25  ;;  %v4926_v25 = vld [vmem:[%s5800_s0 + $0x200] ss:$12 sps:$4 sm:$0xff]  }
  0x2b   :  { %4190 = vmatmul.mubr.bf16.gmra.mrb[4].mxu1 %v4605_v26  ;;  %863 = vmatprep.subr.bf16.mxu0 %v4458_v0 }
  0x2c   :  { %4193 = vmatprep.mubr.bf16.mxu1 %v4612_v27  ;;  %1632 = vmatpush1.bf16.msra.mxu1 %v4348_v28  ;;  %v4931_v28 = vld [vmem:[%s5800_s0 + $0x218] ss:$12 sps:$4 sm:$0xff]  }
  0x2d   :  { %1633 = vmatprep.subr.bf16.mxu1 %v4458_v0 }
  0x2e   :  { %864 = vmatpush1.bf16.msra.mxu0 %v4337_v29  ;;  %v4940_v29 = vld [vmem:[%s5800_s0 + $0xa8] ss:$12 sps:$4 sm:$0xff]  }
  0x2f   :  { %865 = vmatprep.subr.bf16.mxu0 %v4458_v0 }
  0x30   :  { %1634 = vmatpush1.bf16.msra.mxu1 %v4355_v30  ;;  %v4945_v30 = vld [vmem:[%s5800_s0 + $0xc4] ss:$12 sps:$4 sm:$0xff]  }
  0x31   :  { %1635 = vmatprep.subr.bf16.mxu1 %v4458_v0 }
  0x32   :  { %866 = vmatpush1.bf16.msra.mxu0 %v4339_v31  ;;  %v4950_v31 = vld [vmem:[%s5800_s0 + $0x230] ss:$12 sps:$4 sm:$0xff]  }
  0x33   :  { %4194 = vmatmul.mubr.bf16.gmra.mrb[8].mxu1 %v4634_v32  ;;  %867 = vmatprep.subr.bf16.mxu0 %v4458_v0 }
  0x34   :  { %4197 = vmatprep.mubr.bf16.mxu1 %v4640_v33  ;;  %1636 = vmatpush1.bf16.msra.mxu1 %v4361_v34  ;;  %v4959_v34 = vld [vmem:[%s5800_s0 + $0xc0] ss:$12 sps:$4 sm:$0xff]  }
  0x35   :  { %1637 = vmatprep.subr.bf16.mxu1 %v4458_v0 }
  0x36   :  { %868 = vmatpush1.bf16.msra.mxu0 %v4342_v35  ;;  %v4964_v35 = vld [vmem:[%s5800_s0 + $0xdc] ss:$12 sps:$4 sm:$0xff]  }
  0x37   :  { %869 = vmatprep.subr.bf16.mxu0 %v4458_v0 }
  0x38   :  { %1638 = vmatpush1.bf16.msra.mxu1 %v4364_v36  ;;  %v4980_v36 = vld [vmem:[%s5800_s0 + $0xf4] ss:$12 sps:$4 sm:$0xff]  }
  0x39   :  { %1639 = vmatprep.subr.bf16.mxu1 %v4458_v0 }
  0x3a   :  { %870 = vmatpush1.bf16.msra.mxu0 %v4345_v37  ;;  %v4414_v37 = vld [vmem:[%s5800_s0 + $0xf0] ss:$12 sps:$4 sm:$0xff]  }
  0x3b   :  { %4198 = vmatmul.mubr.bf16.gmra.mrb[12].mxu1 %v4663_v38  ;;  %871 = vmatprep.subr.bf16.mxu0 %v4458_v0 }
  0x3c   :  { %4201 = vmatprep.mubr.bf16.mxu1 %v4668_v39  ;;  %1640 = vmatpush1.bf16.msra.mxu1 %v4368_v40  ;;  %v4415_v40 = vld [vmem:[%s5800_s0 + $0x10c] ss:$12 sps:$4 sm:$0xff]  }
  0x3d   :  { %1641 = vmatprep.subr.bf16.mxu1 %v4458_v0 }
  0x3e   :  { %872 = vmatpush1.bf16.msra.mxu0 %v4347_v41  ;;  %v4417_v41 = vld [vmem:[%s5800_s0 + $0x108] ss:$12 sps:$4 sm:$0xff]  }
  0x3f   :  { %4233 = vmatprep.subr.bf16.mxu0 %v4687_v43 }
  0x40   :  { %1642 = vmatpush1.bf16.msra.mxu1 %v4375_v44  ;;  %v4422_v44 = vld [vmem:[%s5800_s0 + $0x13c] ss:$12 sps:$4 sm:$0xff]  }
  0x41   :  { %874 = vmatmul.mubr.bf16.vlgmr.msra.gmra.mrb[0].mxu0 %v4682_v42  ;;  %1643 = vmatprep.subr.bf16.mxu1 %v4458_v0 }
  0x42   :  { %4234 = vmatpush3.bf16.msra.mxu0 %v4687_v43  ;;  %881 = vmatprep.mubr.bf16.mxu0 %v4701_v46 }
  0x43   :  { %4202 = vmatmul.mubr.bf16.gmra.mrb[16].mxu1 %v4696_v45  ;;  %4235 = vmatprep.subr.bf16.mxu0 %v4713_v48 }
  0x44   :  { %4205 = vmatprep.mubr.bf16.mxu1 %v4707_v47  ;;  %1644 = vmatpush1.bf16.msra.mxu1 %v4381_v49  ;;  %v4427_v49 = vld [vmem:[%s5800_s0 + $0x150] ss:$12 sps:$4 sm:$0xff]  }
  0x45   :  { %1645 = vmatprep.subr.bf16.mxu1 %v4458_v0 }
  0x46   :  { %4236 = vmatpush3.bf16.msra.mxu0 %v4713_v48 }
  0x47   :  { %4237 = vmatprep.subr.bf16.mxu0 %v4742_v53 }
  0x48   :  { %1646 = vmatpush1.bf16.msra.mxu1 %v4382_v51  ;;  %v4430_v51 = vld [vmem:[%s5800_s0 + $0x168] ss:$12 sps:$4 sm:$0xff]  }
  0x49   :  { %882 = vmatmul.mubr.bf16.gmra.mrb[4].mxu0 %v4726_v50  ;;  %1647 = vmatprep.subr.bf16.mxu1 %v4458_v0 }
  0x4a   :  { %889 = vmatprep.mubr.bf16.mxu0 %v4747_v54  ;;  %4238 = vmatpush3.bf16.msra.mxu0 %v4742_v53 }
  0x4b   :  { %4206 = vmatmul.mubr.bf16.gmra.mrb[20].mxu1 %v4736_v52  ;;  %4239 = vmatprep.subr.bf16.mxu0 %v4797_v63 }
  0x4c   :  { %4209 = vmatprep.mubr.bf16.mxu1 %v4753_v55  ;;  %1648 = vmatpush1.bf16.msra.mxu1 %v4388_v56  ;;  %v4435_v56 = vld [vmem:[%s5800_s0 + $0x19c] ss:$12 sps:$4 sm:$0xff]  }
  0x4d   :  { %1649 = vmatprep.subr.bf16.mxu1 %v4458_v0 }
  0x4e   :  { %4240 = vmatpush3.bf16.msra.mxu0 %v4797_v63 }
  0x4f   :  { %4241 = vmatprep.subr.bf16.mxu0 %v4821_v4 }
  0x50   :  { %1650 = vmatpush1.bf16.msra.mxu1 %v4389_v57  ;;  %v4437_v57 = vld [vmem:[%s5800_s0 + $0x198] ss:$12 sps:$4 sm:$0xff]  }
  0x51   :  { %890 = vmatmul.mubr.bf16.gmra.mrb[8].mxu0 %v4771_v58  ;;  %1651 = vmatprep.subr.bf16.mxu1 %v4458_v0 }
  0x52   :  { %897 = vmatprep.mubr.bf16.mxu0 %v4782_v60  ;;  %4242 = vmatpush3.bf16.msra.mxu0 %v4821_v4 }
  0x53   :  { %4210 = vmatmul.mubr.bf16.gmra.mrb[24].mxu1 %v4777_v59  ;;  %4243 = vmatprep.subr.bf16.mxu0 %v4845_v8 }
  0x54   :  { %4213 = vmatprep.mubr.bf16.mxu1 %v4787_v61  ;;  %1652 = vmatpush1.bf16.msra.mxu1 %v4396_v62  ;;  %v4442_v62 = vld [vmem:[%s5800_s0 + $0x1cc] ss:$12 sps:$4 sm:$0xff]  }
  0x55   :  { %1653 = vmatprep.subr.bf16.mxu1 %v4458_v0 }
  0x56   :  { %4244 = vmatpush3.bf16.msra.mxu0 %v4845_v8 }
  0x57   :  { %4245 = vmatprep.subr.bf16.mxu0 %v4877_v15 }
  0x58   :  { %1654 = vmatpush1.bf16.msra.mxu1 %v4397_v2  ;;  %v5082_v2 = vld [vmem:[%s5800_s0 + $0x1e0] ss:$12 sps:$4 sm:$0xff]  }
  0x59   :  { %898 = vmatmul.mubr.bf16.gmra.mrb[12].mxu0 %v4804_v1  ;;  %1655 = vmatprep.subr.bf16.mxu1 %v4458_v0 }
  0x5a   :  { %905 = vmatprep.mubr.bf16.mxu0 %v4814_v3  ;;  %4246 = vmatpush3.bf16.msra.mxu0 %v4877_v15 }
  0x5b   :  { %4214 = vmatmul.mubr.bf16.gmra.mrb[28].mxu1 %v4826_v5  ;;  %4247 = vmatprep.subr.bf16.mxu0 %v4451_v21 }
  0x5c   :  { %4217 = vmatprep.mubr.bf16.mxu1 %v4831_v6  ;;  %1656 = vmatpush1.bf16.msra.mxu1 %v4403_v7  ;;  %v5099_v7 = vld [vmem:[%s5800_s0 + $0x214] ss:$12 sps:$4 sm:$0xff]  }
  0x5d   :  { %1657 = vmatprep.subr.bf16.mxu1 %v4458_v0  ;;  %v4888_v0 = vld [vmem:[%s5800_s0 + $0x78] ss:$12 sps:$4 sm:$0xff]  }
  0x5e   :  { %4248 = vmatpush3.bf16.msra.mxu0 %v4451_v21 }
  0x60   :  { %1658 = vmatpush1.bf16.msra.mxu1 %v4404_v9  ;;  %v5111_v9 = vld [vmem:[%s5800_s0 + $0x22c] ss:$12 sps:$4 sm:$0xff]  }
  0x61   :  { %906 = vmatmul.mubr.bf16.gmra.mrb[16].mxu0 %v4854_v10  ;;  %4297 = vmatprep.subr.bf16.mxu1 %v4687_v43 }
  0x62   :  { %913 = vmatprep.mubr.bf16.mxu0 %v4866_v13 }
  0x63   :  { %4218 = vmatmul.mubr.bf16.gmra.mrb[32].mxu1 %v4859_v12 }
  0x64   :  { %4221 = vmatprep.mubr.bf16.mxu1 %v4872_v14 }
  0x69   :  { %914 = vmatmul.mubr.bf16.gmra.mrb[20].mxu0 %v4888_v0 }
  0x6a   :  { %921 = vmatprep.mubr.bf16.mxu0 %v4894_v16 }
  0x6b   :  { %4222 = vmatmul.mubr.bf16.gmra.mrb[36].mxu1 %v4899_v17 }
  0x6c   :  { %4225 = vmatprep.mubr.bf16.mxu1 %v4904_v18 }
  0x71   :  { %922 = vmatmul.mubr.bf16.gmra.mrb[24].mxu0 %v4916_v22 }
  0x72   :  { %929 = vmatprep.mubr.bf16.mxu0 %v4921_v23 }
  0x73   :  { %4226 = vmatmul.mubr.bf16.gmra.mrb[40].mxu1 %v4926_v25 }
  0x74   :  { %4229 = vmatprep.mubr.bf16.mxu1 %v4931_v28 }
  0x79   :  { %930 = vmatmul.mubr.bf16.gmra.mrb[28].mxu0 %v4940_v29 }
  0x7a   :  { %937 = vmatprep.mubr.bf16.mxu0 %v4945_v30 }
  0x7b   :  { %4230 = vmatmul.mubr.bf16.gmra.mrb[44].mxu1 %v4950_v31 }
  0x7c   :  { %1659 = vmatprep.mubr.bf16.mxu1 %v4596_v24  ;;  %v4974_v24 = vld [vmem:[%s5800_s0 + $0xd8] ss:$12 sps:$4 sm:$0xff]  }
  0x81   :  { %938 = vmatmul.mubr.bf16.gmra.mrb[32].mxu0 %v4959_v34 }
  0x82   :  { %945 = vmatprep.mubr.bf16.mxu0 %v4964_v35 }
  0x83   :  { %1660 = vmatmul.mubr.bf16.vlgmr.msra.gmra.mrb[48].mxu1 %v4682_v42  ;;  %v4418_v42 = vld [vmem:[%s5800_s0 + $0x124] ss:$12 sps:$4 sm:$0xff]  }
  0x84   :  { %1667 = vmatprep.mubr.bf16.mxu1 %v4701_v46  ;;  %4305 = vmatpush3.bf16.msra.mxu1 %v4687_v43  ;;  %v4420_v43 = vld [vmem:[%s5800_s0 + $0x120] ss:$12 sps:$4 sm:$0xff]   ;;  %v4424_v46 = vld [vmem:[%s5800_s0 + $0x138] ss:$12 sps:$4 sm:$0xff]  }
  0x85   :  { %4298 = vmatprep.subr.bf16.mxu1 %v4713_v48 }
  0x88   :  { %4306 = vmatpush3.bf16.msra.mxu1 %v4713_v48  ;;  %v4425_v48 = vld [vmem:[%s5800_s0 + $0x154] ss:$12 sps:$4 sm:$0xff]  }
  0x89   :  { %946 = vmatmul.mubr.bf16.gmra.mrb[36].mxu0 %v4974_v24  ;;  %4299 = vmatprep.subr.bf16.mxu1 %v4742_v53 }
  0x8a   :  { %953 = vmatprep.mubr.bf16.mxu0 %v4980_v36 }
  0x8b   :  { %1668 = vmatmul.mubr.bf16.gmra.mrb[52].mxu1 %v4726_v50  ;;  %v4428_v50 = vld [vmem:[%s5800_s0 + $0x16c] ss:$12 sps:$4 sm:$0xff]  }
  0x8c   :  { %1675 = vmatprep.mubr.bf16.mxu1 %v4747_v54  ;;  %4307 = vmatpush3.bf16.msra.mxu1 %v4742_v53  ;;  %v4432_v53 = vld [vmem:[%s5800_s0 + $0x184] ss:$12 sps:$4 sm:$0xff]   ;;  %v4434_v54 = vld [vmem:[%s5800_s0 + $0x180] ss:$12 sps:$4 sm:$0xff]  }
  0x8d   :  { %4300 = vmatprep.subr.bf16.mxu1 %v4797_v63 }
  0x90   :  { %4308 = vmatpush3.bf16.msra.mxu1 %v4797_v63  ;;  %v5070_v63 = vld [vmem:[%s5800_s0 + $0x1c8] ss:$12 sps:$4 sm:$0xff]  }
  0x91   :  { %954 = vmatmul.mubr.bf16.gmra.mrb[40].mxu0 %v4414_v37  ;;  %4301 = vmatprep.subr.bf16.mxu1 %v4821_v4 }
  0x92   :  { %961 = vmatprep.mubr.bf16.mxu0 %v4415_v40 }
  0x93   :  { %1676 = vmatmul.mubr.bf16.gmra.mrb[56].mxu1 %v4771_v58  ;;  %v4438_v58 = vld [vmem:[%s5800_s0 + $0x1b4] ss:$12 sps:$4 sm:$0xff]  }
  0x94   :  { %1683 = vmatprep.mubr.bf16.mxu1 %v4782_v60  ;;  %4309 = vmatpush3.bf16.msra.mxu1 %v4821_v4  ;;  %v4440_v60 = vld [vmem:[%s5800_s0 + $0x1b0] ss:$12 sps:$4 sm:$0xff]   ;;  %v5094_v4 = vld [vmem:[%s5800_s0 + $0x1f8] ss:$12 sps:$4 sm:$0xff]  }
  0x95   :  { %4302 = vmatprep.subr.bf16.mxu1 %v4845_v8 }
  0x98   :  { %4310 = vmatpush3.bf16.msra.mxu1 %v4845_v8  ;;  %v5106_v8 = vld [vmem:[%s5800_s0 + $0x210] ss:$12 sps:$4 sm:$0xff]  }
  0x99   :  { %962 = vmatmul.mubr.bf16.gmra.mrb[44].mxu0 %v4417_v41  ;;  %4303 = vmatprep.subr.bf16.mxu1 %v4877_v15 }
  0x9a   :  { %969 = vmatprep.mubr.bf16.mxu0 %v4418_v42 }
  0x9b   :  { %1684 = vmatmul.mubr.bf16.gmra.mrb[60].mxu1 %v4804_v1  ;;  %v5075_v1 = vld [vmem:[%s5800_s0 + $0x1e4] ss:$12 sps:$4 sm:$0xff]  }
  0x9c   :  { %1691 = vmatprep.mubr.bf16.mxu1 %v4814_v3  ;;  %4311 = vmatpush3.bf16.msra.mxu1 %v4877_v15  ;;  %v5087_v3 = vld [vmem:[%s5800_s0 + $0x1fc] ss:$12 sps:$4 sm:$0xff]  }
  0x9d   :  { %4304 = vmatprep.subr.bf16.mxu1 %v4451_v21 }
  0xa0   :  { %4312 = vmatpush3.bf16.msra.mxu1 %v4451_v21 }
  0xa1   :  { %970 = vmatmul.mubr.bf16.gmra.mrb[48].mxu0 %v4420_v43 }
  0xa2   :  { %977 = vmatprep.mubr.bf16.mxu0 %v4422_v44 }
  0xa3   :  { %1692 = vmatmul.mubr.bf16.gmra.mrb[64].mxu1 %v4854_v10  ;;  %v5118_v10 = vld [vmem:[%s5800_s0 + $0x228] ss:$12 sps:$4 sm:$0xff]  }
  0xa4   :  { %1699 = vmatprep.mubr.bf16.mxu1 %v4866_v13 }
  0xa9   :  { %978 = vmatmul.mubr.bf16.gmra.mrb[52].mxu0 %v4424_v46 }
  0xaa   :  { %985 = vmatprep.mubr.bf16.mxu0 %v4425_v48 }
  0xab   :  { %1700 = vmatmul.mubr.bf16.gmra.mrb[68].mxu1 %v4888_v0 }
  0xac   :  { %1707 = vmatprep.mubr.bf16.mxu1 %v4894_v16 }
  0xb1   :  { %986 = vmatmul.mubr.bf16.gmra.mrb[56].mxu0 %v4427_v49 }
  0xb2   :  { %993 = vmatprep.mubr.bf16.mxu0 %v4428_v50 }
  0xb3   :  { %1708 = vmatmul.mubr.bf16.gmra.mrb[72].mxu1 %v4916_v22 }
  0xb4   :  { %1715 = vmatprep.mubr.bf16.mxu1 %v4921_v23 }
  0xb9   :  { %994 = vmatmul.mubr.bf16.gmra.mrb[60].mxu0 %v4430_v51 }
  0xba   :  { %1001 = vmatprep.mubr.bf16.mxu0 %v4432_v53 }
  0xbb   :  { %1716 = vmatmul.mubr.bf16.gmra.mrb[76].mxu1 %v4940_v29 }
  0xbc   :  { %1723 = vmatprep.mubr.bf16.mxu1 %v4945_v30 }
  0xc1   :  { %1002 = vmatmul.mubr.bf16.gmra.mrb[64].mxu0 %v4434_v54 }
  0xc2   :  { %1009 = vmatprep.mubr.bf16.mxu0 %v4435_v56 }
  0xc3   :  { %1724 = vmatmul.mubr.bf16.gmra.mrb[80].mxu1 %v4959_v34 }
  0xc4   :  { %1731 = vmatprep.mubr.bf16.mxu1 %v4964_v35 }
  0xc9   :  { %1010 = vmatmul.mubr.bf16.gmra.mrb[68].mxu0 %v4437_v57 }
  0xca   :  { %1017 = vmatprep.mubr.bf16.mxu0 %v4438_v58 }
  0xcb   :  { %1732 = vmatmul.mubr.bf16.gmra.mrb[84].mxu1 %v4974_v24 }
  0xcc   :  { %1739 = vmatprep.mubr.bf16.mxu1 %v4980_v36 }
  0xd1   :  { %1018 = vmatmul.mubr.bf16.gmra.mrb[72].mxu0 %v4440_v60 }
  0xd2   :  { %1025 = vmatprep.mubr.bf16.mxu0 %v4442_v62 }
  0xd3   :  { %1740 = vmatmul.mubr.bf16.gmra.mrb[88].mxu1 %v4414_v37 }
  0xd4   :  { %1747 = vmatprep.mubr.bf16.mxu1 %v4415_v40 }
  0xd9   :  { %1026 = vmatmul.mubr.bf16.gmra.mrb[76].mxu0 %v5070_v63 }
  0xda   :  { %1033 = vmatprep.mubr.bf16.mxu0 %v5075_v1 }
  0xdb   :  { %1748 = vmatmul.mubr.bf16.gmra.mrb[92].mxu1 %v4417_v41 }
  0xdc   :  { %1755 = vmatprep.mubr.bf16.mxu1 %v4418_v42 }
  0xe1   :  { %1034 = vmatmul.mubr.bf16.gmra.mrb[80].mxu0 %v5082_v2 }
  0xe2   :  { %1041 = vmatprep.mubr.bf16.mxu0 %v5087_v3 }
  0xe3   :  { %1756 = vmatmul.mubr.bf16.gmra.mrb[96].mxu1 %v4420_v43 }
  0xe4   :  { %1763 = vmatprep.mubr.bf16.mxu1 %v4422_v44 }
  0xe9   :  { %1042 = vmatmul.mubr.bf16.gmra.mrb[84].mxu0 %v5094_v4 }
  0xea   :  { %1049 = vmatprep.mubr.bf16.mxu0 %v5099_v7 }
  0xeb   :  { %1764 = vmatmul.mubr.bf16.gmra.mrb[100].mxu1 %v4424_v46 }
  0xec   :  { %1771 = vmatprep.mubr.bf16.mxu1 %v4425_v48 }
  0xf1   :  { %1050 = vmatmul.mubr.bf16.gmra.mrb[88].mxu0 %v5106_v8 }
  0xf2   :  { %1057 = vmatprep.mubr.bf16.mxu0 %v5111_v9 }
  0xf3   :  { %1772 = vmatmul.mubr.bf16.gmra.mrb[104].mxu1 %v4427_v49 }
  0xf4   :  { %1779 = vmatprep.mubr.bf16.mxu1 %v4428_v50 }
  0xf6   :  { %v4187_v13 = vpop.f32.mrb[0].mxu1 }
  0xf7   :  { %v1100_v15 = vpop.f32.mrb[1].mxu1 }
  0xf8   :  { %v5120_v0 = vpop.f32.mrb[2].mxu1 }
  0xf9   :  { %1058 = vmatmul.mubr.bf16.gmra.mrb[92].mxu0 %v5118_v10  ;;  %v1103_v16 = vpop.f32.mrb[3].mxu1 }
  0xfa   :  { %4249 = vmatprep.mubr.bf16.mxu0 %v4542_v11 }
  0xfb   :  { %1780 = vmatmul.mubr.bf16.gmra.mrb[108].mxu1 %v4430_v51 }
  0xfc   :  { %1787 = vmatprep.mubr.bf16.mxu1 %v4432_v53 }
  0xfe   :  { %v5124_v21 = vpop.f32.mrb[4].mxu1 }
  0xff   :  { %v5126_v22 = vpop.f32.mrb[5].mxu1 }
 0x100   :  { %v5128_v23 = vpop.f32.mrb[6].mxu1 }
 0x101   :  { %4250 = vmatmul.mubr.bf16.vlgmr.msra.gmra.mrb[96].mxu0 %v4572_v19  ;;  %v5131_v29 = vpop.f32.mrb[7].mxu1 }
 0x102   :  { %4253 = vmatprep.mubr.bf16.mxu0 %v4578_v20 }
 0x103   :  { %1788 = vmatmul.mubr.bf16.gmra.mrb[112].mxu1 %v4434_v54 }
 0x104   :  { %1795 = vmatprep.mubr.bf16.mxu1 %v4435_v56 }
 0x106   :  { %v5134_v30 = vpop.f32.mrb[8].mxu1 }
 0x107   :  { %v5136_v34 = vpop.f32.mrb[9].mxu1 }
 0x108   :  { %v5138_v11 = vpop.f32.mrb[10].mxu1 }
 0x109   :  { %4254 = vmatmul.mubr.bf16.gmra.mrb[100].mxu0 %v4605_v26  ;;  %v5141_v35 = vpop.f32.mrb[11].mxu1 }
 0x10a   :  { %4257 = vmatprep.mubr.bf16.mxu0 %v4612_v27 }
 0x10b   :  { %1796 = vmatmul.mubr.bf16.gmra.mrb[116].mxu1 %v4437_v57 }
 0x10c   :  { %1803 = vmatprep.mubr.bf16.mxu1 %v4438_v58 }
 0x10e   :  { %v5144_v19 = vpop.f32.mrb[12].mxu1 }
 0x10f   :  { %v5146_v24 = vpop.f32.mrb[13].mxu1 }
 0x110   :  { %v5148_v20 = vpop.f32.mrb[14].mxu1 }
 0x111   :  { %4258 = vmatmul.mubr.bf16.gmra.mrb[104].mxu0 %v4634_v32  ;;  %v5151_v36 = vpop.f32.mrb[15].mxu1 }
 0x112   :  { %4261 = vmatprep.mubr.bf16.mxu0 %v4640_v33 }
 0x113   :  { %1804 = vmatmul.mubr.bf16.gmra.mrb[120].mxu1 %v4440_v60 }
 0x114   :  { %v875_v26 = vpop.f32.mrb[0].mxu0  ;;  %1811 = vmatprep.mubr.bf16.mxu1 %v4442_v62 }
 0x115   :  { %v1101_v37 = vadd.f32 %v1100_v15, %v875_v26  ;;  %v877_v40 = vpop.f32.mrb[1].mxu0 }
 0x116   :  { %v878_v27 = vpop.f32.mrb[2].mxu0  ;;  %v5154_v41 = vpop.f32.mrb[16].mxu1 }
 0x117   :  { %2368 = vst [vmem:[%s5802_s3] sm:$0xff] %v1101_v37  ;;  %v1104_v42 = vadd.f32 %v1103_v16, %v878_v27  ;;  %v880_v43 = vpop.f32.mrb[3].mxu0  ;;  %v5159_v44 = vpop.f32.mrb[17].mxu1  ;;  %v2272_v46 = vmax.f32 %v1101_v37, 0.0 }
 0x118   :  { %v5161_v32 = vpop.f32.mrb[18].mxu1 }
 0x119   :  { %v2273_v33 = vmax.f32 %v1104_v42, 0.0  ;;  %2369 = vst [vmem:[%s5802_s3 + $0x8] sm:$0xff] %v1104_v42  ;;  %v3679_v48 = vpack.c.bf16 %v1104_v42, %v1101_v37  ;;  %4262 = vmatmul.mubr.bf16.gmra.mrb[108].mxu0 %v4663_v38  ;;  %v5167_v49 = vpop.f32.mrb[19].mxu1 }
 0x11a   :  { %4265 = vmatprep.mubr.bf16.mxu0 %v4668_v39 }
 0x11b   :  { %3680 = vst [vmem:[%s5803_s4] sm:$0xff] %v3679_v48   ;;  %v3799_v50 = vpack.c.bf16 %v2273_v33, %v2272_v46  ;;  %v3136_v51 = vadd.f32 %v2273_v33, %v2272_v46  ;;  %1812 = vmatmul.mubr.bf16.gmra.mrb[124].mxu1 %v5070_v63 }
 0x11c   :  { %v883_v53 = vpop.f32.mrb[4].mxu0  ;;  %1819 = vmatprep.mubr.bf16.mxu1 %v5075_v1 }
 0x11d   :  { %3800 = vst [vmem:[%s5804_s5] sm:$0xff] %v3799_v50   ;;  %v1109_v38 = vadd.f32 %v4187_v13, %v883_v53  ;;  %v885_v54 = vpop.f32.mrb[5].mxu0 }
 0x11e   :  { %v886_v56 = vpop.f32.mrb[6].mxu0  ;;  %v5178_v57 = vpop.f32.mrb[20].mxu1 }
 0x11f   :  { %v2274_v39 = vmax.f32 %v1109_v38, 0.0  ;;  %2370 = vst [vmem:[%s5802_s3 + $0x10] sm:$0xff] %v1109_v38  ;;  %v1112_v58 = vadd.f32 %v5120_v0, %v886_v56  ;;  %v888_v60 = vpop.f32.mrb[7].mxu0  ;;  %v5184_v62 = vpop.f32.mrb[21].mxu1 }
 0x120   :  { %v5186_v63 = vpop.f32.mrb[22].mxu1 }
 0x121   :  { %v3137_v1 = vadd.f32 %v3136_v51, %v2274_v39  ;;  %v2275_v15 = vmax.f32 %v1112_v58, 0.0  ;;  %2371 = vst [vmem:[%s5802_s3 + $0x18] sm:$0xff] %v1112_v58  ;;  %v3684_v13 = vpack.c.bf16 %v1112_v58, %v1109_v38  ;;  %4266 = vmatmul.mubr.bf16.gmra.mrb[112].mxu0 %v4696_v45  ;;  %v5192_v16 = vpop.f32.mrb[23].mxu1 }
 0x122   :  { %4269 = vmatprep.mubr.bf16.mxu0 %v4707_v47 }
 0x123   :  { %4036 = vst [vmem:[%s5803_s4 + $0x8] sm:$0xff] %v3684_v13   ;;  %v3804_v0 = vpack.c.bf16 %v2275_v15, %v2274_v39  ;;  %v3138_v26 = vadd.f32 %v3137_v1, %v2275_v15  ;;  %1820 = vmatmul.mubr.bf16.gmra.mrb[128].mxu1 %v5082_v2 }
 0x124   :  { %v891_v37 = vpop.f32.mrb[8].mxu0  ;;  %1827 = vmatprep.mubr.bf16.mxu1 %v5087_v3 }
 0x125   :  { %4059 = vst [vmem:[%s5804_s5 + $0x8] sm:$0xff] %v3804_v0   ;;  %v1117_v45 = vadd.f32 %v5126_v22, %v891_v37  ;;  %v893_v40 = vpop.f32.mrb[9].mxu0 }
 0x126   :  { %v894_v27 = vpop.f32.mrb[10].mxu0  ;;  %v5204_v47 = vpop.f32.mrb[24].mxu1 }
 0x127   :  { %v2276_v42 = vmax.f32 %v1117_v45, 0.0  ;;  %2372 = vst [vmem:[%s5802_s3 + $0x20] sm:$0xff] %v1117_v45  ;;  %v1120_v2 = vadd.f32 %v5131_v29, %v894_v27  ;;  %v896_v43 = vpop.f32.mrb[11].mxu0  ;;  %v5210_v46 = vpop.f32.mrb[25].mxu1 }
 0x128   :  { %v5212_v3 = vpop.f32.mrb[26].mxu1 }
 0x129   :  { %v3139_v33 = vadd.f32 %v3138_v26, %v2276_v42  ;;  %v2277_v48 = vmax.f32 %v1120_v2, 0.0  ;;  %2373 = vst [vmem:[%s5802_s3 + $0x28] sm:$0xff] %v1120_v2  ;;  %v3689_v22 = vpack.c.bf16 %v1120_v2, %v1117_v45  ;;  %4270 = vmatmul.mubr.bf16.gmra.mrb[116].mxu0 %v4736_v52  ;;  %v5218_v50 = vpop.f32.mrb[27].mxu1 }
 0x12a   :  { %4273 = vmatprep.mubr.bf16.mxu0 %v4753_v55 }
 0x12b   :  { %4037 = vst [vmem:[%s5803_s4 + $0x10] sm:$0xff] %v3689_v22   ;;  %v3809_v29 = vpack.c.bf16 %v2277_v48, %v2276_v42  ;;  %v3140_v51 = vadd.f32 %v3139_v33, %v2277_v48  ;;  %1828 = vmatmul.mubr.bf16.gmra.mrb[132].mxu1 %v5094_v4 }
 0x12c   :  { %v899_v53 = vpop.f32.mrb[12].mxu0  ;;  %1835 = vmatprep.mubr.bf16.mxu1 %v5099_v7 }
 0x12d   :  { %4060 = vst [vmem:[%s5804_s5 + $0x10] sm:$0xff] %v3809_v29   ;;  %v1125_v52 = vadd.f32 %v5124_v21, %v899_v53  ;;  %v901_v38 = vpop.f32.mrb[13].mxu0 }
 0x12e   :  { %v902_v54 = vpop.f32.mrb[14].mxu0  ;;  %v5230_v55 = vpop.f32.mrb[28].mxu1 }
 0x12f   :  { %v2278_v56 = vmax.f32 %v1125_v52, 0.0  ;;  %2374 = vst [vmem:[%s5802_s3 + $0x30] sm:$0xff] %v1125_v52  ;;  %v1128_v4 = vadd.f32 %v5128_v23, %v902_v54  ;;  %v904_v39 = vpop.f32.mrb[15].mxu0  ;;  %v5236_v58 = vpop.f32.mrb[29].mxu1 }
 0x130   :  { %v5238_v7 = vpop.f32.mrb[30].mxu1 }
 0x131   :  { %v3141_v60 = vadd.f32 %v3140_v51, %v2278_v56  ;;  %v2279_v1 = vmax.f32 %v1128_v4, 0.0  ;;  %2375 = vst [vmem:[%s5802_s3 + $0x38] sm:$0xff] %v1128_v4  ;;  %v3694_v21 = vpack.c.bf16 %v1128_v4, %v1125_v52  ;;  %4274 = vmatmul.mubr.bf16.gmra.mrb[120].mxu0 %v4777_v59  ;;  %v5244_v15 = vpop.f32.mrb[31].mxu1 }
 0x132   :  { %4277 = vmatprep.mubr.bf16.mxu0 %v4787_v61 }
 0x133   :  { %4038 = vst [vmem:[%s5803_s4 + $0x18] sm:$0xff] %v3694_v21   ;;  %v3814_v23 = vpack.c.bf16 %v2279_v1, %v2278_v56  ;;  %v3142_v13 = vadd.f32 %v3141_v60, %v2279_v1  ;;  %1836 = vmatmul.mubr.bf16.gmra.mrb[136].mxu1 %v5106_v8 }
 0x134   :  { %v907_v0 = vpop.f32.mrb[16].mxu0  ;;  %1843 = vmatprep.mubr.bf16.mxu1 %v5111_v9 }
 0x135   :  { %4061 = vst [vmem:[%s5804_s5 + $0x18] sm:$0xff] %v3814_v23   ;;  %v1133_v59 = vadd.f32 %v5136_v34, %v907_v0  ;;  %v909_v26 = vpop.f32.mrb[17].mxu0 }
 0x136   :  { %v910_v37 = vpop.f32.mrb[18].mxu0  ;;  %v5256_v61 = vpop.f32.mrb[32].mxu1 }
 0x137   :  { %v2280_v45 = vmax.f32 %v1133_v59, 0.0  ;;  %2376 = vst [vmem:[%s5802_s3 + $0x40] sm:$0xff] %v1133_v59  ;;  %v1136_v8 = vadd.f32 %v5141_v35, %v910_v37  ;;  %v912_v40 = vpop.f32.mrb[19].mxu0  ;;  %v5262_v27 = vpop.f32.mrb[33].mxu1 }
 0x138   :  { %v5264_v9 = vpop.f32.mrb[34].mxu1 }
 0x139   :  { %v3143_v42 = vadd.f32 %v3142_v13, %v2280_v45  ;;  %v2281_v2 = vmax.f32 %v1136_v8, 0.0  ;;  %2377 = vst [vmem:[%s5802_s3 + $0x48] sm:$0xff] %v1136_v8  ;;  %v3699_v34 = vpack.c.bf16 %v1136_v8, %v1133_v59  ;;  %4278 = vmatmul.mubr.bf16.gmra.mrb[124].mxu0 %v4826_v5  ;;  %v5270_v43 = vpop.f32.mrb[35].mxu1 }
 0x13a   :  { %4281 = vmatprep.mubr.bf16.mxu0 %v4831_v6 }
 0x13b   :  { %4039 = vst [vmem:[%s5803_s4 + $0x20] sm:$0xff] %v3699_v34   ;;  %v3819_v35 = vpack.c.bf16 %v2281_v2, %v2280_v45  ;;  %v3144_v33 = vadd.f32 %v3143_v42, %v2281_v2  ;;  %1844 = vmatmul.mubr.bf16.gmra.mrb[140].mxu1 %v5118_v10 }
 0x13c   :  { %v915_v48 = vpop.f32.mrb[20].mxu0  ;;  %4289 = vmatprep.mubr.bf16.mxu1 %v4904_v18 }
 0x13d   :  { %4062 = vst [vmem:[%s5804_s5 + $0x20] sm:$0xff] %v3819_v35   ;;  %v1141_v5 = vadd.f32 %v5134_v30, %v915_v48  ;;  %v917_v22 = vpop.f32.mrb[21].mxu0 }
 0x13e   :  { %v918_v29 = vpop.f32.mrb[22].mxu0  ;;  %v5282_v6 = vpop.f32.mrb[36].mxu1 }
 0x13f   :  { %v2282_v51 = vmax.f32 %v1141_v5, 0.0  ;;  %2378 = vst [vmem:[%s5802_s3 + $0x50] sm:$0xff] %v1141_v5  ;;  %v1144_v10 = vadd.f32 %v5138_v11, %v918_v29  ;;  %v920_v53 = vpop.f32.mrb[23].mxu0  ;;  %v5288_v52 = vpop.f32.mrb[37].mxu1 }
 0x140   :  { %v5290_v18 = vpop.f32.mrb[38].mxu1 }
 0x141   :  { %v3145_v38 = vadd.f32 %v3144_v33, %v2282_v51  ;;  %v2283_v54 = vmax.f32 %v1144_v10, 0.0  ;;  %2379 = vst [vmem:[%s5802_s3 + $0x58] sm:$0xff] %v1144_v10  ;;  %v3704_v30 = vpack.c.bf16 %v1144_v10, %v1141_v5  ;;  %4282 = vmatmul.mubr.bf16.gmra.mrb[128].mxu0 %v4859_v12  ;;  %v5296_v56 = vpop.f32.mrb[39].mxu1 }
 0x142   :  { %4285 = vmatprep.mubr.bf16.mxu0 %v4872_v14 }
 0x143   :  { %4040 = vst [vmem:[%s5803_s4 + $0x28] sm:$0xff] %v3704_v30   ;;  %v3824_v11 = vpack.c.bf16 %v2283_v54, %v2282_v51  ;;  %v3146_v4 = vadd.f32 %v3145_v38, %v2283_v54  ;;  %4290 = vmatmul.mubr.bf16.vlgmr.msra.gmra.mrb[144].mxu1 %v4926_v25 }
 0x144   :  { %v923_v39 = vpop.f32.mrb[24].mxu0  ;;  %4293 = vmatprep.mubr.bf16.mxu1 %v4931_v28 }
 0x145   :  { %4063 = vst [vmem:[%s5804_s5 + $0x28] sm:$0xff] %v3824_v11   ;;  %v1149_v12 = vadd.f32 %v5146_v24, %v923_v39  ;;  %v925_v60 = vpop.f32.mrb[25].mxu0 }
 0x146   :  { %v926_v1 = vpop.f32.mrb[26].mxu0  ;;  %v5308_v14 = vpop.f32.mrb[40].mxu1 }
 0x147   :  { %v2284_v21 = vmax.f32 %v1149_v12, 0.0  ;;  %2380 = vst [vmem:[%s5802_s3 + $0x60] sm:$0xff] %v1149_v12  ;;  %v1152_v25 = vadd.f32 %v5151_v36, %v926_v1  ;;  %v928_v23 = vpop.f32.mrb[27].mxu0  ;;  %v5314_v13 = vpop.f32.mrb[41].mxu1 }
 0x148   :  { %v5316_v28 = vpop.f32.mrb[42].mxu1 }
 0x149   :  { %v3147_v0 = vadd.f32 %v3146_v4, %v2284_v21  ;;  %v2285_v59 = vmax.f32 %v1152_v25, 0.0  ;;  %2381 = vst [vmem:[%s5802_s3 + $0x68] sm:$0xff] %v1152_v25  ;;  %v3709_v24 = vpack.c.bf16 %v1152_v25, %v1149_v12  ;;  %4286 = vmatmul.mubr.bf16.gmra.mrb[132].mxu0 %v4899_v17  ;;  %v5322_v26 = vpop.f32.mrb[43].mxu1 }
 0x14b   :  { %4041 = vst [vmem:[%s5803_s4 + $0x30] sm:$0xff] %v3709_v24   ;;  %v3829_v36 = vpack.c.bf16 %v2285_v59, %v2284_v21  ;;  %v3148_v37 = vadd.f32 %v3147_v0, %v2285_v59  ;;  %4294 = vmatmul.mubr.bf16.gmra.mrb[148].mxu1 %v4950_v31 }
 0x14c   :  { %v931_v45 = vpop.f32.mrb[28].mxu0 }
 0x14d   :  { %4064 = vst [vmem:[%s5804_s5 + $0x30] sm:$0xff] %v3829_v36   ;;  %v1157_v8 = vadd.f32 %v5144_v19, %v931_v45  ;;  %v933_v40 = vpop.f32.mrb[29].mxu0 }
 0x14e   :  { %v934_v42 = vpop.f32.mrb[30].mxu0  ;;  %v5332_v17 = vpop.f32.mrb[44].mxu1 }
 0x14f   :  { %v2286_v2 = vmax.f32 %v1157_v8, 0.0  ;;  %2382 = vst [vmem:[%s5802_s3 + $0x70] sm:$0xff] %v1157_v8  ;;  %v1160_v34 = vadd.f32 %v5148_v20, %v934_v42  ;;  %v936_v35 = vpop.f32.mrb[31].mxu0  ;;  %v5338_v31 = vpop.f32.mrb[45].mxu1 }
 0x150   :  { %v5340_v33 = vpop.f32.mrb[46].mxu1 }
 0x151   :  { %v3149_v48 = vadd.f32 %v3148_v37, %v2286_v2  ;;  %v2287_v5 = vmax.f32 %v1160_v34, 0.0  ;;  %2383 = vst [vmem:[%s5802_s3 + $0x78] sm:$0xff] %v1160_v34  ;;  %v3714_v19 = vpack.c.bf16 %v1160_v34, %v1157_v8  ;;  %v5345_v22 = vpop.f32.mrb[47].mxu1 }
 0x153   :  { %4042 = vst [vmem:[%s5803_s4 + $0x38] sm:$0xff] %v3714_v19   ;;  %v3834_v29 = vpack.c.bf16 %v2287_v5, %v2286_v2  ;;  %v3150_v20 = vadd.f32 %v3149_v48, %v2287_v5 }
 0x154   :  { %v939_v51 = vpop.f32.mrb[32].mxu0 }
 0x155   :  { %4065 = vst [vmem:[%s5804_s5 + $0x38] sm:$0xff] %v3834_v29   ;;  %v1165_v10 = vadd.f32 %v5159_v44, %v939_v51  ;;  %v941_v53 = vpop.f32.mrb[33].mxu0 }
 0x156   :  { %v942_v38 = vpop.f32.mrb[34].mxu0  ;;  %v5354_v54 = vpop.f32.mrb[48].mxu1 }
 0x157   :  { %v2288_v30 = vmax.f32 %v1165_v10, 0.0  ;;  %2384 = vst [vmem:[%s5802_s3 + $0x80] sm:$0xff] %v1165_v10  ;;  %v1168_v11 = vadd.f32 %v5167_v49, %v942_v38  ;;  %v944_v4 = vpop.f32.mrb[35].mxu0  ;;  %v1663_v39 = vpop.f32.mrb[49].mxu1 }
 0x158   :  { %v5360_v12 = vpop.f32.mrb[50].mxu1 }
 0x159   :  { %v3151_v60 = vadd.f32 %v3150_v20, %v2288_v30  ;;  %v2289_v1 = vmax.f32 %v1168_v11, 0.0  ;;  %2385 = vst [vmem:[%s5802_s3 + $0x88] sm:$0xff] %v1168_v11  ;;  %v3719_v44 = vpack.c.bf16 %v1168_v11, %v1165_v10  ;;  %v1666_v21 = vpop.f32.mrb[51].mxu1 }
 0x15b   :  { %4043 = vst [vmem:[%s5803_s4 + $0x40] sm:$0xff] %v3719_v44   ;;  %v3839_v25 = vpack.c.bf16 %v2289_v1, %v2288_v30  ;;  %v3152_v23 = vadd.f32 %v3151_v60, %v2289_v1 }
 0x15c   :  { %v947_v0 = vpop.f32.mrb[36].mxu0 }
 0x15d   :  { %4066 = vst [vmem:[%s5804_s5 + $0x40] sm:$0xff] %v3839_v25   ;;  %v1173_v49 = vadd.f32 %v5154_v41, %v947_v0  ;;  %v949_v59 = vpop.f32.mrb[37].mxu0 }
 0x15e   :  { %v950_v24 = vpop.f32.mrb[38].mxu0  ;;  %v5372_v36 = vpop.f32.mrb[52].mxu1 }
 0x15f   :  { %v2290_v37 = vmax.f32 %v1173_v49, 0.0  ;;  %2386 = vst [vmem:[%s5802_s3 + $0x90] sm:$0xff] %v1173_v49  ;;  %v1176_v45 = vadd.f32 %v5161_v32, %v950_v24  ;;  %v952_v8 = vpop.f32.mrb[39].mxu0  ;;  %v1671_v40 = vpop.f32.mrb[53].mxu1 }
 0x160   :  { %v5378_v42 = vpop.f32.mrb[54].mxu1 }
 0x161   :  { %v3153_v2 = vadd.f32 %v3152_v23, %v2290_v37  ;;  %v2291_v34 = vmax.f32 %v1176_v45, 0.0  ;;  %2387 = vst [vmem:[%s5802_s3 + $0x98] sm:$0xff] %v1176_v45  ;;  %v3724_v41 = vpack.c.bf16 %v1176_v45, %v1173_v49  ;;  %v1674_v35 = vpop.f32.mrb[55].mxu1 }
 0x163   :  { %4044 = vst [vmem:[%s5803_s4 + $0x48] sm:$0xff] %v3724_v41   ;;  %v3844_v48 = vpack.c.bf16 %v2291_v34, %v2290_v37  ;;  %v3154_v5 = vadd.f32 %v3153_v2, %v2291_v34 }
 0x164   :  { %v955_v19 = vpop.f32.mrb[40].mxu0 }
 0x165   :  { %4067 = vst [vmem:[%s5804_s5 + $0x48] sm:$0xff] %v3844_v48   ;;  %v1181_v32 = vadd.f32 %v5184_v62, %v955_v19  ;;  %v957_v29 = vpop.f32.mrb[41].mxu0 }
 0x166   :  { %v958_v20 = vpop.f32.mrb[42].mxu0  ;;  %v5390_v51 = vpop.f32.mrb[56].mxu1 }
 0x167   :  { %v2292_v10 = vmax.f32 %v1181_v32, 0.0  ;;  %2388 = vst [vmem:[%s5802_s3 + $0xa0] sm:$0xff] %v1181_v32  ;;  %v1184_v53 = vadd.f32 %v5192_v16, %v958_v20  ;;  %v960_v38 = vpop.f32.mrb[43].mxu0  ;;  %v1679_v30 = vpop.f32.mrb[57].mxu1 }
 0x168   :  { %v5396_v11 = vpop.f32.mrb[58].mxu1 }
 0x169   :  { %v3155_v4 = vadd.f32 %v3154_v5, %v2292_v10  ;;  %v2293_v39 = vmax.f32 %v1184_v53, 0.0  ;;  %2389 = vst [vmem:[%s5802_s3 + $0xa8] sm:$0xff] %v1184_v53  ;;  %v3729_v62 = vpack.c.bf16 %v1184_v53, %v1181_v32  ;;  %v1682_v60 = vpop.f32.mrb[59].mxu1 }
 0x16b   :  { %4045 = vst [vmem:[%s5803_s4 + $0x50] sm:$0xff] %v3729_v62   ;;  %v3849_v1 = vpack.c.bf16 %v2293_v39, %v2292_v10  ;;  %v3156_v44 = vadd.f32 %v3155_v4, %v2293_v39 }
 0x16c   :  { %v963_v21 = vpop.f32.mrb[44].mxu0 }
 0x16d   :  { %4068 = vst [vmem:[%s5804_s5 + $0x50] sm:$0xff] %v3849_v1   ;;  %v1189_v16 = vadd.f32 %v5178_v57, %v963_v21  ;;  %v965_v25 = vpop.f32.mrb[45].mxu0 }
 0x16e   :  { %v966_v23 = vpop.f32.mrb[46].mxu0  ;;  %v5408_v0 = vpop.f32.mrb[60].mxu1 }
 0x16f   :  { %v2294_v49 = vmax.f32 %v1189_v16, 0.0  ;;  %2390 = vst [vmem:[%s5802_s3 + $0xb0] sm:$0xff] %v1189_v16  ;;  %v1192_v59 = vadd.f32 %v5186_v63, %v966_v23  ;;  %v968_v24 = vpop.f32.mrb[47].mxu0  ;;  %v1687_v37 = vpop.f32.mrb[61].mxu1 }
 0x170   :  { %v5414_v45 = vpop.f32.mrb[62].mxu1 }
 0x171   :  { %v3157_v8 = vadd.f32 %v3156_v44, %v2294_v49  ;;  %v2295_v40 = vmax.f32 %v1192_v59, 0.0  ;;  %2391 = vst [vmem:[%s5802_s3 + $0xb8] sm:$0xff] %v1192_v59  ;;  %v3734_v57 = vpack.c.bf16 %v1192_v59, %v1189_v16  ;;  %v1690_v2 = vpop.f32.mrb[63].mxu1 }
 0x173   :  { %4046 = vst [vmem:[%s5803_s4 + $0x58] sm:$0xff] %v3734_v57   ;;  %v3854_v34 = vpack.c.bf16 %v2295_v40, %v2294_v49  ;;  %v3158_v41 = vadd.f32 %v3157_v8, %v2295_v40 }
 0x174   :  { %v971_v35 = vpop.f32.mrb[48].mxu0 }
 0x175   :  { %4069 = vst [vmem:[%s5804_s5 + $0x58] sm:$0xff] %v3854_v34   ;;  %v1197_v63 = vadd.f32 %v5210_v46, %v971_v35  ;;  %v973_v48 = vpop.f32.mrb[49].mxu0 }
 0x176   :  { %v974_v5 = vpop.f32.mrb[50].mxu0  ;;  %v5426_v19 = vpop.f32.mrb[64].mxu1 }
 0x177   :  { %v2296_v32 = vmax.f32 %v1197_v63, 0.0  ;;  %2392 = vst [vmem:[%s5802_s3 + $0xc0] sm:$0xff] %v1197_v63  ;;  %v1200_v29 = vadd.f32 %v5218_v50, %v974_v5  ;;  %v976_v20 = vpop.f32.mrb[51].mxu0  ;;  %v1695_v10 = vpop.f32.mrb[65].mxu1 }
 0x178   :  { %v5432_v53 = vpop.f32.mrb[66].mxu1 }
 0x179   :  { %v3159_v38 = vadd.f32 %v3158_v41, %v2296_v32  ;;  %v2297_v30 = vmax.f32 %v1200_v29, 0.0  ;;  %2393 = vst [vmem:[%s5802_s3 + $0xc8] sm:$0xff] %v1200_v29  ;;  %v3739_v46 = vpack.c.bf16 %v1200_v29, %v1197_v63  ;;  %v1698_v4 = vpop.f32.mrb[67].mxu1 }
 0x17b   :  { %4047 = vst [vmem:[%s5803_s4 + $0x60] sm:$0xff] %v3739_v46   ;;  %v3859_v39 = vpack.c.bf16 %v2297_v30, %v2296_v32  ;;  %v3160_v62 = vadd.f32 %v3159_v38, %v2297_v30 }
 0x17c   :  { %v979_v60 = vpop.f32.mrb[52].mxu0 }
 0x17d   :  { %4070 = vst [vmem:[%s5804_s5 + $0x60] sm:$0xff] %v3859_v39   ;;  %v1205_v50 = vadd.f32 %v5204_v47, %v979_v60  ;;  %v981_v1 = vpop.f32.mrb[53].mxu0 }
 0x17e   :  { %v982_v44 = vpop.f32.mrb[54].mxu0  ;;  %v5444_v21 = vpop.f32.mrb[68].mxu1 }
 0x17f   :  { %v2298_v16 = vmax.f32 %v1205_v50, 0.0  ;;  %2394 = vst [vmem:[%s5802_s3 + $0xd0] sm:$0xff] %v1205_v50  ;;  %v1208_v25 = vadd.f32 %v5212_v3, %v982_v44  ;;  %v984_v23 = vpop.f32.mrb[55].mxu0  ;;  %v1703_v49 = vpop.f32.mrb[69].mxu1 }
 0x180   :  { %v5450_v59 = vpop.f32.mrb[70].mxu1 }
 0x181   :  { %v3161_v24 = vadd.f32 %v3160_v62, %v2298_v16  ;;  %v2299_v37 = vmax.f32 %v1208_v25, 0.0  ;;  %2395 = vst [vmem:[%s5802_s3 + $0xd8] sm:$0xff] %v1208_v25  ;;  %v3744_v47 = vpack.c.bf16 %v1208_v25, %v1205_v50  ;;  %v1706_v8 = vpop.f32.mrb[71].mxu1 }
 0x183   :  { %4048 = vst [vmem:[%s5803_s4 + $0x68] sm:$0xff] %v3744_v47   ;;  %v3864_v40 = vpack.c.bf16 %v2299_v37, %v2298_v16  ;;  %v3162_v57 = vadd.f32 %v3161_v24, %v2299_v37 }
 0x184   :  { %v987_v2 = vpop.f32.mrb[56].mxu0 }
 0x185   :  { %4071 = vst [vmem:[%s5804_s5 + $0x68] sm:$0xff] %v3864_v40   ;;  %v1213_v3 = vadd.f32 %v5236_v58, %v987_v2  ;;  %v989_v34 = vpop.f32.mrb[57].mxu0 }
 0x186   :  { %v990_v41 = vpop.f32.mrb[58].mxu0  ;;  %v5462_v35 = vpop.f32.mrb[72].mxu1 }
 0x187   :  { %v2300_v63 = vmax.f32 %v1213_v3, 0.0  ;;  %2396 = vst [vmem:[%s5802_s3 + $0xe0] sm:$0xff] %v1213_v3  ;;  %v1216_v48 = vadd.f32 %v5244_v15, %v990_v41  ;;  %v992_v5 = vpop.f32.mrb[59].mxu0  ;;  %v1711_v32 = vpop.f32.mrb[73].mxu1 }
 0x188   :  { %v5468_v29 = vpop.f32.mrb[74].mxu1 }
 0x189   :  { %v3163_v20 = vadd.f32 %v3162_v57, %v2300_v63  ;;  %v2301_v10 = vmax.f32 %v1216_v48, 0.0  ;;  %2397 = vst [vmem:[%s5802_s3 + $0xe8] sm:$0xff] %v1216_v48  ;;  %v3749_v58 = vpack.c.bf16 %v1216_v48, %v1213_v3  ;;  %v1714_v38 = vpop.f32.mrb[75].mxu1 }
 0x18b   :  { %4049 = vst [vmem:[%s5803_s4 + $0x70] sm:$0xff] %v3749_v58   ;;  %v3869_v30 = vpack.c.bf16 %v2301_v10, %v2300_v63  ;;  %v3164_v46 = vadd.f32 %v3163_v20, %v2301_v10 }
 0x18c   :  { %v995_v4 = vpop.f32.mrb[60].mxu0 }
 0x18d   :  { %4072 = vst [vmem:[%s5804_s5 + $0x70] sm:$0xff] %v3869_v30   ;;  %v1221_v15 = vadd.f32 %v5230_v55, %v995_v4  ;;  %v997_v39 = vpop.f32.mrb[61].mxu0 }
 0x18e   :  { %v998_v62 = vpop.f32.mrb[62].mxu0  ;;  %v5480_v60 = vpop.f32.mrb[76].mxu1 }
 0x18f   :  { %v2302_v50 = vmax.f32 %v1221_v15, 0.0  ;;  %2398 = vst [vmem:[%s5802_s3 + $0xf0] sm:$0xff] %v1221_v15  ;;  %v1224_v1 = vadd.f32 %v5238_v7, %v998_v62  ;;  %v1000_v44 = vpop.f32.mrb[63].mxu0  ;;  %v1719_v16 = vpop.f32.mrb[77].mxu1 }
 0x190   :  { %v5486_v25 = vpop.f32.mrb[78].mxu1 }
 0x191   :  { %v3165_v23 = vadd.f32 %v3164_v46, %v2302_v50  ;;  %v2303_v49 = vmax.f32 %v1224_v1, 0.0  ;;  %2399 = vst [vmem:[%s5802_s3 + $0xf8] sm:$0xff] %v1224_v1  ;;  %v3754_v55 = vpack.c.bf16 %v1224_v1, %v1221_v15  ;;  %v1722_v24 = vpop.f32.mrb[79].mxu1 }
 0x193   :  { %4050 = vst [vmem:[%s5803_s4 + $0x78] sm:$0xff] %v3754_v55   ;;  %v3874_v37 = vpack.c.bf16 %v2303_v49, %v2302_v50  ;;  %v3166_v47 = vadd.f32 %v3165_v23, %v2303_v49 }
 0x194   :  { %v1003_v8 = vpop.f32.mrb[64].mxu0 }
 0x195   :  { %4073 = vst [vmem:[%s5804_s5 + $0x78] sm:$0xff] %v3874_v37   ;;  %v1229_v7 = vadd.f32 %v5262_v27, %v1003_v8  ;;  %v1005_v40 = vpop.f32.mrb[65].mxu0 }
 0x196   :  { %v1006_v57 = vpop.f32.mrb[66].mxu0  ;;  %v5498_v2 = vpop.f32.mrb[80].mxu1 }
 0x197   :  { %v2304_v3 = vmax.f32 %v1229_v7, 0.0  ;;  %2400 = vst [vmem:[%s5802_s3 + $0x100] sm:$0xff] %v1229_v7  ;;  %v1232_v34 = vadd.f32 %v5270_v43, %v1006_v57  ;;  %v1008_v41 = vpop.f32.mrb[67].mxu0  ;;  %v1727_v63 = vpop.f32.mrb[81].mxu1 }
 0x198   :  { %v5504_v48 = vpop.f32.mrb[82].mxu1 }
 0x199   :  { %v3167_v5 = vadd.f32 %v3166_v47, %v2304_v3  ;;  %v2305_v32 = vmax.f32 %v1232_v34, 0.0  ;;  %2401 = vst [vmem:[%s5802_s3 + $0x108] sm:$0xff] %v1232_v34  ;;  %v3759_v27 = vpack.c.bf16 %v1232_v34, %v1229_v7  ;;  %v1730_v20 = vpop.f32.mrb[83].mxu1 }
 0x19b   :  { %4051 = vst [vmem:[%s5803_s4 + $0x80] sm:$0xff] %v3759_v27   ;;  %v3879_v10 = vpack.c.bf16 %v2305_v32, %v2304_v3  ;;  %v3168_v58 = vadd.f32 %v3167_v5, %v2305_v32 }
 0x19c   :  { %v1011_v38 = vpop.f32.mrb[68].mxu0 }
 0x19d   :  { %4074 = vst [vmem:[%s5804_s5 + $0x80] sm:$0xff] %v3879_v10   ;;  %v1237_v43 = vadd.f32 %v5256_v61, %v1011_v38  ;;  %v1013_v30 = vpop.f32.mrb[69].mxu0 }
 0x19e   :  { %v1014_v46 = vpop.f32.mrb[70].mxu0  ;;  %v5516_v4 = vpop.f32.mrb[84].mxu1 }
 0x19f   :  { %v2306_v15 = vmax.f32 %v1237_v43, 0.0  ;;  %2402 = vst [vmem:[%s5802_s3 + $0x110] sm:$0xff] %v1237_v43  ;;  %v1240_v39 = vadd.f32 %v5264_v9, %v1014_v46  ;;  %v1016_v62 = vpop.f32.mrb[71].mxu0  ;;  %v1735_v50 = vpop.f32.mrb[85].mxu1 }
 0x1a0   :  { %v5522_v1 = vpop.f32.mrb[86].mxu1 }
 0x1a1   :  { %v3169_v44 = vadd.f32 %v3168_v58, %v2306_v15  ;;  %v2307_v16 = vmax.f32 %v1240_v39, 0.0  ;;  %2403 = vst [vmem:[%s5802_s3 + $0x118] sm:$0xff] %v1240_v39  ;;  %v3764_v61 = vpack.c.bf16 %v1240_v39, %v1237_v43  ;;  %v1738_v23 = vpop.f32.mrb[87].mxu1 }
 0x1a3   :  { %4052 = vst [vmem:[%s5803_s4 + $0x88] sm:$0xff] %v3764_v61   ;;  %v3884_v49 = vpack.c.bf16 %v2307_v16, %v2306_v15  ;;  %v3170_v55 = vadd.f32 %v3169_v44, %v2307_v16 }
 0x1a4   :  { %v1019_v24 = vpop.f32.mrb[72].mxu0 }
 0x1a5   :  { %4075 = vst [vmem:[%s5804_s5 + $0x88] sm:$0xff] %v3884_v49   ;;  %v1245_v9 = vadd.f32 %v5288_v52, %v1019_v24  ;;  %v1021_v37 = vpop.f32.mrb[73].mxu0 }
 0x1a6   :  { %v1022_v47 = vpop.f32.mrb[74].mxu0  ;;  %v5534_v8 = vpop.f32.mrb[88].mxu1 }
 0x1a7   :  { %v2308_v7 = vmax.f32 %v1245_v9, 0.0  ;;  %2404 = vst [vmem:[%s5802_s3 + $0x120] sm:$0xff] %v1245_v9  ;;  %v1248_v40 = vadd.f32 %v5296_v56, %v1022_v47  ;;  %v1024_v57 = vpop.f32.mrb[75].mxu0  ;;  %v1743_v3 = vpop.f32.mrb[89].mxu1 }
 0x1a8   :  { %v5540_v34 = vpop.f32.mrb[90].mxu1 }
 0x1a9   :  { %v3171_v41 = vadd.f32 %v3170_v55, %v2308_v7  ;;  %v2309_v63 = vmax.f32 %v1248_v40, 0.0  ;;  %2405 = vst [vmem:[%s5802_s3 + $0x128] sm:$0xff] %v1248_v40  ;;  %v3769_v52 = vpack.c.bf16 %v1248_v40, %v1245_v9  ;;  %v1746_v5 = vpop.f32.mrb[91].mxu1 }
 0x1ab   :  { %4053 = vst [vmem:[%s5803_s4 + $0x90] sm:$0xff] %v3769_v52   ;;  %v3889_v32 = vpack.c.bf16 %v2309_v63, %v2308_v7  ;;  %v3172_v27 = vadd.f32 %v3171_v41, %v2309_v63 }
 0x1ac   :  { %v1027_v20 = vpop.f32.mrb[76].mxu0 }
 0x1ad   :  { %4076 = vst [vmem:[%s5804_s5 + $0x90] sm:$0xff] %v3889_v32   ;;  %v1253_v56 = vadd.f32 %v5282_v6, %v1027_v20  ;;  %v1029_v10 = vpop.f32.mrb[77].mxu0 }
 0x1ae   :  { %v1030_v58 = vpop.f32.mrb[78].mxu0  ;;  %v5552_v38 = vpop.f32.mrb[92].mxu1 }
 0x1af   :  { %v2310_v43 = vmax.f32 %v1253_v56, 0.0  ;;  %2406 = vst [vmem:[%s5802_s3 + $0x130] sm:$0xff] %v1253_v56  ;;  %v1256_v30 = vadd.f32 %v5290_v18, %v1030_v58  ;;  %v1032_v46 = vpop.f32.mrb[79].mxu0  ;;  %v1751_v15 = vpop.f32.mrb[93].mxu1 }
 0x1b0   :  { %v5558_v39 = vpop.f32.mrb[94].mxu1 }
 0x1b1   :  { %v3173_v62 = vadd.f32 %v3172_v27, %v2310_v43  ;;  %v2311_v50 = vmax.f32 %v1256_v30, 0.0  ;;  %2407 = vst [vmem:[%s5802_s3 + $0x138] sm:$0xff] %v1256_v30  ;;  %v3774_v6 = vpack.c.bf16 %v1256_v30, %v1253_v56  ;;  %v1754_v44 = vpop.f32.mrb[95].mxu1 }
 0x1b3   :  { %4054 = vst [vmem:[%s5803_s4 + $0x98] sm:$0xff] %v3774_v6   ;;  %v3894_v16 = vpack.c.bf16 %v2311_v50, %v2310_v43  ;;  %v3174_v61 = vadd.f32 %v3173_v62, %v2311_v50 }
 0x1b4   :  { %v1035_v23 = vpop.f32.mrb[80].mxu0 }
 0x1b5   :  { %4077 = vst [vmem:[%s5804_s5 + $0x98] sm:$0xff] %v3894_v16   ;;  %v1261_v18 = vadd.f32 %v5314_v13, %v1035_v23  ;;  %v1037_v49 = vpop.f32.mrb[81].mxu0 }
 0x1b6   :  { %v1038_v55 = vpop.f32.mrb[82].mxu0  ;;  %v5570_v24 = vpop.f32.mrb[96].mxu1 }
 0x1b7   :  { %v2312_v9 = vmax.f32 %v1261_v18, 0.0  ;;  %2408 = vst [vmem:[%s5802_s3 + $0x140] sm:$0xff] %v1261_v18  ;;  %v1264_v37 = vadd.f32 %v5322_v26, %v1038_v55  ;;  %v1040_v47 = vpop.f32.mrb[83].mxu0  ;;  %v1759_v7 = vpop.f32.mrb[97].mxu1 }
 0x1b8   :  { %v5576_v40 = vpop.f32.mrb[98].mxu1 }
 0x1b9   :  { %v3175_v57 = vadd.f32 %v3174_v61, %v2312_v9  ;;  %v2313_v3 = vmax.f32 %v1264_v37, 0.0  ;;  %2409 = vst [vmem:[%s5802_s3 + $0x148] sm:$0xff] %v1264_v37  ;;  %v3779_v13 = vpack.c.bf16 %v1264_v37, %v1261_v18  ;;  %v1762_v41 = vpop.f32.mrb[99].mxu1 }
 0x1bb   :  { %4055 = vst [vmem:[%s5803_s4 + $0xa0] sm:$0xff] %v3779_v13   ;;  %v3899_v63 = vpack.c.bf16 %v2313_v3, %v2312_v9  ;;  %v3176_v52 = vadd.f32 %v3175_v57, %v2313_v3 }
 0x1bc   :  { %v1043_v5 = vpop.f32.mrb[84].mxu0 }
 0x1bd   :  { %4078 = vst [vmem:[%s5804_s5 + $0xa0] sm:$0xff] %v3899_v63   ;;  %v1269_v26 = vadd.f32 %v5308_v14, %v1043_v5  ;;  %v1045_v32 = vpop.f32.mrb[85].mxu0 }
 0x1be   :  { %v1046_v27 = vpop.f32.mrb[86].mxu0  ;;  %v5588_v20 = vpop.f32.mrb[100].mxu1 }
 0x1bf   :  { %v2314_v56 = vmax.f32 %v1269_v26, 0.0  ;;  %2410 = vst [vmem:[%s5802_s3 + $0x150] sm:$0xff] %v1269_v26  ;;  %v1272_v10 = vadd.f32 %v5316_v28, %v1046_v27  ;;  %v1048_v58 = vpop.f32.mrb[87].mxu0  ;;  %v1767_v43 = vpop.f32.mrb[101].mxu1 }
 0x1c0   :  { %v5594_v30 = vpop.f32.mrb[102].mxu1 }
 0x1c1   :  { %v3177_v46 = vadd.f32 %v3176_v52, %v2314_v56  ;;  %v2315_v15 = vmax.f32 %v1272_v10, 0.0  ;;  %2411 = vst [vmem:[%s5802_s3 + $0x158] sm:$0xff] %v1272_v10  ;;  %v3784_v14 = vpack.c.bf16 %v1272_v10, %v1269_v26  ;;  %v1770_v62 = vpop.f32.mrb[103].mxu1 }
 0x1c3   :  { %4056 = vst [vmem:[%s5803_s4 + $0xa8] sm:$0xff] %v3784_v14   ;;  %v3904_v50 = vpack.c.bf16 %v2315_v15, %v2314_v56  ;;  %v3178_v6 = vadd.f32 %v3177_v46, %v2315_v15 }
 0x1c4   :  { %v1051_v44 = vpop.f32.mrb[88].mxu0 }
 0x1c5   :  { %4079 = vst [vmem:[%s5804_s5 + $0xa8] sm:$0xff] %v3904_v50   ;;  %v1277_v28 = vadd.f32 %v5338_v31, %v1051_v44  ;;  %v1053_v16 = vpop.f32.mrb[89].mxu0 }
 0x1c6   :  { %v1054_v61 = vpop.f32.mrb[90].mxu0  ;;  %v5606_v23 = vpop.f32.mrb[104].mxu1 }
 0x1c7   :  { %v2316_v18 = vmax.f32 %v1277_v28, 0.0  ;;  %2412 = vst [vmem:[%s5802_s3 + $0x160] sm:$0xff] %v1277_v28  ;;  %v1280_v49 = vadd.f32 %v5345_v22, %v1054_v61  ;;  %v1056_v55 = vpop.f32.mrb[91].mxu0  ;;  %v1775_v9 = vpop.f32.mrb[105].mxu1 }
 0x1c8   :  { %v5612_v37 = vpop.f32.mrb[106].mxu1 }
 0x1c9   :  { %v3179_v47 = vadd.f32 %v3178_v6, %v2316_v18  ;;  %v2317_v7 = vmax.f32 %v1280_v49, 0.0  ;;  %2413 = vst [vmem:[%s5802_s3 + $0x168] sm:$0xff] %v1280_v49  ;;  %v3789_v31 = vpack.c.bf16 %v1280_v49, %v1277_v28  ;;  %v1778_v57 = vpop.f32.mrb[107].mxu1 }
 0x1cb   :  { %4057 = vst [vmem:[%s5803_s4 + $0xb0] sm:$0xff] %v3789_v31   ;;  %v3909_v3 = vpack.c.bf16 %v2317_v7, %v2316_v18  ;;  %v3180_v13 = vadd.f32 %v3179_v47, %v2317_v7 }
 0x1cc   :  { %v1059_v41 = vpop.f32.mrb[92].mxu0 }
 0x1cd   :  { %4080 = vst [vmem:[%s5804_s5 + $0xb0] sm:$0xff] %v3909_v3   ;;  %v1285_v22 = vadd.f32 %v5332_v17, %v1059_v41  ;;  %v1061_v63 = vpop.f32.mrb[93].mxu0 }
 0x1ce   :  { %v1062_v52 = vpop.f32.mrb[94].mxu0  ;;  %v5624_v5 = vpop.f32.mrb[108].mxu1 }
 0x1cf   :  { %v2318_v26 = vmax.f32 %v1285_v22, 0.0  ;;  %2414 = vst [vmem:[%s5802_s3 + $0x170] sm:$0xff] %v1285_v22  ;;  %v1288_v32 = vadd.f32 %v5340_v33, %v1062_v52  ;;  %v1064_v27 = vpop.f32.mrb[95].mxu0  ;;  %v1783_v56 = vpop.f32.mrb[109].mxu1 }
 0x1d0   :  { %v5630_v10 = vpop.f32.mrb[110].mxu1 }
 0x1d1   :  { %v3181_v58 = vadd.f32 %v3180_v13, %v2318_v26  ;;  %v2319_v43 = vmax.f32 %v1288_v32, 0.0  ;;  %2415 = vst [vmem:[%s5802_s3 + $0x178] sm:$0xff] %v1288_v32  ;;  %v3794_v17 = vpack.c.bf16 %v1288_v32, %v1285_v22  ;;  %v1786_v46 = vpop.f32.mrb[111].mxu1 }
 0x1d3   :  { %4058 = vst [vmem:[%s5803_s4 + $0xb8] sm:$0xff] %v3794_v17   ;;  %v3914_v15 = vpack.c.bf16 %v2319_v43, %v2318_v26  ;;  %v3182_v14 = vadd.f32 %v3181_v58, %v2319_v43 }
 0x1d4   :  { %v4251_v62 = vpop.f32.mrb[96].mxu0 }
 0x1d5   :  { %4081 = vst [vmem:[%s5804_s5 + $0xb8] sm:$0xff] %v3914_v15   ;;  %v3183_v33 = vrot.slane %v3182_v14, 4  ;;  %v1895_v50 = vadd.f32 %v4251_v62, %v5372_v36  ;;  %v1886_v6 = vpop.f32.mrb[97].mxu0 }
 0x1d6   :  { %v1887_v44 = vadd.f32 %v1886_v6, %v5354_v54  ;;  %v4252_v28 = vpop.f32.mrb[98].mxu0  ;;  %v5643_v16 = vpop.f32.mrb[112].mxu1 }
 0x1d7   :  { %v3184_v61 = vadd.f32 %v3183_v33, %v3182_v14  ;;  %v1898_v18 = vadd.f32 %v4252_v28, %v5378_v42  ;;  %v1889_v49 = vpop.f32.mrb[99].mxu0  ;;  %v1791_v55 = vpop.f32.mrb[113].mxu1  ;;  %v2322_v31 = vmax.f32 %v1895_v50, 0.0 }
 0x1d8   :  { %v1890_v9 = vadd.f32 %v1889_v49, %v5360_v12  ;;  %v5647_v47 = vpop.f32.mrb[114].mxu1  ;;  %v2320_v36 = vmax.f32 %v1887_v44, 0.0 }
 0x1d9   :  { %v3185_v7 = vrot.slane %v3184_v61, 2  ;;  %v2323_v57 = vmax.f32 %v1898_v18, 0.0  ;;  %v1794_v3 = vpop.f32.mrb[115].mxu1 }
 0x1da   :  { %v2321_v13 = vmax.f32 %v1890_v9, 0.0 }
 0x1db   :  { %v3186_v41 = vadd.f32 %v3185_v7, %v3184_v61  ;;  %v3924_v54 = vpack.c.bf16 %v2323_v57, %v2322_v31 }
 0x1dc   :  { %v3919_v22 = vpack.c.bf16 %v2321_v13, %v2320_v36  ;;  %v3190_v63 = vadd.f32 %v2321_v13, %v2320_v36  ;;  %v4255_v52 = vpop.f32.mrb[100].mxu0 }
 0x1dd   :  { %v3187_v26 = vrot.slane %v3186_v41, 1  ;;  %4082 = vst [vmem:[%s5805_s6 + $0x8] sm:$0xff] %v3924_v54   ;;  %v1911_v12 = vadd.f32 %v4255_v52, %v5408_v0  ;;  %v1902_v42 = vpop.f32.mrb[101].mxu0 }
 0x1de   :  { %3920 = vst [vmem:[%s5805_s6] sm:$0xff] %v3919_v22   ;;  %v3191_v32 = vadd.f32 %v3190_v63, %v2322_v31  ;;  %v1903_v27 = vadd.f32 %v1902_v42, %v5390_v51  ;;  %v4256_v56 = vpop.f32.mrb[102].mxu0  ;;  %v5657_v58 = vpop.f32.mrb[116].mxu1 }
 0x1df   :  { %v3188_v43 = vadd.f32 %v3187_v26, %v3186_v41  ;;  %v1914_v17 = vadd.f32 %v4256_v56, %v5414_v45  ;;  %v1905_v46 = vpop.f32.mrb[103].mxu0  ;;  %v1799_v15 = vpop.f32.mrb[117].mxu1  ;;  %v2326_v50 = vmax.f32 %v1911_v12, 0.0 }
 0x1e0   :  { %v2324_v14 = vmax.f32 %v1903_v27, 0.0  ;;  %v3192_v62 = vadd.f32 %v3191_v32, %v2323_v57  ;;  %v1906_v0 = vadd.f32 %v1905_v46, %v5396_v11  ;;  %v5661_v33 = vpop.f32.mrb[118].mxu1 }
 0x1e1   :  { %3189 = vst [vmem:[%s5806_s7] sm:$0xff] %v3188_v43  ;;  %v2327_v51 = vmax.f32 %v1914_v17, 0.0  ;;  %v1802_v6 = vpop.f32.mrb[119].mxu1 }
 0x1e2   :  { %v3193_v44 = vadd.f32 %v3192_v62, %v2324_v14  ;;  %v2325_v28 = vmax.f32 %v1906_v0, 0.0 }
 0x1e3   :  { %v3934_v61 = vpack.c.bf16 %v2327_v51, %v2326_v50 }
 0x1e4   :  { %v3929_v18 = vpack.c.bf16 %v2325_v28, %v2324_v14  ;;  %v3194_v45 = vadd.f32 %v3193_v44, %v2325_v28  ;;  %v4259_v49 = vpop.f32.mrb[104].mxu0 }
 0x1e5   :  { %4084 = vst [vmem:[%s5805_s6 + $0x18] sm:$0xff] %v3934_v61   ;;  %v1927_v11 = vadd.f32 %v4259_v49, %v5444_v21  ;;  %v1918_v55 = vpop.f32.mrb[105].mxu0 }
 0x1e6   :  { %4083 = vst [vmem:[%s5805_s6 + $0x10] sm:$0xff] %v3929_v18   ;;  %v3195_v9 = vadd.f32 %v3194_v45, %v2326_v50  ;;  %v1919_v7 = vadd.f32 %v1918_v55, %v5426_v19  ;;  %v4260_v31 = vpop.f32.mrb[106].mxu0  ;;  %v5674_v57 = vpop.f32.mrb[120].mxu1 }
 0x1e7   :  { %v1930_v3 = vadd.f32 %v4260_v31, %v5450_v59  ;;  %v1921_v36 = vpop.f32.mrb[107].mxu0  ;;  %v1807_v13 = vpop.f32.mrb[121].mxu1  ;;  %v2330_v63 = vmax.f32 %v1927_v11, 0.0 }
 0x1e8   :  { %v2328_v41 = vmax.f32 %v1919_v7, 0.0  ;;  %v3196_v54 = vadd.f32 %v3195_v9, %v2327_v51  ;;  %v1922_v22 = vadd.f32 %v1921_v36, %v5432_v53  ;;  %v5678_v21 = vpop.f32.mrb[122].mxu1 }
 0x1e9   :  { %v2331_v52 = vmax.f32 %v1930_v3, 0.0  ;;  %v1810_v26 = vpop.f32.mrb[123].mxu1 }
 0x1ea   :  { %v3197_v12 = vadd.f32 %v3196_v54, %v2328_v41  ;;  %v2329_v42 = vmax.f32 %v1922_v22, 0.0 }
 0x1eb   :  { %v3944_v32 = vpack.c.bf16 %v2331_v52, %v2330_v63 }
 0x1ec   :  { %v3939_v19 = vpack.c.bf16 %v2329_v42, %v2328_v41  ;;  %v3198_v27 = vadd.f32 %v3197_v12, %v2329_v42  ;;  %v4263_v56 = vpop.f32.mrb[108].mxu0 }
 0x1ed   :  { %4086 = vst [vmem:[%s5805_s6 + $0x28] sm:$0xff] %v3944_v32   ;;  %v1943_v59 = vadd.f32 %v4263_v56, %v5480_v60  ;;  %v1934_v43 = vpop.f32.mrb[109].mxu0 }
 0x1ee   :  { %4085 = vst [vmem:[%s5805_s6 + $0x20] sm:$0xff] %v3939_v19   ;;  %v3199_v53 = vadd.f32 %v3198_v27, %v2330_v63  ;;  %v1935_v17 = vadd.f32 %v1934_v43, %v5462_v35  ;;  %v4264_v46 = vpop.f32.mrb[110].mxu0  ;;  %v5688_v15 = vpop.f32.mrb[124].mxu1 }
 0x1ef   :  { %v1946_v14 = vadd.f32 %v4264_v46, %v5486_v25  ;;  %v1937_v62 = vpop.f32.mrb[111].mxu0  ;;  %v1815_v0 = vpop.f32.mrb[125].mxu1  ;;  %v2334_v44 = vmax.f32 %v1943_v59, 0.0 }
 0x1f0   :  { %v2332_v50 = vmax.f32 %v1935_v17, 0.0  ;;  %v3200_v51 = vadd.f32 %v3199_v53, %v2331_v52  ;;  %v1938_v6 = vadd.f32 %v1937_v62, %v5468_v29  ;;  %v5692_v60 = vpop.f32.mrb[126].mxu1 }
 0x1f1   :  { %v2335_v28 = vmax.f32 %v1946_v14, 0.0  ;;  %v1818_v61 = vpop.f32.mrb[127].mxu1 }
 0x1f2   :  { %v3201_v18 = vadd.f32 %v3200_v51, %v2332_v50  ;;  %v2333_v45 = vmax.f32 %v1938_v6, 0.0 }
 0x1f3   :  { %v3954_v49 = vpack.c.bf16 %v2335_v28, %v2334_v44 }
 0x1f4   :  { %v3949_v35 = vpack.c.bf16 %v2333_v45, %v2332_v50  ;;  %v3202_v11 = vadd.f32 %v3201_v18, %v2333_v45  ;;  %v4267_v55 = vpop.f32.mrb[112].mxu0 }
 0x1f5   :  { %4088 = vst [vmem:[%s5805_s6 + $0x38] sm:$0xff] %v3954_v49   ;;  %v1959_v25 = vadd.f32 %v4267_v55, %v5516_v4  ;;  %v1950_v9 = vpop.f32.mrb[113].mxu0 }
 0x1f6   :  { %4087 = vst [vmem:[%s5805_s6 + $0x30] sm:$0xff] %v3949_v35   ;;  %v3203_v29 = vadd.f32 %v3202_v11, %v2334_v44  ;;  %v1951_v7 = vadd.f32 %v1950_v9, %v5498_v2  ;;  %v4268_v31 = vpop.f32.mrb[114].mxu0  ;;  %v5702_v3 = vpop.f32.mrb[128].mxu1 }
 0x1f7   :  { %v1962_v36 = vadd.f32 %v4268_v31, %v5522_v1  ;;  %v1953_v13 = vpop.f32.mrb[115].mxu0  ;;  %v1823_v41 = vpop.f32.mrb[129].mxu1  ;;  %v2338_v52 = vmax.f32 %v1959_v25, 0.0 }
 0x1f8   :  { %v2336_v54 = vmax.f32 %v1951_v7, 0.0  ;;  %v3204_v22 = vadd.f32 %v3203_v29, %v2335_v28  ;;  %v1954_v63 = vadd.f32 %v1953_v13, %v5504_v48  ;;  %v5706_v4 = vpop.f32.mrb[130].mxu1 }
 0x1f9   :  { %v2339_v26 = vmax.f32 %v1962_v36, 0.0  ;;  %v1826_v12 = vpop.f32.mrb[131].mxu1 }
 0x1fa   :  { %v3205_v42 = vadd.f32 %v3204_v22, %v2336_v54  ;;  %v2337_v32 = vmax.f32 %v1954_v63, 0.0 }
 0x1fb   :  { %v3964_v19 = vpack.c.bf16 %v2339_v26, %v2338_v52 }
 0x1fc   :  { %v3959_v2 = vpack.c.bf16 %v2337_v32, %v2336_v54  ;;  %v3206_v27 = vadd.f32 %v3205_v42, %v2337_v32  ;;  %v4271_v56 = vpop.f32.mrb[116].mxu0 }
 0x1fd   :  { %4090 = vst [vmem:[%s5805_s6 + $0x48] sm:$0xff] %v3964_v19   ;;  %v1975_v1 = vadd.f32 %v4271_v56, %v5552_v38  ;;  %v1966_v59 = vpop.f32.mrb[117].mxu0 }
 0x1fe   :  { %4089 = vst [vmem:[%s5805_s6 + $0x40] sm:$0xff] %v3959_v2   ;;  %v3207_v48 = vadd.f32 %v3206_v27, %v2338_v52  ;;  %v1967_v43 = vadd.f32 %v1966_v59, %v5534_v8  ;;  %v4272_v53 = vpop.f32.mrb[118].mxu0  ;;  %v5716_v17 = vpop.f32.mrb[132].mxu1 }
 0x1ff   :  { %v1978_v46 = vadd.f32 %v4272_v53, %v5558_v39  ;;  %v1969_v14 = vpop.f32.mrb[119].mxu0  ;;  %v1831_v62 = vpop.f32.mrb[133].mxu1  ;;  %v2342_v6 = vmax.f32 %v1975_v1, 0.0 }
 0x200   :  { %v2340_v0 = vmax.f32 %v1967_v43, 0.0  ;;  %v3208_v50 = vadd.f32 %v3207_v48, %v2339_v26  ;;  %v1970_v51 = vadd.f32 %v1969_v14, %v5540_v34  ;;  %v5720_v38 = vpop.f32.mrb[134].mxu1 }
 0x201   :  { %v2343_v44 = vmax.f32 %v1978_v46, 0.0  ;;  %v1834_v28 = vpop.f32.mrb[135].mxu1 }
 0x202   :  { %v3209_v61 = vadd.f32 %v3208_v50, %v2340_v0  ;;  %v2341_v18 = vmax.f32 %v1970_v51, 0.0 }
 0x203   :  { %v3974_v45 = vpack.c.bf16 %v2343_v44, %v2342_v6 }
 0x204   :  { %v3969_v8 = vpack.c.bf16 %v2341_v18, %v2340_v0  ;;  %v3210_v49 = vadd.f32 %v3209_v61, %v2341_v18  ;;  %v4275_v35 = vpop.f32.mrb[120].mxu0 }
 0x205   :  { %4092 = vst [vmem:[%s5805_s6 + $0x58] sm:$0xff] %v3974_v45   ;;  %v1991_v39 = vadd.f32 %v4275_v35, %v5588_v20  ;;  %v1982_v11 = vpop.f32.mrb[121].mxu0 }
 0x206   :  { %4091 = vst [vmem:[%s5805_s6 + $0x50] sm:$0xff] %v3969_v8   ;;  %v3211_v34 = vadd.f32 %v3210_v49, %v2342_v6  ;;  %v1983_v55 = vadd.f32 %v1982_v11, %v5570_v24  ;;  %v4276_v25 = vpop.f32.mrb[122].mxu0  ;;  %v5730_v9 = vpop.f32.mrb[136].mxu1 }
 0x207   :  { %v1994_v29 = vadd.f32 %v4276_v25, %v5594_v30  ;;  %v1985_v7 = vpop.f32.mrb[123].mxu0  ;;  %v1839_v31 = vpop.f32.mrb[137].mxu1  ;;  %v2346_v54 = vmax.f32 %v1991_v39, 0.0 }
 0x208   :  { %v2344_v36 = vmax.f32 %v1983_v55, 0.0  ;;  %v3212_v13 = vadd.f32 %v3211_v34, %v2343_v44  ;;  %v1986_v41 = vadd.f32 %v1985_v7, %v5576_v40  ;;  %v5734_v20 = vpop.f32.mrb[138].mxu1 }
 0x209   :  { %v2347_v22 = vmax.f32 %v1994_v29, 0.0  ;;  %v1842_v63 = vpop.f32.mrb[139].mxu1 }
 0x20a   :  { %v3213_v52 = vadd.f32 %v3212_v13, %v2344_v36  ;;  %v2345_v26 = vmax.f32 %v1986_v41, 0.0 }
 0x20b   :  { %v3984_v12 = vpack.c.bf16 %v2347_v22, %v2346_v54 }
 0x20c   :  { %v3979_v24 = vpack.c.bf16 %v2345_v26, %v2344_v36  ;;  %v3214_v42 = vadd.f32 %v3213_v52, %v2345_v26  ;;  %v4279_v32 = vpop.f32.mrb[124].mxu0 }
 0x20d   :  { %4094 = vst [vmem:[%s5805_s6 + $0x68] sm:$0xff] %v3984_v12   ;;  %v2007_v30 = vadd.f32 %v4279_v32, %v5624_v5  ;;  %v1998_v19 = vpop.f32.mrb[125].mxu0 }
 0x20e   :  { %4093 = vst [vmem:[%s5805_s6 + $0x60] sm:$0xff] %v3979_v24   ;;  %v3215_v40 = vadd.f32 %v3214_v42, %v2346_v54  ;;  %v1999_v2 = vadd.f32 %v1998_v19, %v5606_v23  ;;  %v4280_v27 = vpop.f32.mrb[126].mxu0  ;;  %v1845_v56 = vpop.f32.mrb[140].mxu1 }
 0x20f   :  { %v2010_v1 = vadd.f32 %v4280_v27, %v5630_v10  ;;  %v2001_v59 = vpop.f32.mrb[127].mxu0  ;;  %v1847_v48 = vpop.f32.mrb[141].mxu1  ;;  %v2350_v5 = vmax.f32 %v2007_v30, 0.0 }
 0x210   :  { %v2348_v43 = vmax.f32 %v1999_v2, 0.0  ;;  %v3216_v53 = vadd.f32 %v3215_v40, %v2347_v22  ;;  %v2002_v46 = vadd.f32 %v2001_v59, %v5612_v37  ;;  %v5746_v14 = vpop.f32.mrb[142].mxu1 }
 0x211   :  { %v2351_v62 = vmax.f32 %v2010_v1, 0.0  ;;  %v1850_v0 = vpop.f32.mrb[143].mxu1 }
 0x212   :  { %v3217_v50 = vadd.f32 %v3216_v53, %v2348_v43  ;;  %v2349_v51 = vmax.f32 %v2002_v46, 0.0 }
 0x213   :  { %v3994_v6 = vpack.c.bf16 %v2351_v62, %v2350_v5 }
 0x214   :  { %v3989_v44 = vpack.c.bf16 %v2349_v51, %v2348_v43  ;;  %v3218_v23 = vadd.f32 %v3217_v50, %v2349_v51  ;;  %v4283_v28 = vpop.f32.mrb[128].mxu0 }
 0x215   :  { %4096 = vst [vmem:[%s5805_s6 + $0x78] sm:$0xff] %v3994_v6   ;;  %v2023_v10 = vadd.f32 %v4283_v28, %v5657_v58  ;;  %v2014_v61 = vpop.f32.mrb[129].mxu0 }
 0x216   :  { %4095 = vst [vmem:[%s5805_s6 + $0x70] sm:$0xff] %v3989_v44   ;;  %v3219_v37 = vadd.f32 %v3218_v23, %v2350_v5  ;;  %v2015_v18 = vadd.f32 %v2014_v61, %v5643_v16  ;;  %v4291_v45 = vpop.f32.mrb[144].mxu1  ;;  %v4284_v8 = vpop.f32.mrb[130].mxu0 }
 0x217   :  { %v5757_v49 = vadd.f32 %v4291_v45, %v5716_v17  ;;  %v2026_v35 = vadd.f32 %v4284_v8, %v5661_v33  ;;  %v2046_v39 = vpop.f32.mrb[145].mxu1  ;;  %v2017_v11 = vpop.f32.mrb[131].mxu0  ;;  %v2354_v7 = vmax.f32 %v2023_v10, 0.0 }
 0x218   :  { %v2352_v34 = vmax.f32 %v2015_v18, 0.0  ;;  %v3220_v55 = vadd.f32 %v3219_v37, %v2351_v62  ;;  %v2047_v58 = vadd.f32 %v2046_v39, %v5702_v3  ;;  %v2018_v25 = vadd.f32 %v2017_v11, %v5647_v47  ;;  %v4292_v29 = vpop.f32.mrb[146].mxu1 }
 0x219   :  { %v2355_v31 = vmax.f32 %v2026_v35, 0.0  ;;  %v2058_v16 = vadd.f32 %v4292_v29, %v5720_v38  ;;  %v2049_v36 = vpop.f32.mrb[147].mxu1  ;;  %v2362_v33 = vmax.f32 %v5757_v49, 0.0 }
 0x21a   :  { %v3221_v13 = vadd.f32 %v3220_v55, %v2352_v34  ;;  %v2353_v41 = vmax.f32 %v2018_v25, 0.0  ;;  %v2050_v17 = vadd.f32 %v2049_v36, %v5706_v4  ;;  %v2360_v63 = vmax.f32 %v2047_v58, 0.0 }
 0x21b   :  { %v4004_v54 = vpack.c.bf16 %v2355_v31, %v2354_v7  ;;  %v2363_v22 = vmax.f32 %v2058_v16, 0.0 }
 0x21c   :  { %v3999_v52 = vpack.c.bf16 %v2353_v41, %v2352_v34  ;;  %v3222_v26 = vadd.f32 %v3221_v13, %v2353_v41  ;;  %v2361_v3 = vmax.f32 %v2050_v17, 0.0  ;;  %v4287_v12 = vpop.f32.mrb[132].mxu0 }
 0x21d   :  { %4098 = vst [vmem:[%s5805_s6 + $0x88] sm:$0xff] %v4004_v54   ;;  %v4024_v47 = vpack.c.bf16 %v2363_v22, %v2362_v33  ;;  %v2039_v38 = vadd.f32 %v4287_v12, %v5688_v15  ;;  %v2030_v24 = vpop.f32.mrb[133].mxu0 }
 0x21e   :  { %4097 = vst [vmem:[%s5805_s6 + $0x80] sm:$0xff] %v3999_v52   ;;  %v3223_v4 = vadd.f32 %v3222_v26, %v2354_v7  ;;  %v4019_v42 = vpack.c.bf16 %v2361_v3, %v2360_v63  ;;  %v2031_v32 = vadd.f32 %v2030_v24, %v5674_v57  ;;  %v4295_v30 = vpop.f32.mrb[148].mxu1  ;;  %v4288_v19 = vpop.f32.mrb[134].mxu0 }
 0x21f   :  { %4102 = vst [vmem:[%s5805_s6 + $0xa8] sm:$0xff] %v4024_v47   ;;  %v2071_v40 = vadd.f32 %v4295_v30, %v1845_v56  ;;  %v2042_v2 = vadd.f32 %v4288_v19, %v5692_v60  ;;  %v2062_v27 = vpop.f32.mrb[149].mxu1  ;;  %v2033_v15 = vpop.f32.mrb[135].mxu0  ;;  %v2358_v53 = vmax.f32 %v2039_v38, 0.0 }
 0x220   :  { %4101 = vst [vmem:[%s5805_s6 + $0xa0] sm:$0xff] %v4019_v42   ;;  %v2356_v1 = vmax.f32 %v2031_v32, 0.0  ;;  %v3224_v59 = vadd.f32 %v3223_v4, %v2355_v31  ;;  %v2063_v48 = vadd.f32 %v2062_v27, %v5730_v9  ;;  %v2034_v57 = vadd.f32 %v2033_v15, %v5678_v21  ;;  %v4296_v43 = vpop.f32.mrb[150].mxu1 }
 0x221   :  { %v2359_v46 = vmax.f32 %v2042_v2, 0.0  ;;  %v2074_v5 = vadd.f32 %v4296_v43, %v5746_v14  ;;  %v2065_v56 = vpop.f32.mrb[151].mxu1  ;;  %v2366_v50 = vmax.f32 %v2071_v40, 0.0 }
 0x222   :  { %v3225_v62 = vadd.f32 %v3224_v59, %v2356_v1  ;;  %v2357_v60 = vmax.f32 %v2034_v57, 0.0  ;;  %v2066_v0 = vadd.f32 %v2065_v56, %v5734_v20  ;;  %v2364_v44 = vmax.f32 %v2063_v48, 0.0 }
 0x223   :  { %v4014_v51 = vpack.c.bf16 %v2359_v46, %v2358_v53  ;;  %v2367_v6 = vmax.f32 %v2074_v5, 0.0 }
 0x224   :  { %v4009_v23 = vpack.c.bf16 %v2357_v60, %v2356_v1  ;;  %v3226_v28 = vadd.f32 %v3225_v62, %v2357_v60  ;;  %v2365_v10 = vmax.f32 %v2066_v0, 0.0 }
 0x225   :  { %4100 = vst [vmem:[%s5805_s6 + $0x98] sm:$0xff] %v4014_v51   ;;  %v4034_v21 = vpack.c.bf16 %v2367_v6, %v2366_v50 }
 0x226   :  { %4099 = vst [vmem:[%s5805_s6 + $0x90] sm:$0xff] %v4009_v23   ;;  %v3227_v9 = vadd.f32 %v3226_v28, %v2358_v53  ;;  %v4029_v14 = vpack.c.bf16 %v2365_v10, %v2364_v44 }
 0x227   :  { %4104 = vst [vmem:[%s5805_s6 + $0xb8] sm:$0xff] %v4034_v21  }
 0x228   :  { %v3228_v20 = vadd.f32 %v3227_v9, %v2359_v46  ;;  %4103 = vst [vmem:[%s5805_s6 + $0xb0] sm:$0xff] %v4029_v14  }
 0x22a   :  { %v3229_v61 = vadd.f32 %v3228_v20, %v2360_v63 }
 0x22c   :  { %v3230_v37 = vadd.f32 %v3229_v61, %v2361_v3 }
 0x22e   :  { %v3231_v18 = vadd.f32 %v3230_v37, %v2362_v33 }
 0x230   :  { %v3232_v45 = vadd.f32 %v3231_v18, %v2363_v22 }
 0x232   :  { %v3233_v8 = vadd.f32 %v3232_v45, %v2364_v44 }
 0x234   :  { %v3234_v49 = vadd.f32 %v3233_v8, %v2365_v10 }
 0x236   :  { %v3235_v35 = vadd.f32 %v3234_v49, %v2366_v50 }
 0x238   :  { %v3236_v39 = vadd.f32 %v3235_v35, %v2367_v6 }
 0x23a   :  { %v3237_v11 = vrot.slane %v3236_v39, 4 }
 0x23c   :  { %v3238_v34 = vadd.f32 %v3237_v11, %v3236_v39 }
 0x23e   :  { %v3239_v55 = vrot.slane %v3238_v34, 2 }
 0x240   :  { %v3240_v58 = vadd.f32 %v3239_v55, %v3238_v34 }
 0x242   :  { %v3241_v25 = vrot.slane %v3240_v58, 1 }
 0x244   :  { %v3242_v29 = vadd.f32 %v3241_v25, %v3240_v58 }
 0x246   :  { %3243 = vst [vmem:[%s5807_s8] sm:$0xff] %v3242_v29 }

</bundles_post_ra>
